<compile_context>
chip_gen: v7x
topology: tpu7x:2x2x1
jax: 0.10.0
libtpu: 0.0.40
codegen_flags: <defaults>
</compile_context>

<pallas_src>
import math

import jax
import jax.numpy as jnp
from jax.experimental import pallas as pl
from jax.experimental.pallas import tpu as pltpu

NUM_TASKS = 8
IN_F = 15
H1 = 512
H2 = 256
H3 = 128
NEG_SLOPE = 0.01  # F.leaky_relu default


def _round_up(n, m):
    return ((n + m - 1) // m) * m


def _cdiv(a, b):
    return -(-a // b)


def _leaky_relu(x):
    return jnp.where(x > 0, x, NEG_SLOPE * x)


def multitask_mlp_kernel(x_ref, w1_ref, b1_ref, w2_ref, b2_ref,
                         w3_ref, b3_ref, w4_ref, b4_ref, out_ref):
    mm_dtype = w1_ref.dtype  # bf16 (fast path) or f32 (exact path)

    # Shared layer: (TB, 15) @ (15, 512) -> (TB, 512), f32 accumulation.
    x = x_ref[...].astype(mm_dtype)
    h1 = jnp.dot(x, w1_ref[...], preferred_element_type=jnp.float32) + b1_ref[...]
    h1 = _leaky_relu(h1).astype(mm_dtype)
    # Dropout(0.5): identity at inference.
    # TODO(synk): training-mode dropout (pltpu.prng_seed/prng_random_bits) not emitted.

    # Fused task layer 2: one wide matmul (TB, 512) @ (512, 2048).
    # Bias + activation + cast in ONE pass -> single live image of h2.
    h2 = jnp.dot(h1, w2_ref[...], preferred_element_type=jnp.float32)
    h2 = _leaky_relu(h2 + b2_ref[...]).astype(mm_dtype)          # (TB, 2048)

    # Per-task layers 3 + 4, fully fused per task.  Layer 4 runs on VPU (mul)
    # + XLU (lane reduce); the scalar column is placed lane-dense via a
    # one-hot broadcast-multiply.  No h3 materialization, no concat, no
    # block-diagonal MXU matmul.
    acc = jnp.zeros(out_ref.shape, jnp.float32)                  # (TB, 8)
    lane = jax.lax.broadcasted_iota(jnp.int32, (1, NUM_TASKS), 1)
    for i in range(NUM_TASKS):
        hi = h2[:, i * H2:(i + 1) * H2]                          # 256-aligned static slice
        t = jnp.dot(hi, w3_ref[i], preferred_element_type=jnp.float32) + b3_ref[i]
        t = _leaky_relu(t)                                       # (TB, 128) f32
        col = jnp.sum(t * w4_ref[i], axis=-1, keepdims=True)     # (TB, 1), VPU+XLU
        acc = acc + col * (lane == i).astype(jnp.float32)        # write lane i

    out_ref[...] = jax.nn.sigmoid(acc + b4_ref[...]).astype(out_ref.dtype)


def prepare_params(params, matmul_dtype=jnp.bfloat16):
    """Repack PyTorch-style per-task params into the fused kernel layout."""
    w1, b1, w2, b2, w3, b3, w4, b4 = params
    w1p = w1.astype(matmul_dtype)                                    # (15, 512)
    b1p = b1.reshape(1, H1).astype(jnp.float32)                      # (1, 512)
    # Concatenate the 8 layer-2 heads along N: (512, 8*256).
    w2p = jnp.transpose(w2, (1, 0, 2)).reshape(H1, NUM_TASKS * H2).astype(matmul_dtype)
    b2p = b2.reshape(1, NUM_TASKS * H2).astype(jnp.float32)          # (1, 2048)
    w3p = w3.astype(matmul_dtype)                                    # (8, 256, 128)
    b3p = b3.reshape(NUM_TASKS, 1, H3).astype(jnp.float32)           # (8, 1, 128)
    # Layer-4 weights kept as f32 rows for the VPU multiply + lane reduce.
    w4p = jnp.transpose(w4, (0, 2, 1)).astype(jnp.float32)           # (8, 1, 128)
    b4p = b4.reshape(1, NUM_TASKS).astype(jnp.float32)               # (1, 8)
    return (w1p, b1p, w2p, b2p, w3p, b3p, w4p, b4p)


def _tpu_vmem_capacity_bytes():
    try:
        return int(pltpu.get_tpu_info().vmem_capacity_bytes)
    except Exception:
        return 64 * 1024 * 1024  # conservative: v7x per-TensorCore VMEM


def _default_tiling(B):
    vmem_cap = _tpu_vmem_capacity_bytes()
    # ~75% of physical VMEM: 96 MiB on 128-MiB chips (v5e/v6e), 48 MiB on v7x.
    vmem_limit = min(96 * 1024 * 1024, (vmem_cap * 3) // 4)
    max_tile = 1024 if vmem_cap >= 100 * 1024 * 1024 else 512
    if B <= 16:
        tile_b = _round_up(max(B, 8), 8)
    else:
        # >=2 grid steps (v7x has 2 TensorCores; the "parallel" batch axis
        # shards across them) while minimizing padded rows for awkward B.
        n_tiles = max(2, _cdiv(B, max_tile))
        tile_b = min(max_tile, _round_up(_cdiv(B, n_tiles), 8))
    return tile_b, vmem_limit


def multitask_mlp_forward(x, prepared_params, *, tile_b=None, vmem_limit_bytes=None):
    (w1, b1, w2, b2, w3, b3, w4, b4) = prepared_params
    B = x.shape[0]
    auto_tile, auto_vmem = _default_tiling(B)
    if tile_b is None:
        tile_b = auto_tile
    if vmem_limit_bytes is None:
        vmem_limit_bytes = auto_vmem
    assert tile_b % 8 == 0, "tile_b must be a multiple of 8 (sublane)"

    grid_steps = _cdiv(B, tile_b)
    Bp = grid_steps * tile_b
    if Bp != B:
        x = jnp.pad(x, ((0, Bp - B), (0, 0)))

    const2 = lambda i: (0, 0)
    const3 = lambda i: (0, 0, 0)

    out = pl.pallas_call(
        multitask_mlp_kernel,
        out_shape=jax.ShapeDtypeStruct((Bp, NUM_TASKS), jnp.float32),
        grid=(grid_steps,),
        in_specs=[
            pl.BlockSpec((tile_b, IN_F), lambda i: (i, 0)),          # x
            pl.BlockSpec((IN_F, H1), const2),                        # w1
            pl.BlockSpec((1, H1), const2),                           # b1
            pl.BlockSpec((H1, NUM_TASKS * H2), const2),              # w2 (fused)
            pl.BlockSpec((1, NUM_TASKS * H2), const2),               # b2 (fused)
            pl.BlockSpec((NUM_TASKS, H2, H3), const3),               # w3
            pl.BlockSpec((NUM_TASKS, 1, H3), const3),                # b3
            pl.BlockSpec((NUM_TASKS, 1, H3), const3),                # w4 rows (f32)
            pl.BlockSpec((1, NUM_TASKS), const2),                    # b4
        ],
        out_specs=pl.BlockSpec((tile_b, NUM_TASKS), lambda i: (i, 0)),
        compiler_params=pltpu.CompilerParams(
            dimension_semantics=("parallel",),       # megacore sharding on v7x
            vmem_limit_bytes=int(vmem_limit_bytes),
        ),
    )(x, w1, b1, w2, b2, w3, b3, w4, b4)
    return out[:B]


def _kaiming_linear(key, fan_in, fan_out):
    # nn.init.kaiming_normal_ defaults: fan_in mode, leaky_relu gain sqrt(2)
    std = math.sqrt(2.0 / fan_in)
    w = std * jax.random.normal(key, (fan_in, fan_out), dtype=jnp.float32)
    b = jnp.zeros((fan_out,), dtype=jnp.float32)
    return w, b


def init_params(key):
    keys = jax.random.split(key, 1 + 3 * NUM_TASKS)
    w1, b1 = _kaiming_linear(keys[0], IN_F, H1)

    w2_list, b2_list, w3_list, b3_list, w4_list, b4_list = [], [], [], [], [], []
    for i in range(NUM_TASKS):
        w2, b2 = _kaiming_linear(keys[1 + 3 * i], H1, H2)
        w3, b3 = _kaiming_linear(keys[2 + 3 * i], H2, H3)
        w4, b4 = _kaiming_linear(keys[3 + 3 * i], H3, 1)
        w2_list.append(w2); b2_list.append(b2)
        w3_list.append(w3); b3_list.append(b3)
        w4_list.append(w4); b4_list.append(b4)

    w2 = jnp.stack(w2_list)          # (8, 512, 256)
    b2 = jnp.stack(b2_list)          # (8, 256)
    w3 = jnp.stack(w3_list)          # (8, 256, 128)
    b3 = jnp.stack(b3_list)          # (8, 128)
    w4 = jnp.stack(w4_list)          # (8, 128, 1)
    b4 = jnp.stack(b4_list)          # (8, 1)
    return (w1, b1, w2, b2, w3, b3, w4, b4)


def reference_forward(x, params):
    (w1, b1, w2, b2, w3, b3, w4, b4) = params
    dot = lambda a, b: jnp.dot(a, b, precision=jax.lax.Precision.HIGHEST)
    h = jax.nn.leaky_relu(dot(x, w1) + b1, NEG_SLOPE)
    outs = []
    for i in range(NUM_TASKS):
        t = jax.nn.leaky_relu(dot(h, w2[i]) + b2[i], NEG_SLOPE)
        t = jax.nn.leaky_relu(dot(t, w3[i]) + b3[i], NEG_SLOPE)
        outs.append(jax.nn.sigmoid(dot(t, w4[i]) + b4[i]))
    return jnp.concatenate(outs, axis=-1)


if __name__ == "__main__":
    key = jax.random.PRNGKey(0)
    pkey, xkey, xkey2 = jax.random.split(key, 3)

    params = init_params(pkey)

    # Small deterministic input: batch=8, 15 features (as the module implies).
    x = jax.random.normal(xkey, (8, IN_F), dtype=jnp.float32)
    ref = jax.block_until_ready(reference_forward(x, params))

    # Exact path (f32 matmul operands): tight check against the reference.
    p_f32 = prepare_params(params, jnp.float32)
    out_f32 = jax.block_until_ready(multitask_mlp_forward(x, p_f32))
    assert out_f32.shape == (8, NUM_TASKS), out_f32.shape
    assert jnp.allclose(out_f32, ref, atol=1e-4, rtol=1e-4), \
        f"f32 max abs err {jnp.max(jnp.abs(out_f32 - ref))}"

    # Fast path (bf16 matmul operands, f32 accumulation): loose check.
    p_bf16 = prepare_params(params, jnp.bfloat16)
    out_bf16 = jax.block_until_ready(multitask_mlp_forward(x, p_bf16))
    assert out_bf16.shape == (8, NUM_TASKS), out_bf16.shape
    assert jnp.allclose(out_bf16, ref, atol=5e-2), \
        f"bf16 max abs err {jnp.max(jnp.abs(out_bf16 - ref))}"

    # Larger batch exercising the batch grid + padding (300 -> 384, grid=3).
    xb = jax.random.normal(xkey2, (300, IN_F), dtype=jnp.float32)
    refb = jax.block_until_ready(reference_forward(xb, params))
    outb = jax.block_until_ready(multitask_mlp_forward(xb, p_f32, tile_b=128))
    assert outb.shape == (300, NUM_TASKS), outb.shape
    assert jnp.allclose(outb, refb, atol=1e-4, rtol=1e-4), \
        f"grid f32 max abs err {jnp.max(jnp.abs(outb - refb))}"

    # Same batch through the generation-aware default tiling (>=2 grid steps).
    outd = jax.block_until_ready(multitask_mlp_forward(xb, p_bf16))
    assert outd.shape == (300, NUM_TASKS), outd.shape
    assert jnp.allclose(outd, refb, atol=5e-2), \
        f"default-tile bf16 max abs err {jnp.max(jnp.abs(outd - refb))}"

    print("KERNEL_OK")
</pallas_src>

<mosaic_0001>
module attributes {stable_mosaic.version = 11 : i64} {
  func.func @multitask_mlp_kernel(%arg0: i32, %arg1: memref<8x15xf32, #tpu.memory_space<vmem>>, %arg2: memref<15x512xf32, #tpu.memory_space<vmem>>, %arg3: memref<1x512xf32, #tpu.memory_space<vmem>>, %arg4: memref<512x2048xf32, #tpu.memory_space<vmem>>, %arg5: memref<1x2048xf32, #tpu.memory_space<vmem>>, %arg6: memref<8x256x128xf32, #tpu.memory_space<vmem>>, %arg7: memref<8x1x128xf32, #tpu.memory_space<vmem>>, %arg8: memref<8x1x128xf32, #tpu.memory_space<vmem>>, %arg9: memref<1x8xf32, #tpu.memory_space<vmem>>, %arg10: memref<8x8xf32, #tpu.memory_space<vmem>>) attributes {dimension_semantics = [#tpu.dimension_semantics<parallel>], iteration_bounds = array<i64: 1>, scalar_prefetch = 0 : i64, scratch_operands = 0 : i64, tpu.core_type = #tpu.core_type<tc>, window_params = [{transform_indices = @transform_0, window_bounds = array<i64: 8, 15>}, {pipeline_mode = #tpu.pipeline_mode<synchronous>, transform_indices = @transform_1, window_bounds = array<i64: 15, 512>}, {pipeline_mode = #tpu.pipeline_mode<synchronous>, transform_indices = @transform_2, window_bounds = array<i64: 1, 512>}, {pipeline_mode = #tpu.pipeline_mode<synchronous>, transform_indices = @transform_3, window_bounds = array<i64: 512, 2048>}, {pipeline_mode = #tpu.pipeline_mode<synchronous>, transform_indices = @transform_4, window_bounds = array<i64: 1, 2048>}, {pipeline_mode = #tpu.pipeline_mode<synchronous>, transform_indices = @transform_5, window_bounds = array<i64: 8, 256, 128>}, {pipeline_mode = #tpu.pipeline_mode<synchronous>, transform_indices = @transform_6, window_bounds = array<i64: 8, 1, 128>}, {pipeline_mode = #tpu.pipeline_mode<synchronous>, transform_indices = @transform_7, window_bounds = array<i64: 8, 1, 128>}, {pipeline_mode = #tpu.pipeline_mode<synchronous>, transform_indices = @transform_8, window_bounds = array<i64: 1, 8>}, {transform_indices = @transform_9, window_bounds = array<i64: 8, 8>}]} {
    %c0 = arith.constant 0 : index
    %c0_0 = arith.constant 0 : index
    %0 = vector.load %arg1[%c0, %c0_0] : memref<8x15xf32, #tpu.memory_space<vmem>>, vector<8x15xf32>
    %c0_1 = arith.constant 0 : index
    %c0_2 = arith.constant 0 : index
    %1 = vector.load %arg2[%c0_1, %c0_2] : memref<15x512xf32, #tpu.memory_space<vmem>>, vector<15x512xf32>
    %cst = arith.constant dense<0.000000e+00> : vector<8x512xf32>
    %2 = tpu.matmul %0, %1, %cst {dimension_numbers = #tpu.dot_dimension_numbers<[1], [0], [0], [1], [0, 0, 1, 1], [], []>} : vector<8x15xf32>, vector<15x512xf32>, vector<8x512xf32> -> vector<8x512xf32>
    %c0_3 = arith.constant 0 : index
    %c0_4 = arith.constant 0 : index
    %3 = vector.load %arg3[%c0_3, %c0_4] : memref<1x512xf32, #tpu.memory_space<vmem>>, vector<1x512xf32>
    %4 = vector.broadcast %3 : vector<1x512xf32> to vector<8x512xf32>
    %5 = arith.addf %2, %4 : vector<8x512xf32>
    %cst_5 = arith.constant 0.000000e+00 : f32
    %6 = vector.broadcast %cst_5 : f32 to vector<8x512xf32>
    %7 = arith.cmpf ogt, %5, %6 : vector<8x512xf32>
    %cst_6 = arith.constant 0.00999999977 : f32
    %8 = vector.broadcast %cst_6 : f32 to vector<8x512xf32>
    %9 = arith.mulf %8, %5 : vector<8x512xf32>
    %10 = arith.select %7, %5, %9 : vector<8x512xi1>, vector<8x512xf32>
    %c0_7 = arith.constant 0 : index
    %c0_8 = arith.constant 0 : index
    %11 = vector.load %arg4[%c0_7, %c0_8] : memref<512x2048xf32, #tpu.memory_space<vmem>>, vector<512x2048xf32>
    %cst_9 = arith.constant dense<0.000000e+00> : vector<8x2048xf32>
    %12 = tpu.matmul %10, %11, %cst_9 {dimension_numbers = #tpu.dot_dimension_numbers<[1], [0], [0], [1], [0, 0, 1, 1], [], []>} : vector<8x512xf32>, vector<512x2048xf32>, vector<8x2048xf32> -> vector<8x2048xf32>
    %c0_10 = arith.constant 0 : index
    %c0_11 = arith.constant 0 : index
    %13 = vector.load %arg5[%c0_10, %c0_11] : memref<1x2048xf32, #tpu.memory_space<vmem>>, vector<1x2048xf32>
    %14 = vector.broadcast %13 : vector<1x2048xf32> to vector<8x2048xf32>
    %15 = arith.addf %12, %14 : vector<8x2048xf32>
    %cst_12 = arith.constant 0.000000e+00 : f32
    %16 = vector.broadcast %cst_12 : f32 to vector<8x2048xf32>
    %17 = arith.cmpf ogt, %15, %16 : vector<8x2048xf32>
    %cst_13 = arith.constant 0.00999999977 : f32
    %18 = vector.broadcast %cst_13 : f32 to vector<8x2048xf32>
    %19 = arith.mulf %18, %15 : vector<8x2048xf32>
    %20 = arith.select %17, %15, %19 : vector<8x2048xi1>, vector<8x2048xf32>
    %cst_14 = arith.constant 0.000000e+00 : f32
    %21 = vector.broadcast %cst_14 : f32 to vector<8x8xf32>
    %22 = tpu.iota {dimensions = array<i32: 1>} : vector<1x8xi32>
    %23 = vector.extract_strided_slice %20 {offsets = [0, 0], sizes = [8, 256], strides = [1, 1]} : vector<8x2048xf32> to vector<8x256xf32>
    %c0_15 = arith.constant 0 : index
    %c0_16 = arith.constant 0 : index
    %c0_17 = arith.constant 0 : index
    %24 = vector.load %arg6[%c0_15, %c0_16, %c0_17] : memref<8x256x128xf32, #tpu.memory_space<vmem>>, vector<1x256x128xf32>
    %25 = vector.shape_cast %24 : vector<1x256x128xf32> to vector<256x128xf32>
    %cst_18 = arith.constant dense<0.000000e+00> : vector<8x128xf32>
    %26 = tpu.matmul %23, %25, %cst_18 {dimension_numbers = #tpu.dot_dimension_numbers<[1], [0], [0], [1], [0, 0, 1, 1], [], []>} : vector<8x256xf32>, vector<256x128xf32>, vector<8x128xf32> -> vector<8x128xf32>
    %c0_19 = arith.constant 0 : index
    %c0_20 = arith.constant 0 : index
    %c0_21 = arith.constant 0 : index
    %27 = vector.load %arg7[%c0_19, %c0_20, %c0_21] : memref<8x1x128xf32, #tpu.memory_space<vmem>>, vector<1x1x128xf32>
    %28 = vector.shape_cast %27 : vector<1x1x128xf32> to vector<1x128xf32>
    %29 = vector.broadcast %28 : vector<1x128xf32> to vector<8x128xf32>
    %30 = arith.addf %26, %29 : vector<8x128xf32>
    %cst_22 = arith.constant 0.000000e+00 : f32
    %31 = vector.broadcast %cst_22 : f32 to vector<8x128xf32>
    %32 = arith.cmpf ogt, %30, %31 : vector<8x128xf32>
    %cst_23 = arith.constant 0.00999999977 : f32
    %33 = vector.broadcast %cst_23 : f32 to vector<8x128xf32>
    %34 = arith.mulf %33, %30 : vector<8x128xf32>
    %35 = arith.select %32, %30, %34 : vector<8x128xi1>, vector<8x128xf32>
    %c0_24 = arith.constant 0 : index
    %c0_25 = arith.constant 0 : index
    %c0_26 = arith.constant 0 : index
    %36 = vector.load %arg8[%c0_24, %c0_25, %c0_26] : memref<8x1x128xf32, #tpu.memory_space<vmem>>, vector<1x1x128xf32>
    %37 = vector.shape_cast %36 : vector<1x1x128xf32> to vector<1x128xf32>
    %38 = vector.broadcast %37 : vector<1x128xf32> to vector<8x128xf32>
    %39 = arith.mulf %35, %38 : vector<8x128xf32>
    %cst_27 = arith.constant dense<0.000000e+00> : vector<8xf32>
    %40 = vector.multi_reduction <add>, %39, %cst_27 [1] : vector<8x128xf32> to vector<8xf32>
    %41 = vector.shape_cast %40 : vector<8xf32> to vector<8x1xf32>
    %c0_i32 = arith.constant 0 : i32
    %42 = vector.broadcast %c0_i32 : i32 to vector<1x8xi32>
    %43 = arith.cmpi eq, %22, %42 : vector<1x8xi32>
    %44 = arith.extui %43 : vector<1x8xi1> to vector<1x8xi32>
    %45 = arith.sitofp %44 : vector<1x8xi32> to vector<1x8xf32>
    %46 = vector.broadcast %41 : vector<8x1xf32> to vector<8x8xf32>
    %47 = vector.broadcast %45 : vector<1x8xf32> to vector<8x8xf32>
    %48 = arith.mulf %46, %47 : vector<8x8xf32>
    %49 = arith.addf %21, %48 : vector<8x8xf32>
    %50 = vector.extract_strided_slice %20 {offsets = [0, 256], sizes = [8, 256], strides = [1, 1]} : vector<8x2048xf32> to vector<8x256xf32>
    %c1 = arith.constant 1 : index
    %c0_28 = arith.constant 0 : index
    %c0_29 = arith.constant 0 : index
    %51 = vector.load %arg6[%c1, %c0_28, %c0_29] : memref<8x256x128xf32, #tpu.memory_space<vmem>>, vector<1x256x128xf32>
    %52 = vector.shape_cast %51 : vector<1x256x128xf32> to vector<256x128xf32>
    %cst_30 = arith.constant dense<0.000000e+00> : vector<8x128xf32>
    %53 = tpu.matmul %50, %52, %cst_30 {dimension_numbers = #tpu.dot_dimension_numbers<[1], [0], [0], [1], [0, 0, 1, 1], [], []>} : vector<8x256xf32>, vector<256x128xf32>, vector<8x128xf32> -> vector<8x128xf32>
    %c1_31 = arith.constant 1 : index
    %c0_32 = arith.constant 0 : index
    %c0_33 = arith.constant 0 : index
    %54 = vector.load %arg7[%c1_31, %c0_32, %c0_33] : memref<8x1x128xf32, #tpu.memory_space<vmem>>, vector<1x1x128xf32>
    %55 = vector.shape_cast %54 : vector<1x1x128xf32> to vector<1x128xf32>
    %56 = vector.broadcast %55 : vector<1x128xf32> to vector<8x128xf32>
    %57 = arith.addf %53, %56 : vector<8x128xf32>
    %cst_34 = arith.constant 0.000000e+00 : f32
    %58 = vector.broadcast %cst_34 : f32 to vector<8x128xf32>
    %59 = arith.cmpf ogt, %57, %58 : vector<8x128xf32>
    %cst_35 = arith.constant 0.00999999977 : f32
    %60 = vector.broadcast %cst_35 : f32 to vector<8x128xf32>
    %61 = arith.mulf %60, %57 : vector<8x128xf32>
    %62 = arith.select %59, %57, %61 : vector<8x128xi1>, vector<8x128xf32>
    %c1_36 = arith.constant 1 : index
    %c0_37 = arith.constant 0 : index
    %c0_38 = arith.constant 0 : index
    %63 = vector.load %arg8[%c1_36, %c0_37, %c0_38] : memref<8x1x128xf32, #tpu.memory_space<vmem>>, vector<1x1x128xf32>
    %64 = vector.shape_cast %63 : vector<1x1x128xf32> to vector<1x128xf32>
    %65 = vector.broadcast %64 : vector<1x128xf32> to vector<8x128xf32>
    %66 = arith.mulf %62, %65 : vector<8x128xf32>
    %cst_39 = arith.constant dense<0.000000e+00> : vector<8xf32>
    %67 = vector.multi_reduction <add>, %66, %cst_39 [1] : vector<8x128xf32> to vector<8xf32>
    %68 = vector.shape_cast %67 : vector<8xf32> to vector<8x1xf32>
    %c1_i32 = arith.constant 1 : i32
    %69 = vector.broadcast %c1_i32 : i32 to vector<1x8xi32>
    %70 = arith.cmpi eq, %22, %69 : vector<1x8xi32>
    %71 = arith.extui %70 : vector<1x8xi1> to vector<1x8xi32>
    %72 = arith.sitofp %71 : vector<1x8xi32> to vector<1x8xf32>
    %73 = vector.broadcast %68 : vector<8x1xf32> to vector<8x8xf32>
    %74 = vector.broadcast %72 : vector<1x8xf32> to vector<8x8xf32>
    %75 = arith.mulf %73, %74 : vector<8x8xf32>
    %76 = arith.addf %49, %75 : vector<8x8xf32>
    %77 = vector.extract_strided_slice %20 {offsets = [0, 512], sizes = [8, 256], strides = [1, 1]} : vector<8x2048xf32> to vector<8x256xf32>
    %c2 = arith.constant 2 : index
    %c0_40 = arith.constant 0 : index
    %c0_41 = arith.constant 0 : index
    %78 = vector.load %arg6[%c2, %c0_40, %c0_41] : memref<8x256x128xf32, #tpu.memory_space<vmem>>, vector<1x256x128xf32>
    %79 = vector.shape_cast %78 : vector<1x256x128xf32> to vector<256x128xf32>
    %cst_42 = arith.constant dense<0.000000e+00> : vector<8x128xf32>
    %80 = tpu.matmul %77, %79, %cst_42 {dimension_numbers = #tpu.dot_dimension_numbers<[1], [0], [0], [1], [0, 0, 1, 1], [], []>} : vector<8x256xf32>, vector<256x128xf32>, vector<8x128xf32> -> vector<8x128xf32>
    %c2_43 = arith.constant 2 : index
    %c0_44 = arith.constant 0 : index
    %c0_45 = arith.constant 0 : index
    %81 = vector.load %arg7[%c2_43, %c0_44, %c0_45] : memref<8x1x128xf32, #tpu.memory_space<vmem>>, vector<1x1x128xf32>
    %82 = vector.shape_cast %81 : vector<1x1x128xf32> to vector<1x128xf32>
    %83 = vector.broadcast %82 : vector<1x128xf32> to vector<8x128xf32>
    %84 = arith.addf %80, %83 : vector<8x128xf32>
    %cst_46 = arith.constant 0.000000e+00 : f32
    %85 = vector.broadcast %cst_46 : f32 to vector<8x128xf32>
    %86 = arith.cmpf ogt, %84, %85 : vector<8x128xf32>
    %cst_47 = arith.constant 0.00999999977 : f32
    %87 = vector.broadcast %cst_47 : f32 to vector<8x128xf32>
    %88 = arith.mulf %87, %84 : vector<8x128xf32>
    %89 = arith.select %86, %84, %88 : vector<8x128xi1>, vector<8x128xf32>
    %c2_48 = arith.constant 2 : index
    %c0_49 = arith.constant 0 : index
    %c0_50 = arith.constant 0 : index
    %90 = vector.load %arg8[%c2_48, %c0_49, %c0_50] : memref<8x1x128xf32, #tpu.memory_space<vmem>>, vector<1x1x128xf32>
    %91 = vector.shape_cast %90 : vector<1x1x128xf32> to vector<1x128xf32>
    %92 = vector.broadcast %91 : vector<1x128xf32> to vector<8x128xf32>
    %93 = arith.mulf %89, %92 : vector<8x128xf32>
    %cst_51 = arith.constant dense<0.000000e+00> : vector<8xf32>
    %94 = vector.multi_reduction <add>, %93, %cst_51 [1] : vector<8x128xf32> to vector<8xf32>
    %95 = vector.shape_cast %94 : vector<8xf32> to vector<8x1xf32>
    %c2_i32 = arith.constant 2 : i32
    %96 = vector.broadcast %c2_i32 : i32 to vector<1x8xi32>
    %97 = arith.cmpi eq, %22, %96 : vector<1x8xi32>
    %98 = arith.extui %97 : vector<1x8xi1> to vector<1x8xi32>
    %99 = arith.sitofp %98 : vector<1x8xi32> to vector<1x8xf32>
    %100 = vector.broadcast %95 : vector<8x1xf32> to vector<8x8xf32>
    %101 = vector.broadcast %99 : vector<1x8xf32> to vector<8x8xf32>
    %102 = arith.mulf %100, %101 : vector<8x8xf32>
    %103 = arith.addf %76, %102 : vector<8x8xf32>
    %104 = vector.extract_strided_slice %20 {offsets = [0, 768], sizes = [8, 256], strides = [1, 1]} : vector<8x2048xf32> to vector<8x256xf32>
    %c3 = arith.constant 3 : index
    %c0_52 = arith.constant 0 : index
    %c0_53 = arith.constant 0 : index
    %105 = vector.load %arg6[%c3, %c0_52, %c0_53] : memref<8x256x128xf32, #tpu.memory_space<vmem>>, vector<1x256x128xf32>
    %106 = vector.shape_cast %105 : vector<1x256x128xf32> to vector<256x128xf32>
    %cst_54 = arith.constant dense<0.000000e+00> : vector<8x128xf32>
    %107 = tpu.matmul %104, %106, %cst_54 {dimension_numbers = #tpu.dot_dimension_numbers<[1], [0], [0], [1], [0, 0, 1, 1], [], []>} : vector<8x256xf32>, vector<256x128xf32>, vector<8x128xf32> -> vector<8x128xf32>
    %c3_55 = arith.constant 3 : index
    %c0_56 = arith.constant 0 : index
    %c0_57 = arith.constant 0 : index
    %108 = vector.load %arg7[%c3_55, %c0_56, %c0_57] : memref<8x1x128xf32, #tpu.memory_space<vmem>>, vector<1x1x128xf32>
    %109 = vector.shape_cast %108 : vector<1x1x128xf32> to vector<1x128xf32>
    %110 = vector.broadcast %109 : vector<1x128xf32> to vector<8x128xf32>
    %111 = arith.addf %107, %110 : vector<8x128xf32>
    %cst_58 = arith.constant 0.000000e+00 : f32
    %112 = vector.broadcast %cst_58 : f32 to vector<8x128xf32>
    %113 = arith.cmpf ogt, %111, %112 : vector<8x128xf32>
    %cst_59 = arith.constant 0.00999999977 : f32
    %114 = vector.broadcast %cst_59 : f32 to vector<8x128xf32>
    %115 = arith.mulf %114, %111 : vector<8x128xf32>
    %116 = arith.select %113, %111, %115 : vector<8x128xi1>, vector<8x128xf32>
    %c3_60 = arith.constant 3 : index
    %c0_61 = arith.constant 0 : index
    %c0_62 = arith.constant 0 : index
    %117 = vector.load %arg8[%c3_60, %c0_61, %c0_62] : memref<8x1x128xf32, #tpu.memory_space<vmem>>, vector<1x1x128xf32>
    %118 = vector.shape_cast %117 : vector<1x1x128xf32> to vector<1x128xf32>
    %119 = vector.broadcast %118 : vector<1x128xf32> to vector<8x128xf32>
    %120 = arith.mulf %116, %119 : vector<8x128xf32>
    %cst_63 = arith.constant dense<0.000000e+00> : vector<8xf32>
    %121 = vector.multi_reduction <add>, %120, %cst_63 [1] : vector<8x128xf32> to vector<8xf32>
    %122 = vector.shape_cast %121 : vector<8xf32> to vector<8x1xf32>
    %c3_i32 = arith.constant 3 : i32
    %123 = vector.broadcast %c3_i32 : i32 to vector<1x8xi32>
    %124 = arith.cmpi eq, %22, %123 : vector<1x8xi32>
    %125 = arith.extui %124 : vector<1x8xi1> to vector<1x8xi32>
    %126 = arith.sitofp %125 : vector<1x8xi32> to vector<1x8xf32>
    %127 = vector.broadcast %122 : vector<8x1xf32> to vector<8x8xf32>
    %128 = vector.broadcast %126 : vector<1x8xf32> to vector<8x8xf32>
    %129 = arith.mulf %127, %128 : vector<8x8xf32>
    %130 = arith.addf %103, %129 : vector<8x8xf32>
    %131 = vector.extract_strided_slice %20 {offsets = [0, 1024], sizes = [8, 256], strides = [1, 1]} : vector<8x2048xf32> to vector<8x256xf32>
    %c4 = arith.constant 4 : index
    %c0_64 = arith.constant 0 : index
    %c0_65 = arith.constant 0 : index
    %132 = vector.load %arg6[%c4, %c0_64, %c0_65] : memref<8x256x128xf32, #tpu.memory_space<vmem>>, vector<1x256x128xf32>
    %133 = vector.shape_cast %132 : vector<1x256x128xf32> to vector<256x128xf32>
    %cst_66 = arith.constant dense<0.000000e+00> : vector<8x128xf32>
    %134 = tpu.matmul %131, %133, %cst_66 {dimension_numbers = #tpu.dot_dimension_numbers<[1], [0], [0], [1], [0, 0, 1, 1], [], []>} : vector<8x256xf32>, vector<256x128xf32>, vector<8x128xf32> -> vector<8x128xf32>
    %c4_67 = arith.constant 4 : index
    %c0_68 = arith.constant 0 : index
    %c0_69 = arith.constant 0 : index
    %135 = vector.load %arg7[%c4_67, %c0_68, %c0_69] : memref<8x1x128xf32, #tpu.memory_space<vmem>>, vector<1x1x128xf32>
    %136 = vector.shape_cast %135 : vector<1x1x128xf32> to vector<1x128xf32>
    %137 = vector.broadcast %136 : vector<1x128xf32> to vector<8x128xf32>
    %138 = arith.addf %134, %137 : vector<8x128xf32>
    %cst_70 = arith.constant 0.000000e+00 : f32
    %139 = vector.broadcast %cst_70 : f32 to vector<8x128xf32>
    %140 = arith.cmpf ogt, %138, %139 : vector<8x128xf32>
    %cst_71 = arith.constant 0.00999999977 : f32
    %141 = vector.broadcast %cst_71 : f32 to vector<8x128xf32>
    %142 = arith.mulf %141, %138 : vector<8x128xf32>
    %143 = arith.select %140, %138, %142 : vector<8x128xi1>, vector<8x128xf32>
    %c4_72 = arith.constant 4 : index
    %c0_73 = arith.constant 0 : index
    %c0_74 = arith.constant 0 : index
    %144 = vector.load %arg8[%c4_72, %c0_73, %c0_74] : memref<8x1x128xf32, #tpu.memory_space<vmem>>, vector<1x1x128xf32>
    %145 = vector.shape_cast %144 : vector<1x1x128xf32> to vector<1x128xf32>
    %146 = vector.broadcast %145 : vector<1x128xf32> to vector<8x128xf32>
    %147 = arith.mulf %143, %146 : vector<8x128xf32>
    %cst_75 = arith.constant dense<0.000000e+00> : vector<8xf32>
    %148 = vector.multi_reduction <add>, %147, %cst_75 [1] : vector<8x128xf32> to vector<8xf32>
    %149 = vector.shape_cast %148 : vector<8xf32> to vector<8x1xf32>
    %c4_i32 = arith.constant 4 : i32
    %150 = vector.broadcast %c4_i32 : i32 to vector<1x8xi32>
    %151 = arith.cmpi eq, %22, %150 : vector<1x8xi32>
    %152 = arith.extui %151 : vector<1x8xi1> to vector<1x8xi32>
    %153 = arith.sitofp %152 : vector<1x8xi32> to vector<1x8xf32>
    %154 = vector.broadcast %149 : vector<8x1xf32> to vector<8x8xf32>
    %155 = vector.broadcast %153 : vector<1x8xf32> to vector<8x8xf32>
    %156 = arith.mulf %154, %155 : vector<8x8xf32>
    %157 = arith.addf %130, %156 : vector<8x8xf32>
    %158 = vector.extract_strided_slice %20 {offsets = [0, 1280], sizes = [8, 256], strides = [1, 1]} : vector<8x2048xf32> to vector<8x256xf32>
    %c5 = arith.constant 5 : index
    %c0_76 = arith.constant 0 : index
    %c0_77 = arith.constant 0 : index
    %159 = vector.load %arg6[%c5, %c0_76, %c0_77] : memref<8x256x128xf32, #tpu.memory_space<vmem>>, vector<1x256x128xf32>
    %160 = vector.shape_cast %159 : vector<1x256x128xf32> to vector<256x128xf32>
    %cst_78 = arith.constant dense<0.000000e+00> : vector<8x128xf32>
    %161 = tpu.matmul %158, %160, %cst_78 {dimension_numbers = #tpu.dot_dimension_numbers<[1], [0], [0], [1], [0, 0, 1, 1], [], []>} : vector<8x256xf32>, vector<256x128xf32>, vector<8x128xf32> -> vector<8x128xf32>
    %c5_79 = arith.constant 5 : index
    %c0_80 = arith.constant 0 : index
    %c0_81 = arith.constant 0 : index
    %162 = vector.load %arg7[%c5_79, %c0_80, %c0_81] : memref<8x1x128xf32, #tpu.memory_space<vmem>>, vector<1x1x128xf32>
    %163 = vector.shape_cast %162 : vector<1x1x128xf32> to vector<1x128xf32>
    %164 = vector.broadcast %163 : vector<1x128xf32> to vector<8x128xf32>
    %165 = arith.addf %161, %164 : vector<8x128xf32>
    %cst_82 = arith.constant 0.000000e+00 : f32
    %166 = vector.broadcast %cst_82 : f32 to vector<8x128xf32>
    %167 = arith.cmpf ogt, %165, %166 : vector<8x128xf32>
    %cst_83 = arith.constant 0.00999999977 : f32
    %168 = vector.broadcast %cst_83 : f32 to vector<8x128xf32>
    %169 = arith.mulf %168, %165 : vector<8x128xf32>
    %170 = arith.select %167, %165, %169 : vector<8x128xi1>, vector<8x128xf32>
    %c5_84 = arith.constant 5 : index
    %c0_85 = arith.constant 0 : index
    %c0_86 = arith.constant 0 : index
    %171 = vector.load %arg8[%c5_84, %c0_85, %c0_86] : memref<8x1x128xf32, #tpu.memory_space<vmem>>, vector<1x1x128xf32>
    %172 = vector.shape_cast %171 : vector<1x1x128xf32> to vector<1x128xf32>
    %173 = vector.broadcast %172 : vector<1x128xf32> to vector<8x128xf32>
    %174 = arith.mulf %170, %173 : vector<8x128xf32>
    %cst_87 = arith.constant dense<0.000000e+00> : vector<8xf32>
    %175 = vector.multi_reduction <add>, %174, %cst_87 [1] : vector<8x128xf32> to vector<8xf32>
    %176 = vector.shape_cast %175 : vector<8xf32> to vector<8x1xf32>
    %c5_i32 = arith.constant 5 : i32
    %177 = vector.broadcast %c5_i32 : i32 to vector<1x8xi32>
    %178 = arith.cmpi eq, %22, %177 : vector<1x8xi32>
    %179 = arith.extui %178 : vector<1x8xi1> to vector<1x8xi32>
    %180 = arith.sitofp %179 : vector<1x8xi32> to vector<1x8xf32>
    %181 = vector.broadcast %176 : vector<8x1xf32> to vector<8x8xf32>
    %182 = vector.broadcast %180 : vector<1x8xf32> to vector<8x8xf32>
    %183 = arith.mulf %181, %182 : vector<8x8xf32>
    %184 = arith.addf %157, %183 : vector<8x8xf32>
    %185 = vector.extract_strided_slice %20 {offsets = [0, 1536], sizes = [8, 256], strides = [1, 1]} : vector<8x2048xf32> to vector<8x256xf32>
    %c6 = arith.constant 6 : index
    %c0_88 = arith.constant 0 : index
    %c0_89 = arith.constant 0 : index
    %186 = vector.load %arg6[%c6, %c0_88, %c0_89] : memref<8x256x128xf32, #tpu.memory_space<vmem>>, vector<1x256x128xf32>
    %187 = vector.shape_cast %186 : vector<1x256x128xf32> to vector<256x128xf32>
    %cst_90 = arith.constant dense<0.000000e+00> : vector<8x128xf32>
    %188 = tpu.matmul %185, %187, %cst_90 {dimension_numbers = #tpu.dot_dimension_numbers<[1], [0], [0], [1], [0, 0, 1, 1], [], []>} : vector<8x256xf32>, vector<256x128xf32>, vector<8x128xf32> -> vector<8x128xf32>
    %c6_91 = arith.constant 6 : index
    %c0_92 = arith.constant 0 : index
    %c0_93 = arith.constant 0 : index
    %189 = vector.load %arg7[%c6_91, %c0_92, %c0_93] : memref<8x1x128xf32, #tpu.memory_space<vmem>>, vector<1x1x128xf32>
    %190 = vector.shape_cast %189 : vector<1x1x128xf32> to vector<1x128xf32>
    %191 = vector.broadcast %190 : vector<1x128xf32> to vector<8x128xf32>
    %192 = arith.addf %188, %191 : vector<8x128xf32>
    %cst_94 = arith.constant 0.000000e+00 : f32
    %193 = vector.broadcast %cst_94 : f32 to vector<8x128xf32>
    %194 = arith.cmpf ogt, %192, %193 : vector<8x128xf32>
    %cst_95 = arith.constant 0.00999999977 : f32
    %195 = vector.broadcast %cst_95 : f32 to vector<8x128xf32>
    %196 = arith.mulf %195, %192 : vector<8x128xf32>
    %197 = arith.select %194, %192, %196 : vector<8x128xi1>, vector<8x128xf32>
    %c6_96 = arith.constant 6 : index
    %c0_97 = arith.constant 0 : index
    %c0_98 = arith.constant 0 : index
    %198 = vector.load %arg8[%c6_96, %c0_97, %c0_98] : memref<8x1x128xf32, #tpu.memory_space<vmem>>, vector<1x1x128xf32>
    %199 = vector.shape_cast %198 : vector<1x1x128xf32> to vector<1x128xf32>
    %200 = vector.broadcast %199 : vector<1x128xf32> to vector<8x128xf32>
    %201 = arith.mulf %197, %200 : vector<8x128xf32>
    %cst_99 = arith.constant dense<0.000000e+00> : vector<8xf32>
    %202 = vector.multi_reduction <add>, %201, %cst_99 [1] : vector<8x128xf32> to vector<8xf32>
    %203 = vector.shape_cast %202 : vector<8xf32> to vector<8x1xf32>
    %c6_i32 = arith.constant 6 : i32
    %204 = vector.broadcast %c6_i32 : i32 to vector<1x8xi32>
    %205 = arith.cmpi eq, %22, %204 : vector<1x8xi32>
    %206 = arith.extui %205 : vector<1x8xi1> to vector<1x8xi32>
    %207 = arith.sitofp %206 : vector<1x8xi32> to vector<1x8xf32>
    %208 = vector.broadcast %203 : vector<8x1xf32> to vector<8x8xf32>
    %209 = vector.broadcast %207 : vector<1x8xf32> to vector<8x8xf32>
    %210 = arith.mulf %208, %209 : vector<8x8xf32>
    %211 = arith.addf %184, %210 : vector<8x8xf32>
    %212 = vector.extract_strided_slice %20 {offsets = [0, 1792], sizes = [8, 256], strides = [1, 1]} : vector<8x2048xf32> to vector<8x256xf32>
    %c7 = arith.constant 7 : index
    %c0_100 = arith.constant 0 : index
    %c0_101 = arith.constant 0 : index
    %213 = vector.load %arg6[%c7, %c0_100, %c0_101] : memref<8x256x128xf32, #tpu.memory_space<vmem>>, vector<1x256x128xf32>
    %214 = vector.shape_cast %213 : vector<1x256x128xf32> to vector<256x128xf32>
    %cst_102 = arith.constant dense<0.000000e+00> : vector<8x128xf32>
    %215 = tpu.matmul %212, %214, %cst_102 {dimension_numbers = #tpu.dot_dimension_numbers<[1], [0], [0], [1], [0, 0, 1, 1], [], []>} : vector<8x256xf32>, vector<256x128xf32>, vector<8x128xf32> -> vector<8x128xf32>
    %c7_103 = arith.constant 7 : index
    %c0_104 = arith.constant 0 : index
    %c0_105 = arith.constant 0 : index
    %216 = vector.load %arg7[%c7_103, %c0_104, %c0_105] : memref<8x1x128xf32, #tpu.memory_space<vmem>>, vector<1x1x128xf32>
    %217 = vector.shape_cast %216 : vector<1x1x128xf32> to vector<1x128xf32>
    %218 = vector.broadcast %217 : vector<1x128xf32> to vector<8x128xf32>
    %219 = arith.addf %215, %218 : vector<8x128xf32>
    %cst_106 = arith.constant 0.000000e+00 : f32
    %220 = vector.broadcast %cst_106 : f32 to vector<8x128xf32>
    %221 = arith.cmpf ogt, %219, %220 : vector<8x128xf32>
    %cst_107 = arith.constant 0.00999999977 : f32
    %222 = vector.broadcast %cst_107 : f32 to vector<8x128xf32>
    %223 = arith.mulf %222, %219 : vector<8x128xf32>
    %224 = arith.select %221, %219, %223 : vector<8x128xi1>, vector<8x128xf32>
    %c7_108 = arith.constant 7 : index
    %c0_109 = arith.constant 0 : index
    %c0_110 = arith.constant 0 : index
    %225 = vector.load %arg8[%c7_108, %c0_109, %c0_110] : memref<8x1x128xf32, #tpu.memory_space<vmem>>, vector<1x1x128xf32>
    %226 = vector.shape_cast %225 : vector<1x1x128xf32> to vector<1x128xf32>
    %227 = vector.broadcast %226 : vector<1x128xf32> to vector<8x128xf32>
    %228 = arith.mulf %224, %227 : vector<8x128xf32>
    %cst_111 = arith.constant dense<0.000000e+00> : vector<8xf32>
    %229 = vector.multi_reduction <add>, %228, %cst_111 [1] : vector<8x128xf32> to vector<8xf32>
    %230 = vector.shape_cast %229 : vector<8xf32> to vector<8x1xf32>
    %c7_i32 = arith.constant 7 : i32
    %231 = vector.broadcast %c7_i32 : i32 to vector<1x8xi32>
    %232 = arith.cmpi eq, %22, %231 : vector<1x8xi32>
    %233 = arith.extui %232 : vector<1x8xi1> to vector<1x8xi32>
    %234 = arith.sitofp %233 : vector<1x8xi32> to vector<1x8xf32>
    %235 = vector.broadcast %230 : vector<8x1xf32> to vector<8x8xf32>
    %236 = vector.broadcast %234 : vector<1x8xf32> to vector<8x8xf32>
    %237 = arith.mulf %235, %236 : vector<8x8xf32>
    %238 = arith.addf %211, %237 : vector<8x8xf32>
    %c0_112 = arith.constant 0 : index
    %c0_113 = arith.constant 0 : index
    %239 = vector.load %arg9[%c0_112, %c0_113] : memref<1x8xf32, #tpu.memory_space<vmem>>, vector<1x8xf32>
    %240 = vector.broadcast %239 : vector<1x8xf32> to vector<8x8xf32>
    %241 = arith.addf %238, %240 : vector<8x8xf32>
    %242 = arith.negf %241 : vector<8x8xf32>
    %243 = math.exp %242 : vector<8x8xf32>
    %cst_114 = arith.constant 1.000000e+00 : f32
    %244 = vector.broadcast %cst_114 : f32 to vector<8x8xf32>
    %245 = arith.addf %244, %243 : vector<8x8xf32>
    %246 = arith.divf %244, %245 : vector<8x8xf32>
    %c0_115 = arith.constant 0 : index
    %c0_116 = arith.constant 0 : index
    %247 = vector.load %arg10[%c0_115, %c0_116] : memref<8x8xf32, #tpu.memory_space<vmem>>, vector<8x8xf32>
    tpu.vector_store %arg10[%c0_115, %c0_116], %246 {strides = array<i32>} : memref<8x8xf32, #tpu.memory_space<vmem>>, vector<8x8xf32>,
    return
  }
  func.func @transform_0(%arg0: i32) -> (i32, i32) {
    %c0_i32 = arith.constant 0 : i32
    %c0_i32_0 = arith.constant 0 : i32
    return %arg0, %c0_i32 : i32, i32
  }
  func.func @transform_1(%arg0: i32) -> (i32, i32) {
    %c0_i32 = arith.constant 0 : i32
    %c0_i32_0 = arith.constant 0 : i32
    %c0_i32_1 = arith.constant 0 : i32
    return %c0_i32, %c0_i32_0 : i32, i32
  }
  func.func @transform_2(%arg0: i32) -> (i32, i32) {
    %c0_i32 = arith.constant 0 : i32
    %c0_i32_0 = arith.constant 0 : i32
    %c0_i32_1 = arith.constant 0 : i32
    return %c0_i32, %c0_i32_0 : i32, i32
  }
  func.func @transform_3(%arg0: i32) -> (i32, i32) {
    %c0_i32 = arith.constant 0 : i32
    %c0_i32_0 = arith.constant 0 : i32
    %c0_i32_1 = arith.constant 0 : i32
    return %c0_i32, %c0_i32_0 : i32, i32
  }
  func.func @transform_4(%arg0: i32) -> (i32, i32) {
    %c0_i32 = arith.constant 0 : i32
    %c0_i32_0 = arith.constant 0 : i32
    %c0_i32_1 = arith.constant 0 : i32
    return %c0_i32, %c0_i32_0 : i32, i32
  }
  func.func @transform_5(%arg0: i32) -> (i32, i32, i32) {
    %c0_i32 = arith.constant 0 : i32
    %c0_i32_0 = arith.constant 0 : i32
    %c0_i32_1 = arith.constant 0 : i32
    %c0_i32_2 = arith.constant 0 : i32
    return %c0_i32, %c0_i32_0, %c0_i32_1 : i32, i32, i32
  }
  func.func @transform_6(%arg0: i32) -> (i32, i32, i32) {
    %c0_i32 = arith.constant 0 : i32
    %c0_i32_0 = arith.constant 0 : i32
    %c0_i32_1 = arith.constant 0 : i32
    %c0_i32_2 = arith.constant 0 : i32
    return %c0_i32, %c0_i32_0, %c0_i32_1 : i32, i32, i32
  }
  func.func @transform_7(%arg0: i32) -> (i32, i32, i32) {
    %c0_i32 = arith.constant 0 : i32
    %c0_i32_0 = arith.constant 0 : i32
    %c0_i32_1 = arith.constant 0 : i32
    %c0_i32_2 = arith.constant 0 : i32
    return %c0_i32, %c0_i32_0, %c0_i32_1 : i32, i32, i32
  }
  func.func @transform_8(%arg0: i32) -> (i32, i32) {
    %c0_i32 = arith.constant 0 : i32
    %c0_i32_0 = arith.constant 0 : i32
    %c0_i32_1 = arith.constant 0 : i32
    return %c0_i32, %c0_i32_0 : i32, i32
  }
  func.func @transform_9(%arg0: i32) -> (i32, i32) {
    %c0_i32 = arith.constant 0 : i32
    %c0_i32_0 = arith.constant 0 : i32
    return %arg0, %c0_i32 : i32, i32
  }
}

</mosaic_0001>

<bundles_post_ra>
// kernel: tpu_custom_call.1
= control target key start
LH: loop header
LB: loop body
LE: loop exit
PB: predicated region body
PF: predicated region fallthrough
CT: control target
= control target key end

     0   :  { %14 = vsyncpa [#allocation3], 0  ;;  %s5974_s0 = inlined_call_operand.hbm [shape: f32[8,15], index: 0, kind: input, shape index: {}]   ;;  %s5975_s1 = inlined_call_operand.hbm [shape: f32[15,512], index: 1, kind: input, shape index: {}]   ;;  %s5976_s2 = inlined_call_operand.hbm [shape: f32[1,512], index: 2, kind: input, shape index: {}]   ;;  %s5977_s3 = inlined_call_operand.hbm [shape: f32[512,2048], index: 3, kind: input, shape index: {}]   ;;  %s5978_s4 = inlined_call_operand.hbm [shape: f32[1,2048], index: 4, kind: input, shape index: {}]   ;;  %s5979_s5 = inlined_call_operand.hbm [shape: f32[8,256,128], index: 5, kind: input, shape index: {}]   ;;  %s5980_s6 = inlined_call_operand.hbm [shape: f32[8,1,128], index: 6, kind: input, shape index: {}]   ;;  %s5981_s7 = inlined_call_operand.hbm [shape: f32[8,1,128], index: 7, kind: input, shape index: {}]   ;;  %s5982_s8 = inlined_call_operand.hbm [shape: f32[1,8], index: 8, kind: input, shape index: {}]   ;;  %s5983_s9 = inlined_call_operand.hbm [shape: f32[8,8], index: 9, kind: output, shape index: {}]  }
   0x1   :  { %15 = vsyncpa [#allocation6], 0 }
   0x2   :  { %16 = vsyncpa [#allocation9], 0 }
   0x3   :  { %17 = vsyncpa [#allocation12], 0 }
   0x4   :  { %18 = vsyncpa [#allocation15], 0 }
   0x5   :  { %19 = vsyncpa [#allocation4], 0  ;;  %s5606_s30 = smov [#allocation5]   ;;  %s5374_s13 = scalar_lea.hbm %s5975_s1, 1024 }
   0x6   :  { %s35_s10 = sshll.u32 %s5606_s30, 4  ;;  %p5375_p0 = scmp.ne.s32.totalorder %s5975_s1, %s5374_s13  ;;  %s36_s10 = int_to_ptr.vmem [resolvable:$true] %s35_s10 }
   0x7   :  { %p5378_p1 = scmp.lt.u32.totalorder %s5374_s13, %s5975_s1 }
   0x9   :  { %p5380_p2 = pnand %p5378_p1, %p5375_p0 }
   0xb   :  { %5383 = shalt.err (!%p5380_p2)
}
   0xc   :  { %s5384_s18 = scalar_lea.vmem %s36_s10, 1024  ;;  %p5389_p4 = scmp.lt.s32.totalorder %s36_s10, %s36_s10 }
   0xd   :  { %p5385_p3 = scmp.ne.s32.totalorder %s36_s10, %s5384_s18  ;;  %p5390_p5 = scmp.lt.s32.totalorder %s5384_s18, %s5384_s18 }
   0xf   :  { %p5391_p6 = por %p5390_p5, %p5389_p4 }
  0x11   :  { %p5392_p7 = pnand %p5391_p6, %p5385_p3 }
  0x13   :  { %5395 = shalt.err (!%p5392_p7)
}
  0x14   :  { %s5607_s19 = smov 512   ;;  %s5608_s20 = smov 32  }
  0x15   :  { %41 = dma.hbm_to_vmem [thread:$0]  %s5975_s1, 1024, %s36_s10, [#allocation6], %s5607_s19, %s5607_s19, %s5608_s20  }
  0x16   :  { %s5609_s23 = smov [#allocation8]   ;;  %s5396_s27 = scalar_lea.hbm %s5977_s3, 131072 }
  0x17   :  { %s57_s24 = sshll.u32 %s5609_s23, 4  ;;  %p5397_p8 = scmp.ne.s32.totalorder %s5977_s3, %s5396_s27  ;;  %s58_s24 = int_to_ptr.vmem [resolvable:$true] %s57_s24 }
  0x18   :  { %p5400_p9 = scmp.lt.u32.totalorder %s5396_s27, %s5977_s3 }
  0x1a   :  { %p5402_p10 = pnand %p5400_p9, %p5397_p8 }
  0x1c   :  { %5405 = shalt.err (!%p5402_p10)
}
  0x1d   :  { %s5406_s12 = scalar_lea.vmem %s58_s24, 131072  ;;  %p5411_p12 = scmp.lt.s32.totalorder %s58_s24, %s58_s24 }
  0x1e   :  { %p5407_p11 = scmp.ne.s32.totalorder %s58_s24, %s5406_s12  ;;  %p5412_p13 = scmp.lt.s32.totalorder %s5406_s12, %s5406_s12 }
  0x20   :  { %p5413_p0 = por %p5412_p13, %p5411_p12 }
  0x22   :  { %p5414_p1 = pnand %p5413_p0, %p5407_p11 }
  0x24   :  { %5417 = shalt.err (!%p5414_p1)
}
  0x25   :  { %s5610_s1 = smov 2048   ;;  %s5611_s10 = smov 128  }
  0x26   :  { %63 = dma.hbm_to_vmem [thread:$0]  %s5977_s3, 131072, %s58_s24, [#allocation9], %s5610_s1, %s5610_s1, %s5611_s10  }
  0x27   :  { %s5612_s15 = smov [#allocation11]   ;;  %s5418_s19 = scalar_lea.hbm %s5979_s5, 32768 }
  0x28   :  { %s79_s16 = sshll.u32 %s5612_s15, 4  ;;  %p5419_p2 = scmp.ne.s32.totalorder %s5979_s5, %s5418_s19  ;;  %s80_s16 = int_to_ptr.vmem [resolvable:$true] %s79_s16 }
  0x29   :  { %p5422_p3 = scmp.lt.u32.totalorder %s5418_s19, %s5979_s5 }
  0x2b   :  { %p5424_p4 = pnand %p5422_p3, %p5419_p2 }
  0x2d   :  { %5427 = shalt.err (!%p5424_p4)
}
  0x2e   :  { %s5428_s25 = scalar_lea.vmem %s80_s16, 32768  ;;  %p5433_p6 = scmp.lt.s32.totalorder %s80_s16, %s80_s16 }
  0x2f   :  { %p5429_p5 = scmp.ne.s32.totalorder %s80_s16, %s5428_s25  ;;  %p5434_p7 = scmp.lt.s32.totalorder %s5428_s25, %s5428_s25 }
  0x31   :  { %p5435_p8 = por %p5434_p7, %p5433_p6 }
  0x33   :  { %p5436_p9 = pnand %p5435_p8, %p5429_p5 }
  0x35   :  { %5439 = shalt.err (!%p5436_p9)
}
  0x36   :  { %s5613_s3 = smov 8   ;;  %s5614_s27 = smov [#allocation14]  }
  0x37   :  { %85 = dma.hbm_to_vmem [thread:$0]  %s5979_s5, 32768, %s80_s16, [#allocation12], %s5611_s10, %s5611_s10, %s5613_s3  }
  0x38   :  { %s103_s28 = sshll.u32 %s5614_s27, 4  ;;  %s5615_s29 = smov [#allocation2]   ;;  %s104_s28 = int_to_ptr.vmem [resolvable:$true] %s103_s28 }
  0x39   :  { %s26_s30 = sshll.u32 %s5615_s29, 4  ;;  %s5440_s1 = scalar_lea.hbm %s5981_s7, 128  ;;  %s27_s30 = int_to_ptr.vmem [resolvable:$true] %s26_s30 }
  0x3a   :  { %p5441_p10 = scmp.ne.s32.totalorder %s5981_s7, %s5440_s1  ;;  %p5444_p11 = scmp.lt.u32.totalorder %s5440_s1, %s5981_s7 }
  0x3c   :  { %p5446_p12 = pnand %p5444_p11, %p5441_p10 }
  0x3e   :  { %5449 = shalt.err (!%p5446_p12)
}
  0x3f   :  { %s5450_s5 = scalar_lea.vmem %s104_s28, 128  ;;  %p5455_p0 = scmp.lt.s32.totalorder %s104_s28, %s104_s28 }
  0x40   :  { %p5451_p13 = scmp.ne.s32.totalorder %s104_s28, %s5450_s5  ;;  %p5456_p1 = scmp.lt.s32.totalorder %s5450_s5, %s5450_s5 }
  0x42   :  { %p5457_p2 = por %p5456_p1, %p5455_p0 }
  0x44   :  { %p5458_p3 = pnand %p5457_p2, %p5451_p13 }
  0x46   :  { %5461 = shalt.err (!%p5458_p3)
}
  0x47   :  { %s5616_s10 = smov 16   ;;  %s5617_s16 = smov 1  }
  0x48   :  { %109 = dma.hbm_to_vmem [thread:$0]  %s5981_s7, 128, %s104_s28, [#allocation15], %s5616_s10, %s5616_s10, %s5617_s16  }
  0x49   :  { %s5462_s22 = scalar_lea.hbm %s5974_s0, 128 }
  0x4a   :  { %p5463_p4 = scmp.ne.s32.totalorder %s5974_s0, %s5462_s22  ;;  %p5466_p5 = scmp.lt.u32.totalorder %s5462_s22, %s5974_s0 }
  0x4c   :  { %p5468_p6 = pnand %p5466_p5, %p5463_p4 }
  0x4e   :  { %5471 = shalt.err (!%p5468_p6)
}
  0x4f   :  { %s5472_s26 = scalar_lea.vmem %s27_s30, 128  ;;  %p5477_p8 = scmp.lt.s32.totalorder %s27_s30, %s27_s30 }
  0x50   :  { %p5473_p7 = scmp.ne.s32.totalorder %s27_s30, %s5472_s26  ;;  %p5478_p9 = scmp.lt.s32.totalorder %s5472_s26, %s5472_s26 }
  0x52   :  { %p5479_p10 = por %p5478_p9, %p5477_p8 }
  0x54   :  { %p5480_p11 = pnand %p5479_p10, %p5473_p7 }
  0x56   :  { %5483 = shalt.err (!%p5480_p11)
}
  0x57   :  { %29 = dma.hbm_to_vmem [thread:$0]  %s5974_s0, 128, %s27_s30, [#allocation3]  }
  0x58   :  { %s5618_s28 = smov [#allocation7]   ;;  %s5619_s11 = smov [#allocation10]  }
  0x59   :  { %s48_s29 = sshll.u32 %s5618_s28, 4  ;;  %s70_s12 = sshll.u32 %s5619_s11, 4  ;;  %s49_s29 = int_to_ptr.vmem [resolvable:$true] %s48_s29  ;;  %s71_s12 = int_to_ptr.vmem [resolvable:$true] %s70_s12 }
  0x5a   :  { %s5484_s14 = scalar_lea.hbm %s5976_s2, 64 }
  0x5b   :  { %p5485_p12 = scmp.ne.s32.totalorder %s5976_s2, %s5484_s14  ;;  %p5488_p13 = scmp.lt.u32.totalorder %s5484_s14, %s5976_s2 }
  0x5d   :  { %p5490_p0 = pnand %p5488_p13, %p5485_p12 }
  0x5f   :  { %5493 = shalt.err (!%p5490_p0)
}
  0x60   :  { %s5494_s0 = scalar_lea.vmem %s49_s29, 64  ;;  %p5499_p2 = scmp.lt.s32.totalorder %s49_s29, %s49_s29 }
  0x61   :  { %p5495_p1 = scmp.ne.s32.totalorder %s49_s29, %s5494_s0  ;;  %p5500_p3 = scmp.lt.s32.totalorder %s5494_s0, %s5494_s0 }
  0x63   :  { %p5501_p4 = por %p5500_p3, %p5499_p2 }
  0x65   :  { %p5502_p5 = pnand %p5501_p4, %p5495_p1 }
  0x67   :  { %5505 = shalt.err (!%p5502_p5)
}
  0x68   :  { %51 = dma.hbm_to_vmem [thread:$0]  %s5976_s2, 64, %s49_s29, [#allocation6]  }
  0x69   :  { %s5506_s22 = scalar_lea.hbm %s5978_s4, 256 }
  0x6a   :  { %p5507_p6 = scmp.ne.s32.totalorder %s5978_s4, %s5506_s22  ;;  %p5510_p7 = scmp.lt.u32.totalorder %s5506_s22, %s5978_s4 }
  0x6c   :  { %p5512_p8 = pnand %p5510_p7, %p5507_p6 }
  0x6e   :  { %5515 = shalt.err (!%p5512_p8)
}
  0x6f   :  { %s5516_s26 = scalar_lea.vmem %s71_s12, 256  ;;  %p5521_p10 = scmp.lt.s32.totalorder %s71_s12, %s71_s12 }
  0x70   :  { %p5517_p9 = scmp.ne.s32.totalorder %s71_s12, %s5516_s26  ;;  %p5522_p11 = scmp.lt.s32.totalorder %s5516_s26, %s5516_s26 }
  0x72   :  { %p5523_p12 = por %p5522_p11, %p5521_p10 }
  0x74   :  { %p5524_p13 = pnand %p5523_p12, %p5517_p9 }
  0x76   :  { %5527 = shalt.err (!%p5524_p13)
}
  0x77   :  { %73 = dma.hbm_to_vmem [thread:$0]  %s5978_s4, 256, %s71_s12, [#allocation9]  }
  0x78   :  { %s5620_s27 = smov [#allocation13]   ;;  %s5621_s29 = smov [#allocation16]  }
  0x79   :  { %s91_s28 = sshll.u32 %s5620_s27, 4  ;;  %s116_s11 = sshll.u32 %s5621_s29, 4  ;;  %s92_s28 = int_to_ptr.vmem [resolvable:$true] %s91_s28  ;;  %s117_s11 = int_to_ptr.vmem [resolvable:$true] %s116_s11 }
  0x7a   :  { %s5528_s14 = scalar_lea.hbm %s5980_s6, 128 }
  0x7b   :  { %p5529_p0 = scmp.ne.s32.totalorder %s5980_s6, %s5528_s14  ;;  %p5532_p1 = scmp.lt.u32.totalorder %s5528_s14, %s5980_s6 }
  0x7d   :  { %p5534_p2 = pnand %p5532_p1, %p5529_p0 }
  0x7f   :  { %5537 = shalt.err (!%p5534_p2)
}
  0x80   :  { %s5538_s4 = scalar_lea.vmem %s92_s28, 128  ;;  %p5543_p4 = scmp.lt.s32.totalorder %s92_s28, %s92_s28 }
  0x81   :  { %p5539_p3 = scmp.ne.s32.totalorder %s92_s28, %s5538_s4  ;;  %p5544_p5 = scmp.lt.s32.totalorder %s5538_s4, %s5538_s4 }
  0x83   :  { %p5545_p6 = por %p5544_p5, %p5543_p4 }
  0x85   :  { %p5546_p7 = pnand %p5545_p6, %p5539_p3 }
  0x87   :  { %5549 = shalt.err (!%p5546_p7)
}
  0x88   :  { %97 = dma.hbm_to_vmem [thread:$0]  %s5980_s6, 128, %s92_s28, [#allocation12], %s5616_s10, %s5616_s10, %s5617_s16  }
  0x89   :  { %s5550_s20 = scalar_lea.hbm %s5982_s8, 16 }
  0x8a   :  { %p5551_p8 = scmp.ne.s32.totalorder %s5982_s8, %s5550_s20  ;;  %p5554_p9 = scmp.lt.u32.totalorder %s5550_s20, %s5982_s8 }
  0x8c   :  { %p5556_p10 = pnand %p5554_p9, %p5551_p8 }
  0x8e   :  { %5559 = shalt.err (!%p5556_p10)
}
  0x8f   :  { %s5560_s3 = scalar_lea.vmem %s117_s11, 16  ;;  %s5564_s24 = scalar_lea.vmem %s117_s11, 32 }
  0x90   :  { %p5561_p11 = scmp.ne.s32.totalorder %s117_s11, %s5560_s3  ;;  %p5565_p12 = scmp.lt.s32.totalorder %s117_s11, %s117_s11 }
  0x91   :  { %p5566_p13 = scmp.lt.s32.totalorder %s5564_s24, %s5560_s3 }
  0x93   :  { %p5567_p0 = por %p5566_p13, %p5565_p12 }
  0x95   :  { %p5568_p1 = pnand %p5567_p0, %p5561_p11 }
  0x97   :  { %5571 = shalt.err (!%p5568_p1)
}
  0x98   :  { %119 = dma.hbm_to_vmem [thread:$0]  %s5982_s8, 16, %s117_s11, [#allocation15]  }
  0x99   :  { %5594 = dma.done.wait [#allocation3], 128  }
  0x9a   :  { %5595 = vsyncadd [#allocation3], 4294967168 }
  0x9b   :  { %5596 = dma.done.wait [#allocation6], 1088  }
  0x9c   :  { %5597 = vsyncadd [#allocation6], 4294966208 }
  0x9d   :  { %5598 = dma.done.wait [#allocation9], 131328  }
  0x9e   :  { %5599 = vsyncadd [#allocation9], 4294835968 }
  0x9f   :  { %5600 = dma.done.wait [#allocation12], 32896  }
  0xa0   :  { %5601 = vsyncadd [#allocation12], 4294934400 }
  0xa1   :  { %5602 = dma.done.wait [#allocation15], 144  }
  0xa2   :  { %5603 = vsyncadd [#allocation15], 4294967152  ;;  %v5622_v0 = vmov 0.0   ;;  %vm182_vm0 = vcmask 1046528   ;;  %vm5623_vm1 = vmmov 1   ;;  %v149_v2 = vld [vmem:[#allocation5 + $0x8] sm:$0xff] }
  0xa3   :  { %259 = vmatprep.mubr.f32.mxu0 %v5622_v0  ;;  %330 = vmatprep.mubr.f32.mxu1 %v5622_v0  ;;  %vm5791_vm2 = vmpackc.low %vm182_vm0, %vm5623_vm1  ;;  %v153_v3 = vld [vmem:[#allocation5 + $0x28] sm:$0x7f]  ;;  %v148_v4 = vld [vmem:[#allocation5] sm:$0xff]  ;;  %vm178_vm3 = vcmask 121856   ;;  %s5624_s8 = smov [#allocation17]  }
  0xa4   :  { %v4027_v5 = vpack.c.bf16 %v153_v3, %v149_v2  ;;  %v152_v6 = vld [vmem:[#allocation5 + $0x20] sm:$0x7f]  ;;  %v151_v7 = vld [vmem:[#allocation5 + $0x18] sm:$0xff]  ;;  %v150_v11 = vld [vmem:[#allocation5 + $0x10] sm:$0xff]  ;;  %s3702_s16 = sshll.u32 %s5624_s8, 4  ;;  %s3703_s16 = int_to_ptr.vmem [resolvable:$true] %s3702_s16 }
  0xa5   :  { %v4030_v8 = vpack.c.bf16 %v152_v6, %v148_v4  ;;  %v147_v9 = vld [vmem:[#allocation2] sm:$0xff]  ;;  %v154_v12 = vld [vmem:[#allocation5 + $0x30] sm:$0x7f]  ;;  %v349_v20 = vld [vmem:[#allocation8] sm:$0xff]  ;;  %s5572_s26 = scalar_lea.vmem %s3703_s16, 128  ;;  %p5577_p3 = scmp.lt.s32.totalorder %s3703_s16, %s3703_s16 }
  0xa6   :  { %v155_v10 = vld [vmem:[#allocation5 + $0x38] sm:$0x7f]  ;;  %4029 = vmatprep.subr.msk.bf16.mxu0 %vm5791_vm2, %v4027_v5  ;;  %v4036_v14 = vpack.c.bf16 %v154_v12, %v150_v11  ;;  %v350_v15 = vld [vmem:[#allocation8 + $0x8] sm:$0xff]  ;;  %v365_v21 = vld [vmem:[#allocation8 + $0x80] sm:$0xff]  ;;  %p5573_p2 = scmp.ne.s32.totalorder %s3703_s16, %s5572_s26  ;;  %p5578_p4 = scmp.lt.s32.totalorder %s5572_s26, %s5572_s26 }
  0xa7   :  { %v4033_v13 = vpack.c.bf16 %v155_v10, %v151_v7  ;;  %v366_v16 = vld [vmem:[#allocation8 + $0x88] sm:$0xff]  ;;  %v352_v17 = vld [vmem:[#allocation8 + $0x18] sm:$0xff]  ;;  %4032 = vmatpush1.bf16.msk.msra.mxu0 %vm5791_vm2, %v4030_v8  ;;  %v4041_v23 = vpack.c.bf16 %v365_v21, %v349_v20  ;;  %v351_v24 = vld [vmem:[#allocation8 + $0x10] sm:$0xff] }
  0xa8   :  { %v4039_v18 = vpack.c.bf16 %v366_v16, %v350_v15  ;;  %v368_v19 = vld [vmem:[#allocation8 + $0x98] sm:$0xff]  ;;  %v367_v25 = vld [vmem:[#allocation8 + $0x90] sm:$0xff]  ;;  %v382_v26 = vld [vmem:[#allocation8 + $0x108] sm:$0xff]  ;;  %p5579_p5 = por %p5578_p4, %p5577_p3 }
  0xa9   :  { %4035 = vmatprep.subr.msk.bf16.mxu1 %vm5791_vm2, %v4033_v13  ;;  %v4167_v22 = vpack.c.bf16 %v368_v19, %v352_v17  ;;  %v4169_v27 = vpack.c.bf16 %v367_v25, %v351_v24  ;;  %v398_v28 = vld [vmem:[#allocation8 + $0x188] sm:$0xff]  ;;  %v384_v29 = vld [vmem:[#allocation8 + $0x118] sm:$0xff]  ;;  %v381_v33 = vld [vmem:[#allocation8 + $0x100] sm:$0xff] }
  0xaa   :  { %4038 = vmatpush1.bf16.msk.msra.mxu1 %vm5791_vm2, %v4036_v14  ;;  %4040 = vmatprep.subr.bf16.mxu0 %v4039_v18  ;;  %v400_v30 = vld [vmem:[#allocation8 + $0x198] sm:$0xff]  ;;  %v4043_v31 = vpack.c.bf16 %v398_v28, %v382_v26  ;;  %v397_v34 = vld [vmem:[#allocation8 + $0x180] sm:$0xff]  ;;  %v383_v35 = vld [vmem:[#allocation8 + $0x110] sm:$0xff]  ;;  %p5580_p6 = pnand %p5579_p5, %p5573_p2 }
  0xab   :  { %3717 = vmatmul.mubr.msk.f32.vlgmr.msra.gmra.mrb[0].mxu0 %vm178_vm3, %v147_v9  ;;  %4168 = vmatprep.subr.bf16.mxu1 %v4167_v22  ;;  %v4171_v32 = vpack.c.bf16 %v400_v30, %v384_v29  ;;  %v4045_v36 = vpack.c.bf16 %v397_v34, %v381_v33  ;;  %v399_v37 = vld [vmem:[#allocation8 + $0x190] sm:$0xff]  ;;  %v414_v38 = vld [vmem:[#allocation8 + $0x208] sm:$0xff]  ;;  %v416_v41 = vld [vmem:[#allocation8 + $0x218] sm:$0xff] }
  0xac   :  { %4042 = vmatpush1.bf16.msra.mxu0 %v4041_v23  ;;  %v430_v39 = vld [vmem:[#allocation8 + $0x288] sm:$0xff]  ;;  %v432_v42 = vld [vmem:[#allocation8 + $0x298] sm:$0xff]  ;;  %v413_v43 = vld [vmem:[#allocation8 + $0x200] sm:$0xff]  ;;  %v4173_v44 = vpack.c.bf16 %v399_v37, %v383_v35 }
  0xad   :  { %3720 = vmatmul.mubr.msk.f32.vlgmr.msra.gmra.mrb[0].mxu1 %vm178_vm3, %v147_v9  ;;  %4044 = vmatprep.subr.bf16.mxu0 %v4043_v31  ;;  %v4047_v40 = vpack.c.bf16 %v430_v39, %v414_v38  ;;  %v429_v45 = vld [vmem:[#allocation8 + $0x280] sm:$0xff]  ;;  %v415_v46 = vld [vmem:[#allocation8 + $0x210] sm:$0xff]  ;;  %v4175_v47 = vpack.c.bf16 %v432_v42, %v416_v41  ;;  %v446_v49 = vld [vmem:[#allocation8 + $0x308] sm:$0xff] }
  0xae   :  { %4170 = vmatpush1.bf16.msra.mxu1 %v4169_v27  ;;  %v431_v48 = vld [vmem:[#allocation8 + $0x290] sm:$0xff]  ;;  %v462_v50 = vld [vmem:[#allocation8 + $0x388] sm:$0xff]  ;;  %v4049_v51 = vpack.c.bf16 %v429_v45, %v413_v43  ;;  %v448_v52 = vld [vmem:[#allocation8 + $0x318] sm:$0xff] }
  0xaf   :  { %4172 = vmatprep.subr.bf16.mxu1 %v4171_v32  ;;  %v464_v53 = vld [vmem:[#allocation8 + $0x398] sm:$0xff]  ;;  %v4051_v54 = vpack.c.bf16 %v462_v50, %v446_v49  ;;  %v445_v55 = vld [vmem:[#allocation8 + $0x300] sm:$0xff]  ;;  %v4177_v57 = vpack.c.bf16 %v431_v48, %v415_v46  ;;  %v478_v58 = vld [vmem:[#allocation8 + $0x408] sm:$0xff] }
  0xb0   :  { %4046 = vmatpush1.bf16.msra.mxu0 %v4045_v36  ;;  %v461_v56 = vld [vmem:[#allocation8 + $0x380] sm:$0xff]  ;;  %v494_v59 = vld [vmem:[#allocation8 + $0x488] sm:$0xff]  ;;  %v4179_v60 = vpack.c.bf16 %v464_v53, %v448_v52  ;;  %v447_v61 = vld [vmem:[#allocation8 + $0x310] sm:$0xff] }
  0xb1   :  { %4048 = vmatprep.subr.bf16.mxu0 %v4047_v40  ;;  %v463_v62 = vld [vmem:[#allocation8 + $0x390] sm:$0xff]  ;;  %v4053_v63 = vpack.c.bf16 %v461_v56, %v445_v55  ;;  %v480_v1 = vld [vmem:[#allocation8 + $0x418] sm:$0xff]  ;;  %v4055_v3 = vpack.c.bf16 %v494_v59, %v478_v58  ;;  %v477_v4 = vld [vmem:[#allocation8 + $0x400] sm:$0xff] }
  0xb2   :  { %4174 = vmatpush1.bf16.msra.mxu1 %v4173_v44  ;;  %v496_v2 = vld [vmem:[#allocation8 + $0x498] sm:$0xff]  ;;  %v493_v5 = vld [vmem:[#allocation8 + $0x480] sm:$0xff]  ;;  %v4181_v6 = vpack.c.bf16 %v463_v62, %v447_v61  ;;  %v510_v7 = vld [vmem:[#allocation8 + $0x508] sm:$0xff] }
  0xb3   :  { %4176 = vmatprep.subr.bf16.mxu1 %v4175_v47  ;;  %v526_v8 = vld [vmem:[#allocation8 + $0x588] sm:$0xff]  ;;  %v4183_v9 = vpack.c.bf16 %v496_v2, %v480_v1  ;;  %v479_v10 = vld [vmem:[#allocation8 + $0x410] sm:$0xff]  ;;  %v4057_v12 = vpack.c.bf16 %v493_v5, %v477_v4  ;;  %v512_v13 = vld [vmem:[#allocation8 + $0x518] sm:$0xff] }
  0xb4   :  { %4050 = vmatpush1.bf16.msra.mxu0 %v4049_v51  ;;  %v495_v11 = vld [vmem:[#allocation8 + $0x490] sm:$0xff]  ;;  %v528_v14 = vld [vmem:[#allocation8 + $0x598] sm:$0xff]  ;;  %v4059_v15 = vpack.c.bf16 %v526_v8, %v510_v7  ;;  %v509_v16 = vld [vmem:[#allocation8 + $0x500] sm:$0xff] }
  0xb5   :  { %4052 = vmatprep.subr.bf16.mxu0 %v4051_v54  ;;  %v525_v17 = vld [vmem:[#allocation8 + $0x580] sm:$0xff]  ;;  %v4185_v18 = vpack.c.bf16 %v495_v11, %v479_v10  ;;  %v542_v19 = vld [vmem:[#allocation8 + $0x608] sm:$0xff]  ;;  %v4187_v21 = vpack.c.bf16 %v528_v14, %v512_v13  ;;  %v511_v22 = vld [vmem:[#allocation8 + $0x510] sm:$0xff] }
  0xb6   :  { %4178 = vmatpush1.bf16.msra.mxu1 %v4177_v57  ;;  %v558_v20 = vld [vmem:[#allocation8 + $0x688] sm:$0xff]  ;;  %v527_v23 = vld [vmem:[#allocation8 + $0x590] sm:$0xff]  ;;  %v4061_v24 = vpack.c.bf16 %v525_v17, %v509_v16  ;;  %v544_v25 = vld [vmem:[#allocation8 + $0x618] sm:$0xff] }
  0xb7   :  { %4180 = vmatprep.subr.bf16.mxu1 %v4179_v60  ;;  %v560_v26 = vld [vmem:[#allocation8 + $0x698] sm:$0xff]  ;;  %v4063_v27 = vpack.c.bf16 %v558_v20, %v542_v19  ;;  %v541_v28 = vld [vmem:[#allocation8 + $0x600] sm:$0xff]  ;;  %v4189_v30 = vpack.c.bf16 %v527_v23, %v511_v22  ;;  %v574_v31 = vld [vmem:[#allocation8 + $0x708] sm:$0xff] }
  0xb8   :  { %4054 = vmatpush1.bf16.msra.mxu0 %v4053_v63  ;;  %v557_v29 = vld [vmem:[#allocation8 + $0x680] sm:$0xff]  ;;  %v590_v32 = vld [vmem:[#allocation8 + $0x788] sm:$0xff]  ;;  %v4191_v33 = vpack.c.bf16 %v560_v26, %v544_v25  ;;  %v543_v34 = vld [vmem:[#allocation8 + $0x610] sm:$0xff] }
  0xb9   :  { %4056 = vmatprep.subr.bf16.mxu0 %v4055_v3  ;;  %v559_v35 = vld [vmem:[#allocation8 + $0x690] sm:$0xff]  ;;  %v4065_v36 = vpack.c.bf16 %v557_v29, %v541_v28  ;;  %v576_v37 = vld [vmem:[#allocation8 + $0x718] sm:$0xff]  ;;  %v4067_v39 = vpack.c.bf16 %v590_v32, %v574_v31  ;;  %v573_v40 = vld [vmem:[#allocation8 + $0x700] sm:$0xff] }
  0xba   :  { %4182 = vmatpush1.bf16.msra.mxu1 %v4181_v6  ;;  %v592_v38 = vld [vmem:[#allocation8 + $0x798] sm:$0xff]  ;;  %v589_v41 = vld [vmem:[#allocation8 + $0x780] sm:$0xff]  ;;  %v4193_v42 = vpack.c.bf16 %v559_v35, %v543_v34  ;;  %v606_v43 = vld [vmem:[#allocation8 + $0x808] sm:$0xff] }
  0xbb   :  { %4184 = vmatprep.subr.bf16.mxu1 %v4183_v9  ;;  %v622_v44 = vld [vmem:[#allocation8 + $0x888] sm:$0xff]  ;;  %v4195_v45 = vpack.c.bf16 %v592_v38, %v576_v37  ;;  %v575_v46 = vld [vmem:[#allocation8 + $0x710] sm:$0xff]  ;;  %v4069_v48 = vpack.c.bf16 %v589_v41, %v573_v40  ;;  %v608_v49 = vld [vmem:[#allocation8 + $0x818] sm:$0xff] }
  0xbc   :  { %4058 = vmatpush1.bf16.msra.mxu0 %v4057_v12  ;;  %v591_v47 = vld [vmem:[#allocation8 + $0x790] sm:$0xff]  ;;  %v624_v50 = vld [vmem:[#allocation8 + $0x898] sm:$0xff]  ;;  %v4071_v51 = vpack.c.bf16 %v622_v44, %v606_v43  ;;  %v605_v52 = vld [vmem:[#allocation8 + $0x800] sm:$0xff] }
  0xbd   :  { %4060 = vmatprep.subr.bf16.mxu0 %v4059_v15  ;;  %v621_v53 = vld [vmem:[#allocation8 + $0x880] sm:$0xff]  ;;  %v4197_v54 = vpack.c.bf16 %v591_v47, %v575_v46  ;;  %v638_v55 = vld [vmem:[#allocation8 + $0x908] sm:$0xff]  ;;  %v4199_v57 = vpack.c.bf16 %v624_v50, %v608_v49  ;;  %v607_v58 = vld [vmem:[#allocation8 + $0x810] sm:$0xff] }
  0xbe   :  { %4186 = vmatpush1.bf16.msra.mxu1 %v4185_v18  ;;  %v654_v56 = vld [vmem:[#allocation8 + $0x988] sm:$0xff]  ;;  %v623_v59 = vld [vmem:[#allocation8 + $0x890] sm:$0xff]  ;;  %v4073_v60 = vpack.c.bf16 %v621_v53, %v605_v52  ;;  %v640_v61 = vld [vmem:[#allocation8 + $0x918] sm:$0xff] }
  0xbf   :  { %4188 = vmatprep.subr.bf16.mxu1 %v4187_v21  ;;  %v656_v62 = vld [vmem:[#allocation8 + $0x998] sm:$0xff]  ;;  %v4075_v63 = vpack.c.bf16 %v654_v56, %v638_v55  ;;  %v637_v1 = vld [vmem:[#allocation8 + $0x900] sm:$0xff]  ;;  %v4201_v3 = vpack.c.bf16 %v623_v59, %v607_v58  ;;  %v670_v4 = vld [vmem:[#allocation8 + $0xa08] sm:$0xff] }
  0xc0   :  { %4062 = vmatpush1.bf16.msra.mxu0 %v4061_v24  ;;  %v653_v2 = vld [vmem:[#allocation8 + $0x980] sm:$0xff]  ;;  %v686_v5 = vld [vmem:[#allocation8 + $0xa88] sm:$0xff]  ;;  %v4203_v6 = vpack.c.bf16 %v656_v62, %v640_v61  ;;  %v639_v7 = vld [vmem:[#allocation8 + $0x910] sm:$0xff] }
  0xc1   :  { %4064 = vmatprep.subr.bf16.mxu0 %v4063_v27  ;;  %v655_v8 = vld [vmem:[#allocation8 + $0x990] sm:$0xff]  ;;  %v4077_v9 = vpack.c.bf16 %v653_v2, %v637_v1  ;;  %v672_v10 = vld [vmem:[#allocation8 + $0xa18] sm:$0xff]  ;;  %v4079_v12 = vpack.c.bf16 %v686_v5, %v670_v4  ;;  %v669_v13 = vld [vmem:[#allocation8 + $0xa00] sm:$0xff] }
  0xc2   :  { %4190 = vmatpush1.bf16.msra.mxu1 %v4189_v30  ;;  %v688_v11 = vld [vmem:[#allocation8 + $0xa98] sm:$0xff]  ;;  %v685_v14 = vld [vmem:[#allocation8 + $0xa80] sm:$0xff]  ;;  %v4205_v15 = vpack.c.bf16 %v655_v8, %v639_v7  ;;  %v702_v16 = vld [vmem:[#allocation8 + $0xb08] sm:$0xff] }
  0xc3   :  { %4192 = vmatprep.subr.bf16.mxu1 %v4191_v33  ;;  %v718_v17 = vld [vmem:[#allocation8 + $0xb88] sm:$0xff]  ;;  %v4207_v18 = vpack.c.bf16 %v688_v11, %v672_v10  ;;  %v671_v19 = vld [vmem:[#allocation8 + $0xa10] sm:$0xff]  ;;  %v4081_v21 = vpack.c.bf16 %v685_v14, %v669_v13  ;;  %v704_v22 = vld [vmem:[#allocation8 + $0xb18] sm:$0xff] }
  0xc4   :  { %4066 = vmatpush1.bf16.msra.mxu0 %v4065_v36  ;;  %v687_v20 = vld [vmem:[#allocation8 + $0xa90] sm:$0xff]  ;;  %v720_v23 = vld [vmem:[#allocation8 + $0xb98] sm:$0xff]  ;;  %v4083_v24 = vpack.c.bf16 %v718_v17, %v702_v16  ;;  %v701_v25 = vld [vmem:[#allocation8 + $0xb00] sm:$0xff] }
  0xc5   :  { %4068 = vmatprep.subr.bf16.mxu0 %v4067_v39  ;;  %v717_v26 = vld [vmem:[#allocation8 + $0xb80] sm:$0xff]  ;;  %v4209_v27 = vpack.c.bf16 %v687_v20, %v671_v19  ;;  %v734_v28 = vld [vmem:[#allocation8 + $0xc08] sm:$0xff]  ;;  %v4211_v30 = vpack.c.bf16 %v720_v23, %v704_v22  ;;  %v703_v31 = vld [vmem:[#allocation8 + $0xb10] sm:$0xff] }
  0xc6   :  { %4194 = vmatpush1.bf16.msra.mxu1 %v4193_v42  ;;  %v750_v29 = vld [vmem:[#allocation8 + $0xc88] sm:$0xff]  ;;  %v719_v32 = vld [vmem:[#allocation8 + $0xb90] sm:$0xff]  ;;  %v4085_v33 = vpack.c.bf16 %v717_v26, %v701_v25  ;;  %v736_v34 = vld [vmem:[#allocation8 + $0xc18] sm:$0xff] }
  0xc7   :  { %4196 = vmatprep.subr.bf16.mxu1 %v4195_v45  ;;  %v752_v35 = vld [vmem:[#allocation8 + $0xc98] sm:$0xff]  ;;  %v4087_v36 = vpack.c.bf16 %v750_v29, %v734_v28  ;;  %v733_v37 = vld [vmem:[#allocation8 + $0xc00] sm:$0xff]  ;;  %v4213_v39 = vpack.c.bf16 %v719_v32, %v703_v31  ;;  %v766_v40 = vld [vmem:[#allocation8 + $0xd08] sm:$0xff] }
  0xc8   :  { %4070 = vmatpush1.bf16.msra.mxu0 %v4069_v48  ;;  %v749_v38 = vld [vmem:[#allocation8 + $0xc80] sm:$0xff]  ;;  %v782_v41 = vld [vmem:[#allocation8 + $0xd88] sm:$0xff]  ;;  %v4215_v42 = vpack.c.bf16 %v752_v35, %v736_v34  ;;  %v735_v43 = vld [vmem:[#allocation8 + $0xc10] sm:$0xff] }
  0xc9   :  { %4072 = vmatprep.subr.bf16.mxu0 %v4071_v51  ;;  %v751_v44 = vld [vmem:[#allocation8 + $0xc90] sm:$0xff]  ;;  %v4089_v45 = vpack.c.bf16 %v749_v38, %v733_v37  ;;  %v768_v46 = vld [vmem:[#allocation8 + $0xd18] sm:$0xff]  ;;  %v4091_v48 = vpack.c.bf16 %v782_v41, %v766_v40  ;;  %v765_v49 = vld [vmem:[#allocation8 + $0xd00] sm:$0xff] }
  0xca   :  { %4198 = vmatpush1.bf16.msra.mxu1 %v4197_v54  ;;  %v784_v47 = vld [vmem:[#allocation8 + $0xd98] sm:$0xff]  ;;  %v781_v50 = vld [vmem:[#allocation8 + $0xd80] sm:$0xff]  ;;  %v4217_v51 = vpack.c.bf16 %v751_v44, %v735_v43  ;;  %v798_v52 = vld [vmem:[#allocation8 + $0xe08] sm:$0xff] }
  0xcb   :  { %4200 = vmatprep.subr.bf16.mxu1 %v4199_v57  ;;  %v814_v53 = vld [vmem:[#allocation8 + $0xe88] sm:$0xff]  ;;  %v4219_v54 = vpack.c.bf16 %v784_v47, %v768_v46  ;;  %v767_v55 = vld [vmem:[#allocation8 + $0xd10] sm:$0xff]  ;;  %v4093_v57 = vpack.c.bf16 %v781_v50, %v765_v49  ;;  %v800_v58 = vld [vmem:[#allocation8 + $0xe18] sm:$0xff] }
  0xcc   :  { %4074 = vmatpush1.bf16.msra.mxu0 %v4073_v60  ;;  %v783_v56 = vld [vmem:[#allocation8 + $0xd90] sm:$0xff]  ;;  %v816_v59 = vld [vmem:[#allocation8 + $0xe98] sm:$0xff]  ;;  %v4095_v60 = vpack.c.bf16 %v814_v53, %v798_v52  ;;  %v813_v1 = vld [vmem:[#allocation8 + $0xe80] sm:$0xff] }
  0xcd   :  { %4076 = vmatprep.subr.bf16.mxu0 %v4075_v63  ;;  %v4221_v61 = vpack.c.bf16 %v783_v56, %v767_v55  ;;  %v4223_v62 = vpack.c.bf16 %v816_v59, %v800_v58  ;;  %v797_v63 = vld [vmem:[#allocation8 + $0xe00] sm:$0xff]  ;;  %v799_v2 = vld [vmem:[#allocation8 + $0xe10] sm:$0xff]  ;;  %v846_v7 = vld [vmem:[#allocation8 + $0xf88] sm:$0xff] }
  0xce   :  { %4202 = vmatpush1.bf16.msra.mxu1 %v4201_v3  ;;  %v4097_v3 = vpack.c.bf16 %v813_v1, %v797_v63  ;;  %v815_v4 = vld [vmem:[#allocation8 + $0xe90] sm:$0xff]  ;;  %v832_v8 = vld [vmem:[#allocation8 + $0xf18] sm:$0xff]  ;;  %v829_v11 = vld [vmem:[#allocation8 + $0xf00] sm:$0xff] }
  0xcf   :  { %4204 = vmatprep.subr.bf16.mxu1 %v4203_v6  ;;  %v4225_v5 = vpack.c.bf16 %v815_v4, %v799_v2  ;;  %v830_v6 = vld [vmem:[#allocation8 + $0xf08] sm:$0xff]  ;;  %v848_v10 = vld [vmem:[#allocation8 + $0xf98] sm:$0xff]  ;;  %v847_v16 = vld [vmem:[#allocation8 + $0xf90] sm:$0xff] }
  0xd0   :  { %4078 = vmatpush1.bf16.msra.mxu0 %v4077_v9  ;;  %v4099_v9 = vpack.c.bf16 %v846_v7, %v830_v6  ;;  %v4227_v13 = vpack.c.bf16 %v848_v10, %v832_v8  ;;  %v878_v19 = vld [vmem:[#allocation8 + $0x1088] sm:$0xff]  ;;  %v864_v20 = vld [vmem:[#allocation8 + $0x1018] sm:$0xff]  ;;  %v877_v37 = vld [vmem:[#allocation8 + $0x1080] sm:$0xff] }
  0xd1   :  { %4080 = vmatprep.subr.bf16.mxu0 %v4079_v12  ;;  %v845_v12 = vld [vmem:[#allocation8 + $0xf80] sm:$0xff]  ;;  %v880_v22 = vld [vmem:[#allocation8 + $0x1098] sm:$0xff]  ;;  %v863_v38 = vld [vmem:[#allocation8 + $0x1010] sm:$0xff] }
  0xd2   :  { %4206 = vmatpush1.bf16.msra.mxu1 %v4205_v15  ;;  %v4101_v14 = vpack.c.bf16 %v845_v12, %v829_v11  ;;  %v831_v15 = vld [vmem:[#allocation8 + $0xf10] sm:$0xff]  ;;  %v4231_v23 = vpack.c.bf16 %v880_v22, %v864_v20  ;;  %v894_v41 = vld [vmem:[#allocation8 + $0x1108] sm:$0xff]  ;;  %v912_v46 = vld [vmem:[#allocation8 + $0x1198] sm:$0xff] }
  0xd3   :  { %4208 = vmatprep.subr.bf16.mxu1 %v4207_v18  ;;  %v4229_v17 = vpack.c.bf16 %v847_v16, %v831_v15  ;;  %v862_v18 = vld [vmem:[#allocation8 + $0x1008] sm:$0xff]  ;;  %v879_v40 = vld [vmem:[#allocation8 + $0x1090] sm:$0xff]  ;;  %v893_v53 = vld [vmem:[#allocation8 + $0x1100] sm:$0xff] }
  0xd4   :  { %4082 = vmatpush1.bf16.msra.mxu0 %v4081_v21  ;;  %v4103_v21 = vpack.c.bf16 %v878_v19, %v862_v18  ;;  %v911_v58 = vld [vmem:[#allocation8 + $0x1190] sm:$0xff]  ;;  %v926_v59 = vld [vmem:[#allocation8 + $0x1208] sm:$0xff]  ;;  %v928_v63 = vld [vmem:[#allocation8 + $0x1218] sm:$0xff] }
  0xd5   :  { %4084 = vmatprep.subr.bf16.mxu0 %v4083_v24  ;;  %v158_v24 = vlaneseq  ;;  %v944_v1 = vld [vmem:[#allocation8 + $0x1298] sm:$0xff]  ;;  %v941_v6 = vld [vmem:[#allocation8 + $0x1280] sm:$0xff]  ;;  %v943_v10 = vld [vmem:[#allocation8 + $0x1290] sm:$0xff] }
  0xd6   :  { %4210 = vmatpush1.bf16.msra.mxu1 %v4209_v27  ;;  %v5811_v27 = vld [vmem:[#allocation7] sm:$0xf]  ;;  %v4239_v8 = vpack.c.bf16 %v944_v1, %v928_v63  ;;  %v958_v11 = vld [vmem:[#allocation8 + $0x1308] sm:$0xff]  ;;  %v973_v18 = vld [vmem:[#allocation8 + $0x1380] sm:$0xff] }
  0xd7   :  { %4212 = vmatprep.subr.bf16.mxu1 %v4211_v30  ;;  %v5806_v25 = vshrl.u32 %v158_v24, 7  ;;  %v974_v12 = vld [vmem:[#allocation8 + $0x1388] sm:$0xff]  ;;  %v975_v22 = vld [vmem:[#allocation8 + $0x1390] sm:$0xff]  ;;  %v1069_v63 = vld [vmem:[#allocation8 + $0x1680] sm:$0xff] }
  0xd8   :  { %4086 = vmatpush1.bf16.msra.mxu0 %v4085_v33  ;;  %v4115_v19 = vpack.c.bf16 %v974_v12, %v958_v11  ;;  %v1085_v12 = vld [vmem:[#allocation8 + $0x1700] sm:$0xff] }
  0xd9   :  { %4088 = vmatprep.subr.bf16.mxu0 %v4087_v36  ;;  %v5809_v26 = vsub.s32 0, %v5806_v25  ;;  %v5814_v28 = vsub.s32 1, %v5806_v25  ;;  %v5817_v29 = vsub.s32 3, %v5806_v25  ;;  %v861_v36 = vld [vmem:[#allocation8 + $0x1000] sm:$0xff] }
  0xda   :  { %4214 = vmatpush1.bf16.msra.mxu1 %v4213_v39  ;;  %v4105_v50 = vpack.c.bf16 %v877_v37, %v861_v36  ;;  %v1005_v36 = vld [vmem:[#allocation8 + $0x1480] sm:$0xff] }
  0xdb   :  { %4216 = vmatprep.subr.bf16.mxu1 %v4215_v42  ;;  %v161_v30 = vrot.slane %v5811_v27, %v5809_v26  ;;  %v165_v31 = vrot.slane %v5811_v27, %v5814_v28  ;;  %v173_v33 = vrot.slane %v5811_v27, %v5817_v29  ;;  %v910_v42 = vld [vmem:[#allocation8 + $0x1188] sm:$0xff] }
  0xdc   :  { %4090 = vmatpush1.bf16.msra.mxu0 %v4089_v45  ;;  %v896_v45 = vld [vmem:[#allocation8 + $0x1118] sm:$0xff]  ;;  %v4107_v52 = vpack.c.bf16 %v910_v42, %v894_v41  ;;  %v1022_v41 = vld [vmem:[#allocation8 + $0x1508] sm:$0xff] }
  0xdd   :  { %4092 = vmatprep.subr.bf16.mxu0 %v4091_v48  ;;  %v4235_v56 = vpack.c.bf16 %v912_v46, %v896_v45  ;;  %v1038_v42 = vld [vmem:[#allocation8 + $0x1588] sm:$0xff]  ;;  %v1040_v45 = vld [vmem:[#allocation8 + $0x1598] sm:$0xff] }
  0xde   :  { %4218 = vmatpush1.bf16.msra.mxu1 %v4217_v51  ;;  %v4233_v51 = vpack.c.bf16 %v879_v40, %v863_v38  ;;  %v1007_v40 = vld [vmem:[#allocation8 + $0x1490] sm:$0xff] }
  0xdf   :  { %4220 = vmatprep.subr.bf16.mxu1 %v4219_v54  ;;  %v909_v54 = vld [vmem:[#allocation8 + $0x1180] sm:$0xff] }
  0xe0   :  { %4094 = vmatpush1.bf16.msra.mxu0 %v4093_v57  ;;  %v895_v57 = vld [vmem:[#allocation8 + $0x1110] sm:$0xff] }
  0xe1   :  { %4096 = vmatprep.subr.bf16.mxu0 %v4095_v60  ;;  %v4237_v4 = vpack.c.bf16 %v911_v58, %v895_v57  ;;  %v1056_v57 = vld [vmem:[#allocation8 + $0x1618] sm:$0xff] }
  0xe2   :  { %4222 = vmatpush1.bf16.msra.mxu1 %v4221_v61  ;;  %v1072_v58 = vld [vmem:[#allocation8 + $0x1698] sm:$0xff] }
  0xe3   :  { %4224 = vmatprep.subr.bf16.mxu1 %v4223_v62  ;;  %v942_v62 = vld [vmem:[#allocation8 + $0x1288] sm:$0xff] }
  0xe4   :  { %4098 = vmatpush1.bf16.msra.mxu0 %v4097_v3  ;;  %v4109_v3 = vpack.c.bf16 %v909_v54, %v893_v53  ;;  %v4111_v7 = vpack.c.bf16 %v942_v62, %v926_v59  ;;  %v1039_v53 = vld [vmem:[#allocation8 + $0x1590] sm:$0xff]  ;;  %v1054_v54 = vld [vmem:[#allocation8 + $0x1608] sm:$0xff]  ;;  %v1053_v62 = vld [vmem:[#allocation8 + $0x1600] sm:$0xff] }
  0xe5   :  { %4100 = vmatprep.subr.bf16.mxu0 %v4099_v9  ;;  %v927_v9 = vld [vmem:[#allocation8 + $0x1210] sm:$0xff] }
  0xe6   :  { %4226 = vmatpush1.bf16.msra.mxu1 %v4225_v5  ;;  %v925_v5 = vld [vmem:[#allocation8 + $0x1200] sm:$0xff]  ;;  %v4241_v16 = vpack.c.bf16 %v943_v10, %v927_v9  ;;  %v1104_v9 = vld [vmem:[#allocation8 + $0x1798] sm:$0xff]  ;;  %v4129_v10 = vpack.c.bf16 %v1069_v63, %v1053_v62  ;;  %v1199_v62 = vld [vmem:[#allocation8 + $0x1a90] sm:$0xff] }
  0xe7   :  { %4228 = vmatprep.subr.bf16.mxu1 %v4227_v13  ;;  %v960_v13 = vld [vmem:[#allocation8 + $0x1318] sm:$0xff]  ;;  %v4113_v15 = vpack.c.bf16 %v941_v6, %v925_v5  ;;  %v1071_v5 = vld [vmem:[#allocation8 + $0x1690] sm:$0xff]  ;;  %v1086_v6 = vld [vmem:[#allocation8 + $0x1708] sm:$0xff] }
  0xe8   :  { %4102 = vmatpush1.bf16.msra.mxu0 %v4101_v14  ;;  %v976_v14 = vld [vmem:[#allocation8 + $0x1398] sm:$0xff]  ;;  %v1214_v63 = vld [vmem:[#allocation8 + $0x1b08] sm:$0xff] }
  0xe9   :  { %4104 = vmatprep.subr.bf16.mxu0 %v4103_v21  ;;  %v4243_v20 = vpack.c.bf16 %v976_v14, %v960_v13  ;;  %v959_v21 = vld [vmem:[#allocation8 + $0x1310] sm:$0xff]  ;;  %v1101_v13 = vld [vmem:[#allocation8 + $0x1780] sm:$0xff] }
  0xea   :  { %4230 = vmatpush1.bf16.msra.mxu1 %v4229_v17  ;;  %v957_v17 = vld [vmem:[#allocation8 + $0x1300] sm:$0xff] }
  0xeb   :  { %4232 = vmatprep.subr.bf16.mxu1 %v4231_v23  ;;  %v990_v23 = vld [vmem:[#allocation8 + $0x1408] sm:$0xff] }
 0x17e   :  { %v261_v32 = vpop.f32.mrb[0].mxu0 }
 0x17f   :  { %v262_v34 = vadd.f32 %v261_v32, %v161_v30  ;;  %v263_v35 = vpop.f32.mrb[1].mxu0  ;;  %v1006_v30 = vld [vmem:[#allocation8 + $0x1488] sm:$0xff]  ;;  %v1008_v32 = vld [vmem:[#allocation8 + $0x1498] sm:$0xff] }
 0x180   :  { %v264_v39 = vadd.f32 %v263_v35, %v165_v31  ;;  %v5825_v43 = vpop.f32.mrb[0].mxu1  ;;  %v992_v31 = vld [vmem:[#allocation8 + $0x1418] sm:$0xff]  ;;  %v989_v35 = vld [vmem:[#allocation8 + $0x1400] sm:$0xff]  ;;  %v4119_v37 = vpack.c.bf16 %v1006_v30, %v990_v23 }
 0x181   :  { %v341_v44 = vmul.f32 0.01, %v262_v34  ;;  %v334_v47 = vpop.f32.mrb[1].mxu1  ;;  %vm337_vm4 = vcmp.gt.f32.partialorder %v262_v34, 0.0  ;;  %v4247_v38 = vpack.c.bf16 %v1008_v32, %v992_v31  ;;  %v4121_v46 = vpack.c.bf16 %v1005_v36, %v989_v35  ;;  %v1117_v30 = vld [vmem:[#allocation8 + $0x1800] sm:$0xff]  ;;  %v1135_v35 = vld [vmem:[#allocation8 + $0x1890] sm:$0xff] }
 0x182   :  { %vm338_vm5 = vcmp.gt.f32.partialorder %v264_v39, 0.0  ;;  %v342_v48 = vmul.f32 0.01, %v264_v39  ;;  %v335_v49 = vadd.f32 %v334_v47, %v173_v33  ;;  %v4117_v33 = vpack.c.bf16 %v973_v18, %v957_v17  ;;  %v1103_v17 = vld [vmem:[#allocation8 + $0x1790] sm:$0xff]  ;;  %v1118_v18 = vld [vmem:[#allocation8 + $0x1808] sm:$0xff]  ;;  %v1133_v31 = vld [vmem:[#allocation8 + $0x1880] sm:$0xff] }
 0x183   :  { %v5830_v61 = vsel %vm337_vm4, %v262_v34, %v341_v44  ;;  %v4245_v34 = vpack.c.bf16 %v975_v22, %v959_v21  ;;  %v1024_v44 = vld [vmem:[#allocation8 + $0x1518] sm:$0xff]  ;;  %v4133_v22 = vpack.c.bf16 %v1101_v13, %v1085_v12  ;;  %v1150_v36 = vld [vmem:[#allocation8 + $0x1908] sm:$0xff]  ;;  %v1231_v12 = vld [vmem:[#allocation8 + $0x1b90] sm:$0xff] }
 0x184   :  { %v5827_v55 = vsel %vm338_vm5, %v264_v39, %v342_v48  ;;  %vm340_vm6 = vcmp.gt.f32.partialorder %v335_v49, 0.0  ;;  %v344_v60 = vmul.f32 0.01, %v335_v49  ;;  %v991_v39 = vld [vmem:[#allocation8 + $0x1410] sm:$0xff]  ;;  %v1021_v48 = vld [vmem:[#allocation8 + $0x1500] sm:$0xff]  ;;  %v1136_v21 = vld [vmem:[#allocation8 + $0x1898] sm:$0xff] }
 0x185   :  { %1521 = vmatprep.mubr.f32.mxu0 %v5827_v55  ;;  %1663 = vmatprep.mubr.f32.mxu1 %v5827_v55  ;;  %v4249_v47 = vpack.c.bf16 %v1007_v40, %v991_v39  ;;  %v1168_v39 = vld [vmem:[#allocation8 + $0x1998] sm:$0xff]  ;;  %v4137_v40 = vpack.c.bf16 %v1133_v31, %v1117_v30  ;;  %v1246_v13 = vld [vmem:[#allocation8 + $0x1c08] sm:$0xff]  ;;  %v1263_v30 = vld [vmem:[#allocation8 + $0x1c90] sm:$0xff] }
 0x186   :  { %1522 = vmatmul.mubr.f32.vlgmr.msra.gmra.mrb[2].mxu0 %v5830_v61  ;;  %1664 = vmatmul.mubr.f32.vlgmr.msra.gmra.mrb[2].mxu1 %v5830_v61  ;;  %v5836_v2 = vsel %vm340_vm6, %v335_v49, %v344_v60  ;;  %v1037_v49 = vld [vmem:[#allocation8 + $0x1580] sm:$0xff]  ;;  %v1278_v31 = vld [vmem:[#allocation8 + $0x1d08] sm:$0xff] }
 0x187   :  { %4106 = vmatpush1.bf16.msra.mxu0 %v4105_v50  ;;  %4234 = vmatpush1.bf16.msra.mxu1 %v4233_v51  ;;  %v4123_v50 = vpack.c.bf16 %v1038_v42, %v1022_v41  ;;  %v4251_v51 = vpack.c.bf16 %v1040_v45, %v1024_v44  ;;  %v4125_v59 = vpack.c.bf16 %v1037_v49, %v1021_v48  ;;  %v1149_v42 = vld [vmem:[#allocation8 + $0x1900] sm:$0xff]  ;;  %v1167_v48 = vld [vmem:[#allocation8 + $0x1990] sm:$0xff]  ;;  %v1182_v49 = vld [vmem:[#allocation8 + $0x1a08] sm:$0xff] }
 0x188   :  { %4108 = vmatprep.subr.bf16.mxu0 %v4107_v52  ;;  %4236 = vmatprep.subr.bf16.mxu1 %v4235_v56  ;;  %v1023_v52 = vld [vmem:[#allocation8 + $0x1510] sm:$0xff]  ;;  %v1070_v56 = vld [vmem:[#allocation8 + $0x1688] sm:$0xff]  ;;  %v1165_v44 = vld [vmem:[#allocation8 + $0x1980] sm:$0xff] }
 0x189   :  { %1592 = vmatprep.mubr.f32.mxu0 %v5836_v2  ;;  %1734 = vmatprep.mubr.f32.mxu1 %v5836_v2  ;;  %v4253_v60 = vpack.c.bf16 %v1039_v53, %v1023_v52  ;;  %v4127_v1 = vpack.c.bf16 %v1070_v56, %v1054_v54  ;;  %v1200_v52 = vld [vmem:[#allocation8 + $0x1a98] sm:$0xff]  ;;  %v4141_v53 = vpack.c.bf16 %v1165_v44, %v1149_v42  ;;  %v1181_v56 = vld [vmem:[#allocation8 + $0x1a00] sm:$0xff]  ;;  %v1295_v42 = vld [vmem:[#allocation8 + $0x1d90] sm:$0xff] }
 0x18a   :  { %v1310_v44 = vld [vmem:[#allocation8 + $0x1e08] sm:$0xff] }
 0x18b   :  { %4110 = vmatpush1.bf16.msra.mxu0 %v4109_v3  ;;  %4238 = vmatpush1.bf16.msra.mxu1 %v4237_v4  ;;  %v4255_v3 = vpack.c.bf16 %v1072_v58, %v1056_v57  ;;  %v1055_v4 = vld [vmem:[#allocation8 + $0x1610] sm:$0xff]  ;;  %v1197_v57 = vld [vmem:[#allocation8 + $0x1a80] sm:$0xff] }
 0x18c   :  { %4112 = vmatprep.subr.bf16.mxu0 %v4111_v7  ;;  %4240 = vmatprep.subr.bf16.mxu1 %v4239_v8  ;;  %v1102_v7 = vld [vmem:[#allocation8 + $0x1788] sm:$0xff]  ;;  %v1088_v8 = vld [vmem:[#allocation8 + $0x1718] sm:$0xff]  ;;  %v4257_v11 = vpack.c.bf16 %v1071_v5, %v1055_v4  ;;  %v4145_v5 = vpack.c.bf16 %v1197_v57, %v1181_v56  ;;  %v1311_v56 = vld [vmem:[#allocation8 + $0x1e10] sm:$0xff] }
 0x18d   :  { %v4131_v14 = vpack.c.bf16 %v1102_v7, %v1086_v6  ;;  %v1232_v4 = vld [vmem:[#allocation8 + $0x1b98] sm:$0xff]  ;;  %v1213_v7 = vld [vmem:[#allocation8 + $0x1b00] sm:$0xff]  ;;  %v1327_v57 = vld [vmem:[#allocation8 + $0x1e90] sm:$0xff] }
 0x18f   :  { %4114 = vmatpush1.bf16.msra.mxu0 %v4113_v15  ;;  %4242 = vmatpush1.bf16.msra.mxu1 %v4241_v16  ;;  %v4259_v15 = vpack.c.bf16 %v1104_v9, %v1088_v8  ;;  %v1087_v16 = vld [vmem:[#allocation8 + $0x1710] sm:$0xff]  ;;  %v1229_v8 = vld [vmem:[#allocation8 + $0x1b80] sm:$0xff] }
 0x190   :  { %4116 = vmatprep.subr.bf16.mxu0 %v4115_v19  ;;  %4244 = vmatprep.subr.bf16.mxu1 %v4243_v20  ;;  %v1134_v19 = vld [vmem:[#allocation8 + $0x1888] sm:$0xff]  ;;  %v1120_v20 = vld [vmem:[#allocation8 + $0x1818] sm:$0xff]  ;;  %v4261_v23 = vpack.c.bf16 %v1103_v17, %v1087_v16  ;;  %v4149_v17 = vpack.c.bf16 %v1229_v8, %v1213_v7  ;;  %v1343_v8 = vld [vmem:[#allocation8 + $0x1f10] sm:$0xff] }
 0x191   :  { %v4135_v32 = vpack.c.bf16 %v1134_v19, %v1118_v18  ;;  %v1264_v16 = vld [vmem:[#allocation8 + $0x1c98] sm:$0xff]  ;;  %v1245_v19 = vld [vmem:[#allocation8 + $0x1c00] sm:$0xff] }
 0x193   :  { %4118 = vmatpush1.bf16.msra.mxu0 %v4117_v33  ;;  %4246 = vmatpush1.bf16.msra.mxu1 %v4245_v34  ;;  %v4263_v33 = vpack.c.bf16 %v1136_v21, %v1120_v20  ;;  %v1119_v34 = vld [vmem:[#allocation8 + $0x1810] sm:$0xff]  ;;  %v1261_v20 = vld [vmem:[#allocation8 + $0x1c80] sm:$0xff] }
 0x194   :  { %4120 = vmatprep.subr.bf16.mxu0 %v4119_v37  ;;  %4248 = vmatprep.subr.bf16.mxu1 %v4247_v38  ;;  %v1166_v37 = vld [vmem:[#allocation8 + $0x1988] sm:$0xff]  ;;  %v1152_v38 = vld [vmem:[#allocation8 + $0x1918] sm:$0xff]  ;;  %v4265_v41 = vpack.c.bf16 %v1135_v35, %v1119_v34  ;;  %v4153_v35 = vpack.c.bf16 %v1261_v20, %v1245_v19  ;;  %v369_v19 = vld [vmem:[#allocation8 + $0xa0] sm:$0xff] }
 0x195   :  { %v4139_v45 = vpack.c.bf16 %v1166_v37, %v1150_v36  ;;  %v1296_v34 = vld [vmem:[#allocation8 + $0x1d98] sm:$0xff]  ;;  %v1277_v37 = vld [vmem:[#allocation8 + $0x1d00] sm:$0xff] }
 0x197   :  { %4122 = vmatpush1.bf16.msra.mxu0 %v4121_v46  ;;  %4250 = vmatpush1.bf16.msra.mxu1 %v4249_v47  ;;  %v4267_v46 = vpack.c.bf16 %v1168_v39, %v1152_v38  ;;  %v1151_v47 = vld [vmem:[#allocation8 + $0x1910] sm:$0xff]  ;;  %v1293_v38 = vld [vmem:[#allocation8 + $0x1d80] sm:$0xff] }
 0x198   :  { %4124 = vmatprep.subr.bf16.mxu0 %v4123_v50  ;;  %4252 = vmatprep.subr.bf16.mxu1 %v4251_v51  ;;  %v1198_v50 = vld [vmem:[#allocation8 + $0x1a88] sm:$0xff]  ;;  %v1184_v51 = vld [vmem:[#allocation8 + $0x1a18] sm:$0xff]  ;;  %v4269_v54 = vpack.c.bf16 %v1167_v48, %v1151_v47 }
 0x199   :  { %v4143_v58 = vpack.c.bf16 %v1198_v50, %v1182_v49  ;;  %v1312_v47 = vld [vmem:[#allocation8 + $0x1e18] sm:$0xff]  ;;  %v4157_v49 = vpack.c.bf16 %v1293_v38, %v1277_v37 }
 0x19a   :  { %v1328_v48 = vld [vmem:[#allocation8 + $0x1e98] sm:$0xff] }
 0x19b   :  { %4126 = vmatpush1.bf16.msra.mxu0 %v4125_v59  ;;  %4254 = vmatpush1.bf16.msra.mxu1 %v4253_v60  ;;  %v4271_v59 = vpack.c.bf16 %v1200_v52, %v1184_v51  ;;  %v1183_v60 = vld [vmem:[#allocation8 + $0x1a10] sm:$0xff]  ;;  %v1309_v51 = vld [vmem:[#allocation8 + $0x1e00] sm:$0xff] }
 0x19c   :  { %4128 = vmatprep.subr.bf16.mxu0 %v4127_v1  ;;  %4256 = vmatprep.subr.bf16.mxu1 %v4255_v3  ;;  %v1230_v1 = vld [vmem:[#allocation8 + $0x1b88] sm:$0xff]  ;;  %v1216_v3 = vld [vmem:[#allocation8 + $0x1b18] sm:$0xff]  ;;  %v4273_v6 = vpack.c.bf16 %v1199_v62, %v1183_v60  ;;  %v1325_v52 = vld [vmem:[#allocation8 + $0x1e80] sm:$0xff] }
 0x19d   :  { %v4147_v9 = vpack.c.bf16 %v1230_v1, %v1214_v63  ;;  %v1358_v60 = vld [vmem:[#allocation8 + $0x1f88] sm:$0xff]  ;;  %v1344_v62 = vld [vmem:[#allocation8 + $0x1f18] sm:$0xff]  ;;  %v4161_v1 = vpack.c.bf16 %v1325_v52, %v1309_v51  ;;  %v433_v51 = vld [vmem:[#allocation8 + $0x2a0] sm:$0xff] }
 0x19e   :  { %v1360_v63 = vld [vmem:[#allocation8 + $0x1f98] sm:$0xff]  ;;  %v419_v52 = vld [vmem:[#allocation8 + $0x230] sm:$0xff] }
 0x19f   :  { %4130 = vmatpush1.bf16.msra.mxu0 %v4129_v10  ;;  %4258 = vmatpush1.bf16.msra.mxu1 %v4257_v11  ;;  %v4275_v10 = vpack.c.bf16 %v1232_v4, %v1216_v3  ;;  %v1215_v11 = vld [vmem:[#allocation8 + $0x1b10] sm:$0xff]  ;;  %v4289_v3 = vpack.c.bf16 %v1327_v57, %v1311_v56  ;;  %v1341_v4 = vld [vmem:[#allocation8 + $0x1f00] sm:$0xff]  ;;  %v4291_v7 = vpack.c.bf16 %v1360_v63, %v1344_v62  ;;  %v450_v56 = vld [vmem:[#allocation8 + $0x328] sm:$0xff] }
 0x1a0   :  { %4132 = vmatprep.subr.bf16.mxu0 %v4131_v14  ;;  %4260 = vmatprep.subr.bf16.mxu1 %v4259_v15  ;;  %v1262_v14 = vld [vmem:[#allocation8 + $0x1c88] sm:$0xff]  ;;  %v1248_v15 = vld [vmem:[#allocation8 + $0x1c18] sm:$0xff]  ;;  %v4277_v18 = vpack.c.bf16 %v1231_v12, %v1215_v11 }
 0x1a1   :  { %v4151_v21 = vpack.c.bf16 %v1262_v14, %v1246_v13  ;;  %v370_v12 = vld [vmem:[#allocation8 + $0xa8] sm:$0xff]  ;;  %v372_v13 = vld [vmem:[#allocation8 + $0xb8] sm:$0xff] }
 0x1a2   :  { %v466_v57 = vld [vmem:[#allocation8 + $0x3a8] sm:$0xff] }
 0x1a3   :  { %4134 = vmatpush1.bf16.msra.mxu0 %v4133_v22  ;;  %4262 = vmatpush1.bf16.msra.mxu1 %v4261_v23  ;;  %v4279_v22 = vpack.c.bf16 %v1264_v16, %v1248_v15  ;;  %v1247_v23 = vld [vmem:[#allocation8 + $0x1c10] sm:$0xff]  ;;  %v4307_v63 = vpack.c.bf16 %v466_v57, %v450_v56 }
 0x1a4   :  { %4136 = vmatprep.subr.bf16.mxu0 %v4135_v32  ;;  %4264 = vmatprep.subr.bf16.mxu1 %v4263_v33  ;;  %v1294_v32 = vld [vmem:[#allocation8 + $0x1d88] sm:$0xff]  ;;  %v1280_v33 = vld [vmem:[#allocation8 + $0x1d18] sm:$0xff]  ;;  %v4281_v36 = vpack.c.bf16 %v1263_v30, %v1247_v23 }
 0x1a5   :  { %v4155_v39 = vpack.c.bf16 %v1294_v32, %v1278_v31  ;;  %v386_v23 = vld [vmem:[#allocation8 + $0x128] sm:$0xff]  ;;  %v404_v31 = vld [vmem:[#allocation8 + $0x1b8] sm:$0xff] }
 0x1a6   :  { %v402_v30 = vld [vmem:[#allocation8 + $0x1a8] sm:$0xff] }
 0x1a7   :  { %4138 = vmatpush1.bf16.msra.mxu0 %v4137_v40  ;;  %4266 = vmatpush1.bf16.msra.mxu1 %v4265_v41  ;;  %v4283_v40 = vpack.c.bf16 %v1296_v34, %v1280_v33  ;;  %v1279_v41 = vld [vmem:[#allocation8 + $0x1d10] sm:$0xff]  ;;  %v385_v34 = vld [vmem:[#allocation8 + $0x120] sm:$0xff]  ;;  %v4299_v38 = vpack.c.bf16 %v402_v30, %v386_v23 }
 0x1a8   :  { %4140 = vmatprep.subr.bf16.mxu0 %v4139_v45  ;;  %4268 = vmatprep.subr.bf16.mxu1 %v4267_v46  ;;  %v5841_v45 = vsub.s32 2, %v5806_v25  ;;  %v1326_v46 = vld [vmem:[#allocation8 + $0x1e88] sm:$0xff]  ;;  %v4285_v50 = vpack.c.bf16 %v1295_v42, %v1279_v41 }
 0x1a9   :  { %v418_v41 = vld [vmem:[#allocation8 + $0x228] sm:$0xff] }
 0x1aa   :  { %v434_v42 = vld [vmem:[#allocation8 + $0x2a8] sm:$0xff] }
 0x1ab   :  { %4142 = vmatpush1.bf16.msra.mxu0 %v4141_v53  ;;  %4270 = vmatpush1.bf16.msra.mxu1 %v4269_v54  ;;  %v4159_v53 = vpack.c.bf16 %v1326_v46, %v1310_v44  ;;  %v4287_v54 = vpack.c.bf16 %v1328_v48, %v1312_v47  ;;  %v420_v44 = vld [vmem:[#allocation8 + $0x238] sm:$0xff] }
 0x1ac   :  { %4144 = vmatprep.subr.bf16.mxu0 %v4143_v58  ;;  %4272 = vmatprep.subr.bf16.mxu1 %v4271_v59  ;;  %v1342_v58 = vld [vmem:[#allocation8 + $0x1f08] sm:$0xff]  ;;  %v169_v59 = vrot.slane %v5811_v27, %v5841_v45  ;;  %v356_v27 = vld [vmem:[#allocation8 + $0x38] sm:$0xff] }
 0x1ad   :  { %v436_v46 = vld [vmem:[#allocation8 + $0x2b8] sm:$0xff] }
 0x1ae   :  { %v333_v11 = vadd.f32 %v5825_v43, %v169_v59  ;;  %v388_v43 = vld [vmem:[#allocation8 + $0x138] sm:$0xff] }
 0x1af   :  { %4146 = vmatpush1.bf16.msra.mxu0 %v4145_v5  ;;  %4274 = vmatpush1.bf16.msra.mxu1 %v4273_v6  ;;  %v1357_v5 = vld [vmem:[#allocation8 + $0x1f80] sm:$0xff]  ;;  %v4163_v6 = vpack.c.bf16 %v1358_v60, %v1342_v58  ;;  %v452_v58 = vld [vmem:[#allocation8 + $0x338] sm:$0xff] }
 0x1b0   :  { %4148 = vmatprep.subr.bf16.mxu0 %v4147_v9  ;;  %4276 = vmatprep.subr.bf16.mxu1 %v4275_v10  ;;  %v1359_v9 = vld [vmem:[#allocation8 + $0x1f90] sm:$0xff]  ;;  %v354_v10 = vld [vmem:[#allocation8 + $0x28] sm:$0xff]  ;;  %v4165_v14 = vpack.c.bf16 %v1357_v5, %v1341_v4  ;;  %v343_v20 = vmul.f32 0.01, %v333_v11  ;;  %vm339_vm7 = vcmp.gt.f32.partialorder %v333_v11, 0.0  ;;  %v468_v59 = vld [vmem:[#allocation8 + $0x3b8] sm:$0xff] }
 0x1b1   :  { %v4293_v15 = vpack.c.bf16 %v1359_v9, %v1343_v8  ;;  %v4295_v16 = vpack.c.bf16 %v370_v12, %v354_v10  ;;  %v451_v4 = vld [vmem:[#allocation8 + $0x330] sm:$0xff]  ;;  %v4435_v5 = vpack.c.bf16 %v468_v59, %v452_v58  ;;  %v498_v8 = vld [vmem:[#allocation8 + $0x4a8] sm:$0xff]  ;;  %v484_v9 = vld [vmem:[#allocation8 + $0x438] sm:$0xff] }
 0x1b2   :  { %v5846_v37 = vsel %vm339_vm7, %v333_v11, %v343_v20  ;;  %v500_v10 = vld [vmem:[#allocation8 + $0x4b8] sm:$0xff]  ;;  %v577_v58 = vld [vmem:[#allocation8 + $0x720] sm:$0xff] }
 0x1b3   :  { %4150 = vmatpush1.bf16.msra.mxu0 %v4149_v17  ;;  %4278 = vmatpush1.bf16.msra.mxu1 %v4277_v18  ;;  %v4423_v17 = vpack.c.bf16 %v372_v13, %v356_v27  ;;  %v353_v18 = vld [vmem:[#allocation8 + $0x20] sm:$0xff]  ;;  %v516_v20 = vld [vmem:[#allocation8 + $0x538] sm:$0xff] }
 0x1b4   :  { %4152 = vmatprep.subr.bf16.mxu0 %v4151_v21  ;;  %4280 = vmatprep.subr.bf16.mxu1 %v4279_v22  ;;  %v355_v21 = vld [vmem:[#allocation8 + $0x30] sm:$0xff]  ;;  %v4297_v32 = vpack.c.bf16 %v369_v19, %v353_v18  ;;  %v481_v13 = vld [vmem:[#allocation8 + $0x420] sm:$0xff]  ;;  %v514_v18 = vld [vmem:[#allocation8 + $0x528] sm:$0xff] }
 0x1b5   :  { %v371_v22 = vld [vmem:[#allocation8 + $0xb0] sm:$0xff]  ;;  %v530_v19 = vld [vmem:[#allocation8 + $0x5a8] sm:$0xff]  ;;  %v593_v59 = vld [vmem:[#allocation8 + $0x7a0] sm:$0xff] }
 0x1b6   :  { %v4425_v33 = vpack.c.bf16 %v371_v22, %v355_v21  ;;  %v532_v21 = vld [vmem:[#allocation8 + $0x5b8] sm:$0xff]  ;;  %v4315_v30 = vpack.c.bf16 %v530_v19, %v514_v18 }
 0x1b7   :  { %4154 = vmatpush1.bf16.msra.mxu0 %v4153_v35  ;;  %4282 = vmatpush1.bf16.msra.mxu1 %v4281_v36  ;;  %v401_v35 = vld [vmem:[#allocation8 + $0x1a0] sm:$0xff]  ;;  %v387_v36 = vld [vmem:[#allocation8 + $0x130] sm:$0xff] }
 0x1b8   :  { %4156 = vmatprep.subr.bf16.mxu0 %v4155_v39  ;;  %4284 = vmatprep.subr.bf16.mxu1 %v4283_v40  ;;  %v4427_v39 = vpack.c.bf16 %v404_v31, %v388_v43  ;;  %v403_v40 = vld [vmem:[#allocation8 + $0x1b0] sm:$0xff]  ;;  %v4301_v47 = vpack.c.bf16 %v401_v35, %v385_v34  ;;  %v513_v43 = vld [vmem:[#allocation8 + $0x520] sm:$0xff]  ;;  %v546_v35 = vld [vmem:[#allocation8 + $0x628] sm:$0xff] }
 0x1b9   :  { %v4429_v48 = vpack.c.bf16 %v403_v40, %v387_v36  ;;  %v529_v31 = vld [vmem:[#allocation8 + $0x5a0] sm:$0xff]  ;;  %v531_v34 = vld [vmem:[#allocation8 + $0x5b0] sm:$0xff]  ;;  %v562_v36 = vld [vmem:[#allocation8 + $0x6a8] sm:$0xff] }
 0x1ba   :  { %v4317_v40 = vpack.c.bf16 %v529_v31, %v513_v43  ;;  %v674_v43 = vld [vmem:[#allocation8 + $0xa28] sm:$0xff] }
 0x1bb   :  { %4158 = vmatpush1.bf16.msra.mxu0 %v4157_v49  ;;  %4286 = vmatpush1.bf16.msra.mxu1 %v4285_v50  ;;  %v4303_v49 = vpack.c.bf16 %v434_v42, %v418_v41  ;;  %v417_v50 = vld [vmem:[#allocation8 + $0x220] sm:$0xff]  ;;  %v4319_v42 = vpack.c.bf16 %v562_v36, %v546_v35  ;;  %v690_v31 = vld [vmem:[#allocation8 + $0xaa8] sm:$0xff] }
 0x1bc   :  { %4160 = vmatprep.subr.bf16.mxu0 %v4159_v53  ;;  %4288 = vmatprep.subr.bf16.mxu1 %v4287_v54  ;;  %v4431_v53 = vpack.c.bf16 %v436_v46, %v420_v44  ;;  %v435_v54 = vld [vmem:[#allocation8 + $0x2b0] sm:$0xff]  ;;  %v4305_v60 = vpack.c.bf16 %v433_v51, %v417_v50  ;;  %v545_v44 = vld [vmem:[#allocation8 + $0x620] sm:$0xff]  ;;  %v578_v50 = vld [vmem:[#allocation8 + $0x728] sm:$0xff]  ;;  %v4335_v36 = vpack.c.bf16 %v690_v31, %v674_v43 }
 0x1bd   :  { %v4433_v62 = vpack.c.bf16 %v435_v54, %v419_v52  ;;  %v561_v46 = vld [vmem:[#allocation8 + $0x6a0] sm:$0xff]  ;;  %v594_v51 = vld [vmem:[#allocation8 + $0x7a8] sm:$0xff]  ;;  %v580_v52 = vld [vmem:[#allocation8 + $0x738] sm:$0xff] }
 0x1be   :  { %v4321_v54 = vpack.c.bf16 %v561_v46, %v545_v44  ;;  %v4323_v57 = vpack.c.bf16 %v594_v51, %v578_v50  ;;  %v706_v44 = vld [vmem:[#allocation8 + $0xb28] sm:$0xff] }
 0x1bf   :  { %4162 = vmatpush1.bf16.msra.mxu0 %v4161_v1  ;;  %4290 = vmatpush1.bf16.msra.mxu1 %v4289_v3  ;;  %v449_v1 = vld [vmem:[#allocation8 + $0x320] sm:$0xff]  ;;  %v722_v46 = vld [vmem:[#allocation8 + $0xba8] sm:$0xff] }
 0x1c0   :  { %4164 = vmatprep.subr.bf16.mxu0 %v4163_v6  ;;  %4292 = vmatprep.subr.bf16.mxu1 %v4291_v7  ;;  %v465_v3 = vld [vmem:[#allocation8 + $0x3a0] sm:$0xff]  ;;  %v467_v6 = vld [vmem:[#allocation8 + $0x3b0] sm:$0xff]  ;;  %v482_v7 = vld [vmem:[#allocation8 + $0x428] sm:$0xff]  ;;  %v4339_v51 = vpack.c.bf16 %v722_v46, %v706_v44 }
 0x1c1   :  { %v4309_v11 = vpack.c.bf16 %v465_v3, %v449_v1  ;;  %v4437_v12 = vpack.c.bf16 %v467_v6, %v451_v4  ;;  %v4311_v27 = vpack.c.bf16 %v498_v8, %v482_v7  ;;  %v610_v1 = vld [vmem:[#allocation8 + $0x828] sm:$0xff]  ;;  %v612_v4 = vld [vmem:[#allocation8 + $0x838] sm:$0xff]  ;;  %v4325_v6 = vpack.c.bf16 %v593_v59, %v577_v58 }
 0x1c2   :  { %v626_v3 = vld [vmem:[#allocation8 + $0x8a8] sm:$0xff] }
 0x1c3   :  { %4166 = vmatpush1.bf16.msra.mxu0 %v4165_v14  ;;  %4294 = vmatpush1.bf16.msra.mxu1 %v4293_v15  ;;  %v497_v14 = vld [vmem:[#allocation8 + $0x4a0] sm:$0xff]  ;;  %v483_v15 = vld [vmem:[#allocation8 + $0x430] sm:$0xff]  ;;  %v4327_v8 = vpack.c.bf16 %v626_v3, %v610_v1  ;;  %v738_v58 = vld [vmem:[#allocation8 + $0xc28] sm:$0xff] }
 0x1c4   :  { %4296 = vmatprep.subr.bf16.mxu0 %v4295_v16  ;;  %4424 = vmatprep.subr.bf16.mxu1 %v4423_v17  ;;  %v4439_v16 = vpack.c.bf16 %v500_v10, %v484_v9  ;;  %v499_v17 = vld [vmem:[#allocation8 + $0x4b0] sm:$0xff]  ;;  %v4313_v22 = vpack.c.bf16 %v497_v14, %v481_v13  ;;  %v609_v9 = vld [vmem:[#allocation8 + $0x820] sm:$0xff]  ;;  %v642_v13 = vld [vmem:[#allocation8 + $0x928] sm:$0xff] }
 0x1c5   :  { %v4441_v23 = vpack.c.bf16 %v499_v17, %v483_v15  ;;  %v625_v10 = vld [vmem:[#allocation8 + $0x8a0] sm:$0xff]  ;;  %v658_v14 = vld [vmem:[#allocation8 + $0x9a8] sm:$0xff]  ;;  %v644_v15 = vld [vmem:[#allocation8 + $0x938] sm:$0xff] }
 0x1c6   :  { %1593 = vmatmul.mubr.f32.vlgmr.msra.gmra.mrb[2].mxu0 %v5846_v37  ;;  %1735 = vmatmul.mubr.f32.vlgmr.msra.gmra.mrb[2].mxu1 %v5846_v37  ;;  %v4329_v17 = vpack.c.bf16 %v625_v10, %v609_v9  ;;  %v4331_v19 = vpack.c.bf16 %v658_v14, %v642_v13  ;;  %v754_v59 = vld [vmem:[#allocation8 + $0xca8] sm:$0xff] }
 0x1c7   :  { %4298 = vmatpush1.bf16.msra.mxu0 %v4297_v32  ;;  %1805 = vmatprep.mubr.f32.mxu0 %v5827_v55  ;;  %v515_v32 = vld [vmem:[#allocation8 + $0x530] sm:$0xff]  ;;  %v4343_v3 = vpack.c.bf16 %v754_v59, %v738_v58  ;;  %v770_v9 = vld [vmem:[#allocation8 + $0xd28] sm:$0xff] }
 0x1c8   :  { %4426 = vmatpush1.bf16.msra.mxu1 %v4425_v33  ;;  %1947 = vmatprep.mubr.f32.mxu1 %v5827_v55  ;;  %v4443_v33 = vpack.c.bf16 %v532_v21, %v516_v20  ;;  %v4445_v41 = vpack.c.bf16 %v531_v34, %v515_v32  ;;  %v641_v20 = vld [vmem:[#allocation8 + $0x920] sm:$0xff]  ;;  %v676_v32 = vld [vmem:[#allocation8 + $0xa38] sm:$0xff]  ;;  %v786_v10 = vld [vmem:[#allocation8 + $0xda8] sm:$0xff] }
 0x1c9   :  { %4300 = vmatprep.subr.bf16.mxu0 %v4299_v38  ;;  %4428 = vmatprep.subr.bf16.mxu1 %v4427_v39  ;;  %v548_v38 = vld [vmem:[#allocation8 + $0x638] sm:$0xff]  ;;  %v657_v21 = vld [vmem:[#allocation8 + $0x9a0] sm:$0xff]  ;;  %v4347_v14 = vpack.c.bf16 %v786_v10, %v770_v9 }
 0x1ca   :  { %v564_v39 = vld [vmem:[#allocation8 + $0x6b8] sm:$0xff]  ;;  %v4333_v34 = vpack.c.bf16 %v657_v21, %v641_v20  ;;  %v802_v20 = vld [vmem:[#allocation8 + $0xe28] sm:$0xff]  ;;  %v897_v10 = vld [vmem:[#allocation8 + $0x1120] sm:$0xff] }
 0x1cb   :  { %4302 = vmatpush1.bf16.msra.mxu0 %v4301_v47  ;;  %v547_v47 = vld [vmem:[#allocation8 + $0x630] sm:$0xff]  ;;  %v818_v21 = vld [vmem:[#allocation8 + $0xea8] sm:$0xff] }
 0x1cc   :  { %4430 = vmatpush1.bf16.msra.mxu1 %v4429_v48  ;;  %4304 = vmatprep.subr.bf16.mxu0 %v4303_v49  ;;  %v4447_v48 = vpack.c.bf16 %v564_v39, %v548_v38  ;;  %v563_v49 = vld [vmem:[#allocation8 + $0x6b0] sm:$0xff]  ;;  %v673_v38 = vld [vmem:[#allocation8 + $0xa20] sm:$0xff]  ;;  %v4351_v31 = vpack.c.bf16 %v818_v21, %v802_v20 }
 0x1cd   :  { %4432 = vmatprep.subr.bf16.mxu1 %v4431_v53  ;;  %v596_v53 = vld [vmem:[#allocation8 + $0x7b8] sm:$0xff]  ;;  %v4449_v56 = vpack.c.bf16 %v563_v49, %v547_v47  ;;  %v689_v39 = vld [vmem:[#allocation8 + $0xaa0] sm:$0xff] }
 0x1ce   :  { %v708_v47 = vld [vmem:[#allocation8 + $0xb38] sm:$0xff]  ;;  %v4337_v49 = vpack.c.bf16 %v689_v39, %v673_v38  ;;  %v834_v38 = vld [vmem:[#allocation8 + $0xf28] sm:$0xff] }
 0x1cf   :  { %4306 = vmatpush1.bf16.msra.mxu0 %v4305_v60  ;;  %v579_v60 = vld [vmem:[#allocation8 + $0x730] sm:$0xff]  ;;  %v850_v39 = vld [vmem:[#allocation8 + $0xfa8] sm:$0xff] }
 0x1d0   :  { %4434 = vmatpush1.bf16.msra.mxu1 %v4433_v62  ;;  %4308 = vmatprep.subr.bf16.mxu0 %v4307_v63  ;;  %v4451_v62 = vpack.c.bf16 %v596_v53, %v580_v52  ;;  %v595_v63 = vld [vmem:[#allocation8 + $0x7b0] sm:$0xff]  ;;  %v705_v52 = vld [vmem:[#allocation8 + $0xb20] sm:$0xff]  ;;  %v4355_v46 = vpack.c.bf16 %v850_v39, %v834_v38 }
 0x1d1   :  { %4436 = vmatprep.subr.bf16.mxu1 %v4435_v5  ;;  %v628_v5 = vld [vmem:[#allocation8 + $0x8b8] sm:$0xff]  ;;  %v4453_v7 = vpack.c.bf16 %v595_v63, %v579_v60  ;;  %v721_v53 = vld [vmem:[#allocation8 + $0xba0] sm:$0xff] }
 0x1d2   :  { %v740_v60 = vld [vmem:[#allocation8 + $0xc38] sm:$0xff]  ;;  %v4341_v63 = vpack.c.bf16 %v721_v53, %v705_v52  ;;  %v866_v52 = vld [vmem:[#allocation8 + $0x1028] sm:$0xff] }
 0x1d3   :  { %4310 = vmatpush1.bf16.msra.mxu0 %v4309_v11  ;;  %v611_v11 = vld [vmem:[#allocation8 + $0x830] sm:$0xff]  ;;  %v882_v53 = vld [vmem:[#allocation8 + $0x10a8] sm:$0xff] }
 0x1d4   :  { %4438 = vmatpush1.bf16.msra.mxu1 %v4437_v12  ;;  %4312 = vmatprep.subr.bf16.mxu0 %v4311_v27  ;;  %v4455_v12 = vpack.c.bf16 %v628_v5, %v612_v4  ;;  %v627_v27 = vld [vmem:[#allocation8 + $0x8b0] sm:$0xff]  ;;  %v737_v4 = vld [vmem:[#allocation8 + $0xc20] sm:$0xff]  ;;  %v4359_v59 = vpack.c.bf16 %v882_v53, %v866_v52 }
 0x1d5   :  { %4440 = vmatprep.subr.bf16.mxu1 %v4439_v16  ;;  %v660_v16 = vld [vmem:[#allocation8 + $0x9b8] sm:$0xff]  ;;  %v4457_v18 = vpack.c.bf16 %v627_v27, %v611_v11  ;;  %v753_v5 = vld [vmem:[#allocation8 + $0xca0] sm:$0xff] }
 0x1d6   :  { %v772_v11 = vld [vmem:[#allocation8 + $0xd38] sm:$0xff]  ;;  %v4345_v27 = vpack.c.bf16 %v753_v5, %v737_v4  ;;  %v898_v4 = vld [vmem:[#allocation8 + $0x1128] sm:$0xff] }
 0x1d7   :  { %4314 = vmatpush1.bf16.msra.mxu0 %v4313_v22  ;;  %v643_v22 = vld [vmem:[#allocation8 + $0x930] sm:$0xff]  ;;  %v914_v5 = vld [vmem:[#allocation8 + $0x11a8] sm:$0xff] }
 0x1d8   :  { %4442 = vmatpush1.bf16.msra.mxu1 %v4441_v23  ;;  %4316 = vmatprep.subr.bf16.mxu0 %v4315_v30  ;;  %v4459_v23 = vpack.c.bf16 %v660_v16, %v644_v15  ;;  %v659_v30 = vld [vmem:[#allocation8 + $0x9b0] sm:$0xff]  ;;  %v769_v15 = vld [vmem:[#allocation8 + $0xd20] sm:$0xff] }
 0x1d9   :  { %4444 = vmatprep.subr.bf16.mxu1 %v4443_v33  ;;  %v692_v33 = vld [vmem:[#allocation8 + $0xab8] sm:$0xff]  ;;  %v4461_v35 = vpack.c.bf16 %v659_v30, %v643_v22  ;;  %v785_v16 = vld [vmem:[#allocation8 + $0xda0] sm:$0xff] }
 0x1da   :  { %v804_v22 = vld [vmem:[#allocation8 + $0xe38] sm:$0xff]  ;;  %v4349_v30 = vpack.c.bf16 %v785_v16, %v769_v15  ;;  %v946_v15 = vld [vmem:[#allocation8 + $0x12a8] sm:$0xff] }
 0x1db   :  { %4318 = vmatpush1.bf16.msra.mxu0 %v4317_v40  ;;  %v675_v40 = vld [vmem:[#allocation8 + $0xa30] sm:$0xff] }
 0x1dc   :  { %4446 = vmatpush1.bf16.msra.mxu1 %v4445_v41  ;;  %4320 = vmatprep.subr.bf16.mxu0 %v4319_v42  ;;  %v4463_v41 = vpack.c.bf16 %v692_v33, %v676_v32  ;;  %v691_v42 = vld [vmem:[#allocation8 + $0xab0] sm:$0xff]  ;;  %v801_v32 = vld [vmem:[#allocation8 + $0xe20] sm:$0xff] }
 0x1dd   :  { %4448 = vmatprep.subr.bf16.mxu1 %v4447_v48  ;;  %v724_v48 = vld [vmem:[#allocation8 + $0xbb8] sm:$0xff]  ;;  %v4465_v50 = vpack.c.bf16 %v691_v42, %v675_v40  ;;  %v817_v33 = vld [vmem:[#allocation8 + $0xea0] sm:$0xff] }
 0x1de   :  { %v836_v40 = vld [vmem:[#allocation8 + $0xf38] sm:$0xff]  ;;  %v4353_v42 = vpack.c.bf16 %v817_v33, %v801_v32  ;;  %v962_v32 = vld [vmem:[#allocation8 + $0x1328] sm:$0xff] }
 0x1df   :  { %4322 = vmatpush1.bf16.msra.mxu0 %v4321_v54  ;;  %v707_v54 = vld [vmem:[#allocation8 + $0xb30] sm:$0xff]  ;;  %v978_v33 = vld [vmem:[#allocation8 + $0x13a8] sm:$0xff] }
 0x1e0   :  { %4450 = vmatpush1.bf16.msra.mxu1 %v4449_v56  ;;  %4324 = vmatprep.subr.bf16.mxu0 %v4323_v57  ;;  %v4467_v56 = vpack.c.bf16 %v724_v48, %v708_v47  ;;  %v723_v57 = vld [vmem:[#allocation8 + $0xbb0] sm:$0xff]  ;;  %v833_v47 = vld [vmem:[#allocation8 + $0xf20] sm:$0xff]  ;;  %v4371_v39 = vpack.c.bf16 %v978_v33, %v962_v32 }
 0x1e1   :  { %4452 = vmatprep.subr.bf16.mxu1 %v4451_v62  ;;  %v756_v62 = vld [vmem:[#allocation8 + $0xcb8] sm:$0xff]  ;;  %v4469_v1 = vpack.c.bf16 %v723_v57, %v707_v54  ;;  %v849_v48 = vld [vmem:[#allocation8 + $0xfa0] sm:$0xff] }
 0x1e2   :  { %v868_v54 = vld [vmem:[#allocation8 + $0x1038] sm:$0xff]  ;;  %v4357_v57 = vpack.c.bf16 %v849_v48, %v833_v47  ;;  %v994_v47 = vld [vmem:[#allocation8 + $0x1428] sm:$0xff] }
 0x1e3   :  { %4326 = vmatpush1.bf16.msra.mxu0 %v4325_v6  ;;  %v739_v6 = vld [vmem:[#allocation8 + $0xc30] sm:$0xff]  ;;  %v1010_v48 = vld [vmem:[#allocation8 + $0x14a8] sm:$0xff] }
 0x1e4   :  { %4454 = vmatpush1.bf16.msra.mxu1 %v4453_v7  ;;  %4328 = vmatprep.subr.bf16.mxu0 %v4327_v8  ;;  %v4471_v7 = vpack.c.bf16 %v756_v62, %v740_v60  ;;  %v755_v8 = vld [vmem:[#allocation8 + $0xcb0] sm:$0xff]  ;;  %v865_v60 = vld [vmem:[#allocation8 + $0x1020] sm:$0xff]  ;;  %v4375_v53 = vpack.c.bf16 %v1010_v48, %v994_v47 }
 0x1e5   :  { %4456 = vmatprep.subr.bf16.mxu1 %v4455_v12  ;;  %v788_v12 = vld [vmem:[#allocation8 + $0xdb8] sm:$0xff]  ;;  %v4473_v13 = vpack.c.bf16 %v755_v8, %v739_v6  ;;  %v881_v62 = vld [vmem:[#allocation8 + $0x10a0] sm:$0xff] }
 0x1e6   :  { %v4361_v6 = vpack.c.bf16 %v881_v62, %v865_v60  ;;  %v916_v8 = vld [vmem:[#allocation8 + $0x11b8] sm:$0xff]  ;;  %v1026_v60 = vld [vmem:[#allocation8 + $0x1528] sm:$0xff] }
 0x1e7   :  { %4330 = vmatpush1.bf16.msra.mxu0 %v4329_v17  ;;  %v771_v17 = vld [vmem:[#allocation8 + $0xd30] sm:$0xff]  ;;  %v1042_v62 = vld [vmem:[#allocation8 + $0x15a8] sm:$0xff] }
 0x1e8   :  { %4458 = vmatpush1.bf16.msra.mxu1 %v4457_v18  ;;  %4332 = vmatprep.subr.bf16.mxu0 %v4331_v19  ;;  %v4475_v18 = vpack.c.bf16 %v788_v12, %v772_v11  ;;  %v787_v19 = vld [vmem:[#allocation8 + $0xdb0] sm:$0xff]  ;;  %v913_v11 = vld [vmem:[#allocation8 + $0x11a0] sm:$0xff] }
 0x1e9   :  { %4460 = vmatprep.subr.bf16.mxu1 %v4459_v23  ;;  %v820_v23 = vld [vmem:[#allocation8 + $0xeb8] sm:$0xff]  ;;  %v4477_v43 = vpack.c.bf16 %v787_v19, %v771_v17  ;;  %v899_v12 = vld [vmem:[#allocation8 + $0x1130] sm:$0xff]  ;;  %v4365_v19 = vpack.c.bf16 %v913_v11, %v897_v10  ;;  %v1058_v11 = vld [vmem:[#allocation8 + $0x1628] sm:$0xff] }
 0x1ea   :  { %v932_v17 = vld [vmem:[#allocation8 + $0x1238] sm:$0xff]  ;;  %v1043_v10 = vld [vmem:[#allocation8 + $0x15b0] sm:$0xff] }
 0x1eb   :  { %4334 = vmatpush1.bf16.msra.mxu0 %v4333_v34  ;;  %v803_v34 = vld [vmem:[#allocation8 + $0xe30] sm:$0xff] }
 0x1ec   :  { %4462 = vmatpush1.bf16.msra.mxu1 %v4461_v35  ;;  %4336 = vmatprep.subr.bf16.mxu0 %v4335_v36  ;;  %v4479_v35 = vpack.c.bf16 %v820_v23, %v804_v22  ;;  %v819_v36 = vld [vmem:[#allocation8 + $0xeb0] sm:$0xff]  ;;  %v929_v22 = vld [vmem:[#allocation8 + $0x1220] sm:$0xff] }
 0x1ed   :  { %4464 = vmatprep.subr.bf16.mxu1 %v4463_v41  ;;  %v852_v41 = vld [vmem:[#allocation8 + $0xfb8] sm:$0xff]  ;;  %v4481_v44 = vpack.c.bf16 %v819_v36, %v803_v34  ;;  %v945_v23 = vld [vmem:[#allocation8 + $0x12a0] sm:$0xff] }
 0x1ee   :  { %v964_v34 = vld [vmem:[#allocation8 + $0x1338] sm:$0xff]  ;;  %v4369_v36 = vpack.c.bf16 %v945_v23, %v929_v22  ;;  %v1090_v22 = vld [vmem:[#allocation8 + $0x1728] sm:$0xff] }
 0x1ef   :  { %4338 = vmatpush1.bf16.msra.mxu0 %v4337_v49  ;;  %v835_v49 = vld [vmem:[#allocation8 + $0xf30] sm:$0xff]  ;;  %v1106_v23 = vld [vmem:[#allocation8 + $0x17a8] sm:$0xff] }
 0x1f0   :  { %4466 = vmatpush1.bf16.msra.mxu1 %v4465_v50  ;;  %4340 = vmatprep.subr.bf16.mxu0 %v4339_v51  ;;  %v4483_v50 = vpack.c.bf16 %v852_v41, %v836_v40  ;;  %v851_v51 = vld [vmem:[#allocation8 + $0xfb0] sm:$0xff]  ;;  %v961_v40 = vld [vmem:[#allocation8 + $0x1320] sm:$0xff]  ;;  %v4387_v33 = vpack.c.bf16 %v1106_v23, %v1090_v22 }
 0x1f1   :  { %4468 = vmatprep.subr.bf16.mxu1 %v4467_v56  ;;  %v884_v56 = vld [vmem:[#allocation8 + $0x10b8] sm:$0xff]  ;;  %v4485_v58 = vpack.c.bf16 %v851_v51, %v835_v49  ;;  %v977_v41 = vld [vmem:[#allocation8 + $0x13a0] sm:$0xff] }
 0x1f2   :  { %v996_v49 = vld [vmem:[#allocation8 + $0x1438] sm:$0xff]  ;;  %v4373_v51 = vpack.c.bf16 %v977_v41, %v961_v40  ;;  %v1122_v40 = vld [vmem:[#allocation8 + $0x1828] sm:$0xff] }
 0x1f3   :  { %4342 = vmatpush1.bf16.msra.mxu0 %v4341_v63  ;;  %v4487_v63 = vpack.c.bf16 %v884_v56, %v868_v54  ;;  %v993_v54 = vld [vmem:[#allocation8 + $0x1420] sm:$0xff]  ;;  %v1138_v41 = vld [vmem:[#allocation8 + $0x18a8] sm:$0xff] }
 0x1f4   :  { %4470 = vmatpush1.bf16.msra.mxu1 %v4469_v1  ;;  %4344 = vmatprep.subr.bf16.mxu0 %v4343_v3  ;;  %v867_v1 = vld [vmem:[#allocation8 + $0x1030] sm:$0xff]  ;;  %v1009_v56 = vld [vmem:[#allocation8 + $0x14a0] sm:$0xff]  ;;  %v4391_v48 = vpack.c.bf16 %v1138_v41, %v1122_v40 }
 0x1f5   :  { %4472 = vmatprep.subr.bf16.mxu1 %v4471_v7  ;;  %v883_v3 = vld [vmem:[#allocation8 + $0x10b0] sm:$0xff]  ;;  %v900_v7 = vld [vmem:[#allocation8 + $0x1138] sm:$0xff] }
 0x1f6   :  { %v4489_v9 = vpack.c.bf16 %v883_v3, %v867_v1  ;;  %v4491_v16 = vpack.c.bf16 %v916_v8, %v900_v7  ;;  %v1044_v1 = vld [vmem:[#allocation8 + $0x15b8] sm:$0xff]  ;;  %v4377_v3 = vpack.c.bf16 %v1009_v56, %v993_v54  ;;  %v1041_v7 = vld [vmem:[#allocation8 + $0x15a0] sm:$0xff]  ;;  %v1027_v8 = vld [vmem:[#allocation8 + $0x1530] sm:$0xff] }
 0x1f7   :  { %4346 = vmatpush1.bf16.msra.mxu0 %v4345_v27  ;;  %v4363_v27 = vpack.c.bf16 %v914_v5, %v898_v4  ;;  %v4379_v5 = vpack.c.bf16 %v1042_v62, %v1026_v60  ;;  %v1154_v54 = vld [vmem:[#allocation8 + $0x1928] sm:$0xff] }
 0x1f8   :  { %4474 = vmatpush1.bf16.msra.mxu1 %v4473_v13  ;;  %4348 = vmatprep.subr.bf16.mxu0 %v4347_v14  ;;  %v915_v13 = vld [vmem:[#allocation8 + $0x11b0] sm:$0xff]  ;;  %v930_v14 = vld [vmem:[#allocation8 + $0x1228] sm:$0xff] }
 0x1f9   :  { %4476 = vmatprep.subr.bf16.mxu1 %v4475_v18  ;;  %v948_v18 = vld [vmem:[#allocation8 + $0x12b8] sm:$0xff]  ;;  %v4493_v20 = vpack.c.bf16 %v915_v13, %v899_v12  ;;  %v4367_v21 = vpack.c.bf16 %v946_v15, %v930_v14  ;;  %v1074_v12 = vld [vmem:[#allocation8 + $0x16a8] sm:$0xff]  ;;  %v4509_v15 = vpack.c.bf16 %v1043_v10, %v1027_v8 }
 0x1fa   :  { %v1076_v13 = vld [vmem:[#allocation8 + $0x16b8] sm:$0xff]  ;;  %v1170_v56 = vld [vmem:[#allocation8 + $0x19a8] sm:$0xff] }
 0x1fb   :  { %4350 = vmatpush1.bf16.msra.mxu0 %v4349_v30  ;;  %v931_v30 = vld [vmem:[#allocation8 + $0x1230] sm:$0xff]  ;;  %v4395_v62 = vpack.c.bf16 %v1170_v56, %v1154_v54  ;;  %v1188_v8 = vld [vmem:[#allocation8 + $0x1a38] sm:$0xff] }
 0x1fc   :  { %4478 = vmatpush1.bf16.msra.mxu1 %v4477_v43  ;;  %4352 = vmatprep.subr.bf16.mxu0 %v4351_v31  ;;  %v4495_v43 = vpack.c.bf16 %v948_v18, %v932_v17  ;;  %v947_v31 = vld [vmem:[#allocation8 + $0x12b0] sm:$0xff]  ;;  %v1057_v17 = vld [vmem:[#allocation8 + $0x1620] sm:$0xff] }
 0x1fd   :  { %4480 = vmatprep.subr.bf16.mxu1 %v4479_v35  ;;  %v980_v35 = vld [vmem:[#allocation8 + $0x13b8] sm:$0xff]  ;;  %v4497_v38 = vpack.c.bf16 %v947_v31, %v931_v30  ;;  %v1073_v18 = vld [vmem:[#allocation8 + $0x16a0] sm:$0xff] }
 0x1fe   :  { %v1092_v30 = vld [vmem:[#allocation8 + $0x1738] sm:$0xff]  ;;  %v4385_v31 = vpack.c.bf16 %v1073_v18, %v1057_v17  ;;  %v1218_v17 = vld [vmem:[#allocation8 + $0x1b28] sm:$0xff] }
 0x1ff   :  { %4354 = vmatpush1.bf16.msra.mxu0 %v4353_v42  ;;  %v963_v42 = vld [vmem:[#allocation8 + $0x1330] sm:$0xff]  ;;  %v1234_v18 = vld [vmem:[#allocation8 + $0x1ba8] sm:$0xff] }
 0x200   :  { %4482 = vmatpush1.bf16.msra.mxu1 %v4481_v44  ;;  %4356 = vmatprep.subr.bf16.mxu0 %v4355_v46  ;;  %v4499_v44 = vpack.c.bf16 %v980_v35, %v964_v34  ;;  %v979_v46 = vld [vmem:[#allocation8 + $0x13b0] sm:$0xff]  ;;  %v1089_v34 = vld [vmem:[#allocation8 + $0x1720] sm:$0xff]  ;;  %v4403_v23 = vpack.c.bf16 %v1234_v18, %v1218_v17 }
 0x201   :  { %4484 = vmatprep.subr.bf16.mxu1 %v4483_v50  ;;  %v1012_v50 = vld [vmem:[#allocation8 + $0x14b8] sm:$0xff]  ;;  %v4501_v52 = vpack.c.bf16 %v979_v46, %v963_v42  ;;  %v1105_v35 = vld [vmem:[#allocation8 + $0x17a0] sm:$0xff] }
 0x202   :  { %v1124_v42 = vld [vmem:[#allocation8 + $0x1838] sm:$0xff]  ;;  %v4389_v46 = vpack.c.bf16 %v1105_v35, %v1089_v34  ;;  %v1250_v34 = vld [vmem:[#allocation8 + $0x1c28] sm:$0xff] }
 0x203   :  { %4358 = vmatpush1.bf16.msra.mxu0 %v4357_v57  ;;  %v995_v57 = vld [vmem:[#allocation8 + $0x1430] sm:$0xff]  ;;  %v1266_v35 = vld [vmem:[#allocation8 + $0x1ca8] sm:$0xff] }
 0x204   :  { %4486 = vmatpush1.bf16.msra.mxu1 %v4485_v58  ;;  %4360 = vmatprep.subr.bf16.mxu0 %v4359_v59  ;;  %v4503_v58 = vpack.c.bf16 %v1012_v50, %v996_v49  ;;  %v1011_v59 = vld [vmem:[#allocation8 + $0x14b0] sm:$0xff]  ;;  %v1121_v49 = vld [vmem:[#allocation8 + $0x1820] sm:$0xff]  ;;  %v4407_v41 = vpack.c.bf16 %v1266_v35, %v1250_v34 }
 0x205   :  { %4488 = vmatprep.subr.bf16.mxu1 %v4487_v63  ;;  %v1028_v63 = vld [vmem:[#allocation8 + $0x1538] sm:$0xff]  ;;  %v4505_v4 = vpack.c.bf16 %v1011_v59, %v995_v57  ;;  %v1137_v50 = vld [vmem:[#allocation8 + $0x18a0] sm:$0xff] }
 0x206   :  { %1806 = vmatmul.mubr.f32.vlgmr.msra.gmra.mrb[4].mxu0 %v5830_v61  ;;  %v1156_v57 = vld [vmem:[#allocation8 + $0x1938] sm:$0xff]  ;;  %v4393_v59 = vpack.c.bf16 %v1137_v50, %v1121_v49  ;;  %v1282_v49 = vld [vmem:[#allocation8 + $0x1d28] sm:$0xff] }
 0x207   :  { %1948 = vmatmul.mubr.f32.vlgmr.msra.gmra.mrb[4].mxu1 %v5830_v61  ;;  %4362 = vmatpush1.bf16.msra.mxu0 %v4361_v6  ;;  %v1025_v6 = vld [vmem:[#allocation8 + $0x1520] sm:$0xff]  ;;  %v1298_v50 = vld [vmem:[#allocation8 + $0x1da8] sm:$0xff] }
 0x208   :  { %1876 = vmatprep.mubr.f32.mxu0 %v5836_v2  ;;  %4490 = vmatpush1.bf16.msra.mxu1 %v4489_v9  ;;  %v4507_v9 = vpack.c.bf16 %v1044_v1, %v1028_v63  ;;  %v4381_v14 = vpack.c.bf16 %v1041_v7, %v1025_v6  ;;  %v1153_v63 = vld [vmem:[#allocation8 + $0x1920] sm:$0xff]  ;;  %v1186_v6 = vld [vmem:[#allocation8 + $0x1a28] sm:$0xff]  ;;  %v4411_v56 = vpack.c.bf16 %v1298_v50, %v1282_v49 }
 0x209   :  { %2018 = vmatprep.mubr.f32.mxu1 %v5836_v2  ;;  %4364 = vmatprep.subr.bf16.mxu0 %v4363_v27  ;;  %v1060_v27 = vld [vmem:[#allocation8 + $0x1638] sm:$0xff]  ;;  %v1169_v1 = vld [vmem:[#allocation8 + $0x19a0] sm:$0xff]  ;;  %v1202_v7 = vld [vmem:[#allocation8 + $0x1aa8] sm:$0xff] }
 0x20a   :  { %4492 = vmatprep.subr.bf16.mxu1 %v4491_v16  ;;  %v4383_v16 = vpack.c.bf16 %v1074_v12, %v1058_v11  ;;  %v4397_v10 = vpack.c.bf16 %v1169_v1, %v1153_v63  ;;  %v4399_v12 = vpack.c.bf16 %v1202_v7, %v1186_v6  ;;  %v1314_v63 = vld [vmem:[#allocation8 + $0x1e28] sm:$0xff]  ;;  %v389_v50 = vld [vmem:[#allocation8 + $0x140] sm:$0xff] }
 0x20b   :  { %4366 = vmatpush1.bf16.msra.mxu0 %v4365_v19  ;;  %v1059_v19 = vld [vmem:[#allocation8 + $0x1630] sm:$0xff]  ;;  %v1330_v1 = vld [vmem:[#allocation8 + $0x1ea8] sm:$0xff] }
 0x20c   :  { %4494 = vmatpush1.bf16.msra.mxu1 %v4493_v20  ;;  %4368 = vmatprep.subr.bf16.mxu0 %v4367_v21  ;;  %v4511_v20 = vpack.c.bf16 %v1076_v13, %v1060_v27  ;;  %v1075_v21 = vld [vmem:[#allocation8 + $0x16b0] sm:$0xff]  ;;  %v1185_v27 = vld [vmem:[#allocation8 + $0x1a20] sm:$0xff]  ;;  %v4415_v7 = vpack.c.bf16 %v1330_v1, %v1314_v63 }
 0x20d   :  { %4496 = vmatprep.subr.bf16.mxu1 %v4495_v43  ;;  %v1108_v43 = vld [vmem:[#allocation8 + $0x17b8] sm:$0xff]  ;;  %v4513_v32 = vpack.c.bf16 %v1075_v21, %v1059_v19  ;;  %v1201_v13 = vld [vmem:[#allocation8 + $0x1aa0] sm:$0xff] }
 0x20e   :  { %v1220_v19 = vld [vmem:[#allocation8 + $0x1b38] sm:$0xff]  ;;  %v4401_v21 = vpack.c.bf16 %v1201_v13, %v1185_v27  ;;  %v1346_v27 = vld [vmem:[#allocation8 + $0x1f28] sm:$0xff] }
 0x20f   :  { %4370 = vmatpush1.bf16.msra.mxu0 %v4369_v36  ;;  %v1091_v36 = vld [vmem:[#allocation8 + $0x1730] sm:$0xff]  ;;  %v1362_v13 = vld [vmem:[#allocation8 + $0x1fa8] sm:$0xff] }
 0x210   :  { %4498 = vmatpush1.bf16.msra.mxu1 %v4497_v38  ;;  %4372 = vmatprep.subr.bf16.mxu0 %v4371_v39  ;;  %v4515_v38 = vpack.c.bf16 %v1108_v43, %v1092_v30  ;;  %v1107_v39 = vld [vmem:[#allocation8 + $0x17b0] sm:$0xff]  ;;  %v1217_v30 = vld [vmem:[#allocation8 + $0x1b20] sm:$0xff]  ;;  %v4419_v18 = vpack.c.bf16 %v1362_v13, %v1346_v27 }
 0x211   :  { %4500 = vmatprep.subr.bf16.mxu1 %v4499_v44  ;;  %v1140_v44 = vld [vmem:[#allocation8 + $0x18b8] sm:$0xff]  ;;  %v4517_v47 = vpack.c.bf16 %v1107_v39, %v1091_v36  ;;  %v1233_v43 = vld [vmem:[#allocation8 + $0x1ba0] sm:$0xff] }
 0x212   :  { %v1252_v36 = vld [vmem:[#allocation8 + $0x1c38] sm:$0xff]  ;;  %v4405_v39 = vpack.c.bf16 %v1233_v43, %v1217_v30  ;;  %v358_v30 = vld [vmem:[#allocation8 + $0x48] sm:$0xff] }
 0x213   :  { %4374 = vmatpush1.bf16.msra.mxu0 %v4373_v51  ;;  %v1123_v51 = vld [vmem:[#allocation8 + $0x1830] sm:$0xff]  ;;  %v374_v43 = vld [vmem:[#allocation8 + $0xc8] sm:$0xff] }
 0x214   :  { %4502 = vmatpush1.bf16.msra.mxu1 %v4501_v52  ;;  %4376 = vmatprep.subr.bf16.mxu0 %v4375_v53  ;;  %v4519_v52 = vpack.c.bf16 %v1140_v44, %v1124_v42  ;;  %v1139_v53 = vld [vmem:[#allocation8 + $0x18b0] sm:$0xff]  ;;  %v1249_v42 = vld [vmem:[#allocation8 + $0x1c20] sm:$0xff]  ;;  %v4551_v35 = vpack.c.bf16 %v374_v43, %v358_v30 }
 0x215   :  { %4504 = vmatprep.subr.bf16.mxu1 %v4503_v58  ;;  %v1172_v58 = vld [vmem:[#allocation8 + $0x19b8] sm:$0xff]  ;;  %v4521_v60 = vpack.c.bf16 %v1139_v53, %v1123_v51  ;;  %v1265_v44 = vld [vmem:[#allocation8 + $0x1ca0] sm:$0xff] }
 0x216   :  { %v1284_v51 = vld [vmem:[#allocation8 + $0x1d38] sm:$0xff]  ;;  %v4409_v53 = vpack.c.bf16 %v1265_v44, %v1249_v42  ;;  %v390_v42 = vld [vmem:[#allocation8 + $0x148] sm:$0xff] }
 0x217   :  { %4378 = vmatpush1.bf16.msra.mxu0 %v4377_v3  ;;  %v1155_v3 = vld [vmem:[#allocation8 + $0x1930] sm:$0xff]  ;;  %v406_v44 = vld [vmem:[#allocation8 + $0x1c8] sm:$0xff] }
 0x218   :  { %4506 = vmatpush1.bf16.msra.mxu1 %v4505_v4  ;;  %4380 = vmatprep.subr.bf16.mxu0 %v4379_v5  ;;  %v4523_v4 = vpack.c.bf16 %v1172_v58, %v1156_v57  ;;  %v1171_v5 = vld [vmem:[#allocation8 + $0x19b0] sm:$0xff]  ;;  %v1281_v57 = vld [vmem:[#allocation8 + $0x1d20] sm:$0xff] }
 0x219   :  { %4508 = vmatprep.subr.bf16.mxu1 %v4507_v9  ;;  %v1204_v9 = vld [vmem:[#allocation8 + $0x1ab8] sm:$0xff]  ;;  %v4525_v11 = vpack.c.bf16 %v1171_v5, %v1155_v3  ;;  %v1297_v58 = vld [vmem:[#allocation8 + $0x1da0] sm:$0xff] }
 0x21a   :  { %v1316_v3 = vld [vmem:[#allocation8 + $0x1e38] sm:$0xff]  ;;  %v4413_v5 = vpack.c.bf16 %v1297_v58, %v1281_v57  ;;  %v438_v57 = vld [vmem:[#allocation8 + $0x2c8] sm:$0xff] }
 0x21b   :  { %4382 = vmatpush1.bf16.msra.mxu0 %v4381_v14  ;;  %v1187_v14 = vld [vmem:[#allocation8 + $0x1a30] sm:$0xff] }
 0x21c   :  { %4510 = vmatpush1.bf16.msra.mxu1 %v4509_v15  ;;  %4384 = vmatprep.subr.bf16.mxu0 %v4383_v16  ;;  %v4527_v15 = vpack.c.bf16 %v1204_v9, %v1188_v8  ;;  %v1203_v16 = vld [vmem:[#allocation8 + $0x1ab0] sm:$0xff]  ;;  %v1313_v8 = vld [vmem:[#allocation8 + $0x1e20] sm:$0xff] }
 0x21d   :  { %4512 = vmatprep.subr.bf16.mxu1 %v4511_v20  ;;  %v1236_v20 = vld [vmem:[#allocation8 + $0x1bb8] sm:$0xff]  ;;  %v4529_v22 = vpack.c.bf16 %v1203_v16, %v1187_v14  ;;  %v1329_v9 = vld [vmem:[#allocation8 + $0x1ea0] sm:$0xff] }
 0x21e   :  { %v1348_v14 = vld [vmem:[#allocation8 + $0x1f38] sm:$0xff]  ;;  %v4417_v16 = vpack.c.bf16 %v1329_v9, %v1313_v8  ;;  %v454_v8 = vld [vmem:[#allocation8 + $0x348] sm:$0xff] }
 0x21f   :  { %4386 = vmatpush1.bf16.msra.mxu0 %v4385_v31  ;;  %v1219_v31 = vld [vmem:[#allocation8 + $0x1b30] sm:$0xff]  ;;  %v470_v9 = vld [vmem:[#allocation8 + $0x3c8] sm:$0xff] }
 0x220   :  { %4514 = vmatpush1.bf16.msra.mxu1 %v4513_v32  ;;  %4388 = vmatprep.subr.bf16.mxu0 %v4387_v33  ;;  %v4531_v32 = vpack.c.bf16 %v1236_v20, %v1220_v19  ;;  %v1235_v33 = vld [vmem:[#allocation8 + $0x1bb0] sm:$0xff]  ;;  %v1345_v19 = vld [vmem:[#allocation8 + $0x1f20] sm:$0xff]  ;;  %v4563_v13 = vpack.c.bf16 %v470_v9, %v454_v8 }
 0x221   :  { %4516 = vmatprep.subr.bf16.mxu1 %v4515_v38  ;;  %v1268_v38 = vld [vmem:[#allocation8 + $0x1cb8] sm:$0xff]  ;;  %v4533_v40 = vpack.c.bf16 %v1235_v33, %v1219_v31  ;;  %v1361_v20 = vld [vmem:[#allocation8 + $0x1fa0] sm:$0xff] }
 0x222   :  { %v360_v31 = vld [vmem:[#allocation8 + $0x58] sm:$0xff]  ;;  %v4421_v33 = vpack.c.bf16 %v1361_v20, %v1345_v19  ;;  %v486_v19 = vld [vmem:[#allocation8 + $0x448] sm:$0xff] }
 0x223   :  { %4390 = vmatpush1.bf16.msra.mxu0 %v4389_v46  ;;  %v1251_v46 = vld [vmem:[#allocation8 + $0x1c30] sm:$0xff]  ;;  %v502_v20 = vld [vmem:[#allocation8 + $0x4c8] sm:$0xff] }
 0x224   :  { %4518 = vmatpush1.bf16.msra.mxu1 %v4517_v47  ;;  %4392 = vmatprep.subr.bf16.mxu0 %v4391_v48  ;;  %v4535_v47 = vpack.c.bf16 %v1268_v38, %v1252_v36  ;;  %v1267_v48 = vld [vmem:[#allocation8 + $0x1cb0] sm:$0xff]  ;;  %v357_v36 = vld [vmem:[#allocation8 + $0x40] sm:$0xff]  ;;  %v4567_v43 = vpack.c.bf16 %v502_v20, %v486_v19 }
 0x225   :  { %4520 = vmatprep.subr.bf16.mxu1 %v4519_v52  ;;  %v1300_v52 = vld [vmem:[#allocation8 + $0x1db8] sm:$0xff]  ;;  %v4537_v54 = vpack.c.bf16 %v1267_v48, %v1251_v46  ;;  %v373_v38 = vld [vmem:[#allocation8 + $0xc0] sm:$0xff] }
 0x226   :  { %v4553_v46 = vpack.c.bf16 %v373_v38, %v357_v36  ;;  %v408_v48 = vld [vmem:[#allocation8 + $0x1d8] sm:$0xff]  ;;  %v518_v36 = vld [vmem:[#allocation8 + $0x548] sm:$0xff] }
 0x227   :  { %4394 = vmatpush1.bf16.msra.mxu0 %v4393_v59  ;;  %v1283_v59 = vld [vmem:[#allocation8 + $0x1d30] sm:$0xff]  ;;  %v534_v38 = vld [vmem:[#allocation8 + $0x5c8] sm:$0xff] }
 0x228   :  { %4522 = vmatpush1.bf16.msra.mxu1 %v4521_v60  ;;  %4396 = vmatprep.subr.bf16.mxu0 %v4395_v62  ;;  %v4539_v60 = vpack.c.bf16 %v1300_v52, %v1284_v51  ;;  %v1299_v62 = vld [vmem:[#allocation8 + $0x1db0] sm:$0xff]  ;;  %v405_v51 = vld [vmem:[#allocation8 + $0x1c0] sm:$0xff] }
 0x229   :  { %4524 = vmatprep.subr.bf16.mxu1 %v4523_v4  ;;  %v1332_v4 = vld [vmem:[#allocation8 + $0x1eb8] sm:$0xff]  ;;  %v4541_v6 = vpack.c.bf16 %v1299_v62, %v1283_v59  ;;  %v391_v52 = vld [vmem:[#allocation8 + $0x150] sm:$0xff]  ;;  %v4557_v62 = vpack.c.bf16 %v405_v51, %v389_v50  ;;  %v550_v51 = vld [vmem:[#allocation8 + $0x648] sm:$0xff] }
 0x22a   :  { %v424_v59 = vld [vmem:[#allocation8 + $0x258] sm:$0xff]  ;;  %v535_v50 = vld [vmem:[#allocation8 + $0x5d0] sm:$0xff] }
 0x22b   :  { %4398 = vmatpush1.bf16.msra.mxu0 %v4397_v10  ;;  %v1315_v10 = vld [vmem:[#allocation8 + $0x1e30] sm:$0xff] }
 0x22c   :  { %4526 = vmatpush1.bf16.msra.mxu1 %v4525_v11  ;;  %4400 = vmatprep.subr.bf16.mxu0 %v4399_v12  ;;  %v4543_v11 = vpack.c.bf16 %v1332_v4, %v1316_v3  ;;  %v1331_v12 = vld [vmem:[#allocation8 + $0x1eb0] sm:$0xff]  ;;  %v421_v3 = vld [vmem:[#allocation8 + $0x240] sm:$0xff] }
 0x22d   :  { %4528 = vmatprep.subr.bf16.mxu1 %v4527_v15  ;;  %v1364_v15 = vld [vmem:[#allocation8 + $0x1fb8] sm:$0xff]  ;;  %v4545_v17 = vpack.c.bf16 %v1331_v12, %v1315_v10  ;;  %v437_v4 = vld [vmem:[#allocation8 + $0x2c0] sm:$0xff] }
 0x22e   :  { %v456_v10 = vld [vmem:[#allocation8 + $0x358] sm:$0xff]  ;;  %v4561_v12 = vpack.c.bf16 %v437_v4, %v421_v3  ;;  %v582_v3 = vld [vmem:[#allocation8 + $0x748] sm:$0xff] }
 0x22f   :  { %4402 = vmatpush1.bf16.msra.mxu0 %v4401_v21  ;;  %v1347_v21 = vld [vmem:[#allocation8 + $0x1f30] sm:$0xff]  ;;  %v598_v4 = vld [vmem:[#allocation8 + $0x7c8] sm:$0xff] }
 0x230   :  { %4530 = vmatpush1.bf16.msra.mxu1 %v4529_v22  ;;  %4404 = vmatprep.subr.bf16.mxu0 %v4403_v23  ;;  %v4547_v22 = vpack.c.bf16 %v1364_v15, %v1348_v14  ;;  %v1363_v23 = vld [vmem:[#allocation8 + $0x1fb0] sm:$0xff]  ;;  %v453_v14 = vld [vmem:[#allocation8 + $0x340] sm:$0xff]  ;;  %v4579_v9 = vpack.c.bf16 %v598_v4, %v582_v3 }
 0x231   :  { %4532 = vmatprep.subr.bf16.mxu1 %v4531_v32  ;;  %v376_v32 = vld [vmem:[#allocation8 + $0xd8] sm:$0xff]  ;;  %v4549_v34 = vpack.c.bf16 %v1363_v23, %v1347_v21  ;;  %v469_v15 = vld [vmem:[#allocation8 + $0x3c0] sm:$0xff] }
 0x232   :  { %v488_v21 = vld [vmem:[#allocation8 + $0x458] sm:$0xff]  ;;  %v4565_v23 = vpack.c.bf16 %v469_v15, %v453_v14  ;;  %v614_v14 = vld [vmem:[#allocation8 + $0x848] sm:$0xff] }
 0x233   :  { %4406 = vmatpush1.bf16.msra.mxu0 %v4405_v39  ;;  %v4679_v39 = vpack.c.bf16 %v376_v32, %v360_v31  ;;  %v485_v31 = vld [vmem:[#allocation8 + $0x440] sm:$0xff]  ;;  %v630_v15 = vld [vmem:[#allocation8 + $0x8c8] sm:$0xff] }
 0x234   :  { %4534 = vmatpush1.bf16.msra.mxu1 %v4533_v40  ;;  %4408 = vmatprep.subr.bf16.mxu0 %v4407_v41  ;;  %v359_v40 = vld [vmem:[#allocation8 + $0x50] sm:$0xff]  ;;  %v501_v32 = vld [vmem:[#allocation8 + $0x4c0] sm:$0xff]  ;;  %v4583_v20 = vpack.c.bf16 %v630_v15, %v614_v14 }
 0x235   :  { %4536 = vmatprep.subr.bf16.mxu1 %v4535_v47  ;;  %v375_v41 = vld [vmem:[#allocation8 + $0xd0] sm:$0xff]  ;;  %v392_v47 = vld [vmem:[#allocation8 + $0x158] sm:$0xff] }
 0x236   :  { %v4681_v49 = vpack.c.bf16 %v375_v41, %v359_v40  ;;  %v4683_v58 = vpack.c.bf16 %v408_v48, %v392_v47  ;;  %v536_v40 = vld [vmem:[#allocation8 + $0x5d8] sm:$0xff]  ;;  %v4569_v41 = vpack.c.bf16 %v501_v32, %v485_v31  ;;  %v533_v47 = vld [vmem:[#allocation8 + $0x5c0] sm:$0xff]  ;;  %v519_v48 = vld [vmem:[#allocation8 + $0x550] sm:$0xff] }
 0x237   :  { %4410 = vmatpush1.bf16.msra.mxu0 %v4409_v53  ;;  %v4555_v53 = vpack.c.bf16 %v406_v44, %v390_v42  ;;  %v4571_v44 = vpack.c.bf16 %v534_v38, %v518_v36  ;;  %v646_v31 = vld [vmem:[#allocation8 + $0x948] sm:$0xff] }
 0x238   :  { %4538 = vmatpush1.bf16.msra.mxu1 %v4537_v54  ;;  %4412 = vmatprep.subr.bf16.mxu0 %v4411_v56  ;;  %v407_v54 = vld [vmem:[#allocation8 + $0x1d0] sm:$0xff]  ;;  %v422_v56 = vld [vmem:[#allocation8 + $0x248] sm:$0xff] }
 0x239   :  { %4540 = vmatprep.subr.bf16.mxu1 %v4539_v60  ;;  %v440_v60 = vld [vmem:[#allocation8 + $0x2d8] sm:$0xff]  ;;  %v4685_v63 = vpack.c.bf16 %v407_v54, %v391_v52  ;;  %v4559_v1 = vpack.c.bf16 %v438_v57, %v422_v56  ;;  %v566_v52 = vld [vmem:[#allocation8 + $0x6c8] sm:$0xff]  ;;  %v4701_v57 = vpack.c.bf16 %v535_v50, %v519_v48 }
 0x23a   :  { %v568_v54 = vld [vmem:[#allocation8 + $0x6d8] sm:$0xff]  ;;  %v662_v32 = vld [vmem:[#allocation8 + $0x9c8] sm:$0xff] }
 0x23b   :  { %4414 = vmatpush1.bf16.msra.mxu0 %v4413_v5  ;;  %v423_v5 = vld [vmem:[#allocation8 + $0x250] sm:$0xff]  ;;  %v4587_v38 = vpack.c.bf16 %v662_v32, %v646_v31  ;;  %v680_v48 = vld [vmem:[#allocation8 + $0xa58] sm:$0xff] }
 0x23c   :  { %4542 = vmatpush1.bf16.msra.mxu1 %v4541_v6  ;;  %4416 = vmatprep.subr.bf16.mxu0 %v4415_v7  ;;  %v4687_v6 = vpack.c.bf16 %v440_v60, %v424_v59  ;;  %v439_v7 = vld [vmem:[#allocation8 + $0x2d0] sm:$0xff]  ;;  %v549_v59 = vld [vmem:[#allocation8 + $0x640] sm:$0xff] }
 0x23d   :  { %4544 = vmatprep.subr.bf16.mxu1 %v4543_v11  ;;  %v472_v11 = vld [vmem:[#allocation8 + $0x3d8] sm:$0xff]  ;;  %v4689_v27 = vpack.c.bf16 %v439_v7, %v423_v5  ;;  %v565_v60 = vld [vmem:[#allocation8 + $0x6c0] sm:$0xff] }
 0x23e   :  { %v584_v5 = vld [vmem:[#allocation8 + $0x758] sm:$0xff]  ;;  %v4577_v7 = vpack.c.bf16 %v565_v60, %v549_v59  ;;  %v710_v59 = vld [vmem:[#allocation8 + $0xb48] sm:$0xff] }
 0x23f   :  { %4418 = vmatpush1.bf16.msra.mxu0 %v4417_v16  ;;  %v455_v16 = vld [vmem:[#allocation8 + $0x350] sm:$0xff]  ;;  %v726_v60 = vld [vmem:[#allocation8 + $0xbc8] sm:$0xff] }
 0x240   :  { %4546 = vmatpush1.bf16.msra.mxu1 %v4545_v17  ;;  %4420 = vmatprep.subr.bf16.mxu0 %v4419_v18  ;;  %v4691_v17 = vpack.c.bf16 %v472_v11, %v456_v10  ;;  %v471_v18 = vld [vmem:[#allocation8 + $0x3d0] sm:$0xff]  ;;  %v581_v10 = vld [vmem:[#allocation8 + $0x740] sm:$0xff]  ;;  %v4595_v4 = vpack.c.bf16 %v726_v60, %v710_v59 }
 0x241   :  { %4548 = vmatprep.subr.bf16.mxu1 %v4547_v22  ;;  %v504_v22 = vld [vmem:[#allocation8 + $0x4d8] sm:$0xff]  ;;  %v4693_v30 = vpack.c.bf16 %v471_v18, %v455_v16  ;;  %v597_v11 = vld [vmem:[#allocation8 + $0x7c0] sm:$0xff] }
 0x242   :  { %v616_v16 = vld [vmem:[#allocation8 + $0x858] sm:$0xff]  ;;  %v4581_v18 = vpack.c.bf16 %v597_v11, %v581_v10  ;;  %v742_v10 = vld [vmem:[#allocation8 + $0xc48] sm:$0xff] }
 0x243   :  { %4422 = vmatpush1.bf16.msra.mxu0 %v4421_v33  ;;  %v487_v33 = vld [vmem:[#allocation8 + $0x450] sm:$0xff]  ;;  %v758_v11 = vld [vmem:[#allocation8 + $0xcc8] sm:$0xff] }
 0x244   :  { %4550 = vmatpush1.bf16.msra.mxu1 %v4549_v34  ;;  %4552 = vmatprep.subr.bf16.mxu0 %v4551_v35  ;;  %v4695_v34 = vpack.c.bf16 %v504_v22, %v488_v21  ;;  %v503_v35 = vld [vmem:[#allocation8 + $0x4d0] sm:$0xff]  ;;  %v613_v21 = vld [vmem:[#allocation8 + $0x840] sm:$0xff]  ;;  %v4599_v15 = vpack.c.bf16 %v758_v11, %v742_v10 }
 0x245   :  { %4680 = vmatprep.subr.bf16.mxu1 %v4679_v39  ;;  %v520_v39 = vld [vmem:[#allocation8 + $0x558] sm:$0xff]  ;;  %v4697_v42 = vpack.c.bf16 %v503_v35, %v487_v33  ;;  %v629_v22 = vld [vmem:[#allocation8 + $0x8c0] sm:$0xff] }
 0x246   :  { %1877 = vmatmul.mubr.f32.vlgmr.msra.gmra.mrb[4].mxu0 %v5846_v37  ;;  %v648_v33 = vld [vmem:[#allocation8 + $0x958] sm:$0xff]  ;;  %v4585_v35 = vpack.c.bf16 %v629_v22, %v613_v21  ;;  %v774_v21 = vld [vmem:[#allocation8 + $0xd48] sm:$0xff] }
 0x247   :  { %2019 = vmatmul.mubr.f32.vlgmr.msra.gmra.mrb[4].mxu1 %v5846_v37  ;;  %4554 = vmatpush1.bf16.msra.mxu0 %v4553_v46  ;;  %v517_v46 = vld [vmem:[#allocation8 + $0x540] sm:$0xff]  ;;  %v790_v22 = vld [vmem:[#allocation8 + $0xdc8] sm:$0xff] }
 0x248   :  { %2089 = vmatprep.mubr.f32.mxu0 %v5827_v55  ;;  %4682 = vmatpush1.bf16.msra.mxu1 %v4681_v49  ;;  %v4699_v49 = vpack.c.bf16 %v536_v40, %v520_v39  ;;  %v4573_v56 = vpack.c.bf16 %v533_v47, %v517_v46  ;;  %v645_v39 = vld [vmem:[#allocation8 + $0x940] sm:$0xff]  ;;  %v678_v46 = vld [vmem:[#allocation8 + $0xa48] sm:$0xff]  ;;  %v4603_v32 = vpack.c.bf16 %v790_v22, %v774_v21 }
 0x249   :  { %2231 = vmatprep.mubr.f32.mxu1 %v5827_v55  ;;  %4556 = vmatprep.subr.bf16.mxu0 %v4555_v53  ;;  %v552_v53 = vld [vmem:[#allocation8 + $0x658] sm:$0xff]  ;;  %v661_v40 = vld [vmem:[#allocation8 + $0x9c0] sm:$0xff]  ;;  %v694_v47 = vld [vmem:[#allocation8 + $0xac8] sm:$0xff] }
 0x24a   :  { %4684 = vmatprep.subr.bf16.mxu1 %v4683_v58  ;;  %v4575_v58 = vpack.c.bf16 %v566_v52, %v550_v51  ;;  %v4589_v50 = vpack.c.bf16 %v661_v40, %v645_v39  ;;  %v4591_v52 = vpack.c.bf16 %v694_v47, %v678_v46  ;;  %v806_v39 = vld [vmem:[#allocation8 + $0xe48] sm:$0xff]  ;;  %v901_v22 = vld [vmem:[#allocation8 + $0x1140] sm:$0xff] }
 0x24b   :  { %4558 = vmatpush1.bf16.msra.mxu0 %v4557_v62  ;;  %v551_v62 = vld [vmem:[#allocation8 + $0x650] sm:$0xff]  ;;  %v822_v40 = vld [vmem:[#allocation8 + $0xec8] sm:$0xff] }
 0x24c   :  { %4686 = vmatpush1.bf16.msra.mxu1 %v4685_v63  ;;  %4560 = vmatprep.subr.bf16.mxu0 %v4559_v1  ;;  %v4703_v63 = vpack.c.bf16 %v568_v54, %v552_v53  ;;  %v567_v1 = vld [vmem:[#allocation8 + $0x6d0] sm:$0xff]  ;;  %v677_v53 = vld [vmem:[#allocation8 + $0xa40] sm:$0xff]  ;;  %v4607_v47 = vpack.c.bf16 %v822_v40, %v806_v39 }
 0x24d   :  { %4688 = vmatprep.subr.bf16.mxu1 %v4687_v6  ;;  %v600_v6 = vld [vmem:[#allocation8 + $0x7d8] sm:$0xff]  ;;  %v4705_v8 = vpack.c.bf16 %v567_v1, %v551_v62  ;;  %v693_v54 = vld [vmem:[#allocation8 + $0xac0] sm:$0xff] }
 0x24e   :  { %v712_v62 = vld [vmem:[#allocation8 + $0xb58] sm:$0xff]  ;;  %v4593_v1 = vpack.c.bf16 %v693_v54, %v677_v53  ;;  %v838_v53 = vld [vmem:[#allocation8 + $0xf48] sm:$0xff] }
 0x24f   :  { %4562 = vmatpush1.bf16.msra.mxu0 %v4561_v12  ;;  %v583_v12 = vld [vmem:[#allocation8 + $0x750] sm:$0xff]  ;;  %v854_v54 = vld [vmem:[#allocation8 + $0xfc8] sm:$0xff] }
 0x250   :  { %4690 = vmatpush1.bf16.msra.mxu1 %v4689_v27  ;;  %4564 = vmatprep.subr.bf16.mxu0 %v4563_v13  ;;  %v4707_v27 = vpack.c.bf16 %v600_v6, %v584_v5  ;;  %v599_v13 = vld [vmem:[#allocation8 + $0x7d0] sm:$0xff]  ;;  %v709_v5 = vld [vmem:[#allocation8 + $0xb40] sm:$0xff]  ;;  %v4611_v60 = vpack.c.bf16 %v854_v54, %v838_v53 }
 0x251   :  { %4692 = vmatprep.subr.bf16.mxu1 %v4691_v17  ;;  %v632_v17 = vld [vmem:[#allocation8 + $0x8d8] sm:$0xff]  ;;  %v4709_v19 = vpack.c.bf16 %v599_v13, %v583_v12  ;;  %v725_v6 = vld [vmem:[#allocation8 + $0xbc0] sm:$0xff] }
 0x252   :  { %v744_v12 = vld [vmem:[#allocation8 + $0xc58] sm:$0xff]  ;;  %v4597_v13 = vpack.c.bf16 %v725_v6, %v709_v5  ;;  %v870_v5 = vld [vmem:[#allocation8 + $0x1048] sm:$0xff] }
 0x253   :  { %4566 = vmatpush1.bf16.msra.mxu0 %v4565_v23  ;;  %v615_v23 = vld [vmem:[#allocation8 + $0x850] sm:$0xff]  ;;  %v886_v6 = vld [vmem:[#allocation8 + $0x10c8] sm:$0xff] }
 0x254   :  { %4694 = vmatpush1.bf16.msra.mxu1 %v4693_v30  ;;  %4568 = vmatprep.subr.bf16.mxu0 %v4567_v43  ;;  %v4711_v30 = vpack.c.bf16 %v632_v17, %v616_v16  ;;  %v631_v43 = vld [vmem:[#allocation8 + $0x8d0] sm:$0xff]  ;;  %v741_v16 = vld [vmem:[#allocation8 + $0xc40] sm:$0xff]  ;;  %v4615_v11 = vpack.c.bf16 %v886_v6, %v870_v5 }
 0x255   :  { %4696 = vmatprep.subr.bf16.mxu1 %v4695_v34  ;;  %v664_v34 = vld [vmem:[#allocation8 + $0x9d8] sm:$0xff]  ;;  %v4713_v36 = vpack.c.bf16 %v631_v43, %v615_v23  ;;  %v757_v17 = vld [vmem:[#allocation8 + $0xcc0] sm:$0xff] }
 0x256   :  { %v776_v23 = vld [vmem:[#allocation8 + $0xd58] sm:$0xff]  ;;  %v4601_v43 = vpack.c.bf16 %v757_v17, %v741_v16  ;;  %v902_v16 = vld [vmem:[#allocation8 + $0x1148] sm:$0xff] }
 0x257   :  { %4570 = vmatpush1.bf16.msra.mxu0 %v4569_v41  ;;  %v647_v41 = vld [vmem:[#allocation8 + $0x950] sm:$0xff]  ;;  %v918_v17 = vld [vmem:[#allocation8 + $0x11c8] sm:$0xff] }
 0x258   :  { %4698 = vmatpush1.bf16.msra.mxu1 %v4697_v42  ;;  %4572 = vmatprep.subr.bf16.mxu0 %v4571_v44  ;;  %v4715_v42 = vpack.c.bf16 %v664_v34, %v648_v33  ;;  %v663_v44 = vld [vmem:[#allocation8 + $0x9d0] sm:$0xff]  ;;  %v773_v33 = vld [vmem:[#allocation8 + $0xd40] sm:$0xff] }
 0x259   :  { %4700 = vmatprep.subr.bf16.mxu1 %v4699_v49  ;;  %v696_v49 = vld [vmem:[#allocation8 + $0xad8] sm:$0xff]  ;;  %v4717_v51 = vpack.c.bf16 %v663_v44, %v647_v41  ;;  %v789_v34 = vld [vmem:[#allocation8 + $0xdc0] sm:$0xff] }
 0x25a   :  { %v808_v41 = vld [vmem:[#allocation8 + $0xe58] sm:$0xff]  ;;  %v4605_v44 = vpack.c.bf16 %v789_v34, %v773_v33  ;;  %v950_v33 = vld [vmem:[#allocation8 + $0x12c8] sm:$0xff] }
 0x25b   :  { %4574 = vmatpush1.bf16.msra.mxu0 %v4573_v56  ;;  %v679_v56 = vld [vmem:[#allocation8 + $0xa50] sm:$0xff] }
 0x25c   :  { %4702 = vmatpush1.bf16.msra.mxu1 %v4701_v57  ;;  %4576 = vmatprep.subr.bf16.mxu0 %v4575_v58  ;;  %v4719_v57 = vpack.c.bf16 %v696_v49, %v680_v48  ;;  %v695_v58 = vld [vmem:[#allocation8 + $0xad0] sm:$0xff]  ;;  %v805_v48 = vld [vmem:[#allocation8 + $0xe40] sm:$0xff] }
 0x25d   :  { %4704 = vmatprep.subr.bf16.mxu1 %v4703_v63  ;;  %v728_v63 = vld [vmem:[#allocation8 + $0xbd8] sm:$0xff]  ;;  %v4721_v3 = vpack.c.bf16 %v695_v58, %v679_v56  ;;  %v821_v49 = vld [vmem:[#allocation8 + $0xec0] sm:$0xff] }
 0x25e   :  { %v840_v56 = vld [vmem:[#allocation8 + $0xf58] sm:$0xff]  ;;  %v4609_v58 = vpack.c.bf16 %v821_v49, %v805_v48  ;;  %v966_v48 = vld [vmem:[#allocation8 + $0x1348] sm:$0xff] }
 0x25f   :  { %4578 = vmatpush1.bf16.msra.mxu0 %v4577_v7  ;;  %v711_v7 = vld [vmem:[#allocation8 + $0xb50] sm:$0xff]  ;;  %v982_v49 = vld [vmem:[#allocation8 + $0x13c8] sm:$0xff] }
 0x260   :  { %4706 = vmatpush1.bf16.msra.mxu1 %v4705_v8  ;;  %4580 = vmatprep.subr.bf16.mxu0 %v4579_v9  ;;  %v4723_v8 = vpack.c.bf16 %v728_v63, %v712_v62  ;;  %v727_v9 = vld [vmem:[#allocation8 + $0xbd0] sm:$0xff]  ;;  %v837_v62 = vld [vmem:[#allocation8 + $0xf40] sm:$0xff]  ;;  %v4627_v54 = vpack.c.bf16 %v982_v49, %v966_v48  ;;  %v1096_v49 = vld [vmem:[#allocation8 + $0x1758] sm:$0xff] }
 0x261   :  { %4708 = vmatprep.subr.bf16.mxu1 %v4707_v27  ;;  %v760_v27 = vld [vmem:[#allocation8 + $0xcd8] sm:$0xff]  ;;  %v4725_v14 = vpack.c.bf16 %v727_v9, %v711_v7  ;;  %v853_v63 = vld [vmem:[#allocation8 + $0xfc0] sm:$0xff] }
 0x262   :  { %v872_v7 = vld [vmem:[#allocation8 + $0x1058] sm:$0xff]  ;;  %v4613_v9 = vpack.c.bf16 %v853_v63, %v837_v62  ;;  %v998_v62 = vld [vmem:[#allocation8 + $0x1448] sm:$0xff] }
 0x263   :  { %4582 = vmatpush1.bf16.msra.mxu0 %v4581_v18  ;;  %v743_v18 = vld [vmem:[#allocation8 + $0xc50] sm:$0xff]  ;;  %v1014_v63 = vld [vmem:[#allocation8 + $0x14c8] sm:$0xff] }
 0x264   :  { %4710 = vmatpush1.bf16.msra.mxu1 %v4709_v19  ;;  %4584 = vmatprep.subr.bf16.mxu0 %v4583_v20  ;;  %v4727_v19 = vpack.c.bf16 %v760_v27, %v744_v12  ;;  %v759_v20 = vld [vmem:[#allocation8 + $0xcd0] sm:$0xff]  ;;  %v869_v12 = vld [vmem:[#allocation8 + $0x1040] sm:$0xff]  ;;  %v4631_v6 = vpack.c.bf16 %v1014_v63, %v998_v62  ;;  %v1142_v62 = vld [vmem:[#allocation8 + $0x18c8] sm:$0xff] }
 0x265   :  { %4712 = vmatprep.subr.bf16.mxu1 %v4711_v30  ;;  %v792_v30 = vld [vmem:[#allocation8 + $0xdd8] sm:$0xff]  ;;  %v4729_v31 = vpack.c.bf16 %v759_v20, %v743_v18  ;;  %v885_v27 = vld [vmem:[#allocation8 + $0x10c0] sm:$0xff] }
 0x266   :  { %v4617_v18 = vpack.c.bf16 %v885_v27, %v869_v12  ;;  %v920_v20 = vld [vmem:[#allocation8 + $0x11d8] sm:$0xff]  ;;  %v1030_v12 = vld [vmem:[#allocation8 + $0x1548] sm:$0xff] }
 0x267   :  { %4586 = vmatpush1.bf16.msra.mxu0 %v4585_v35  ;;  %v775_v35 = vld [vmem:[#allocation8 + $0xd50] sm:$0xff]  ;;  %v1046_v27 = vld [vmem:[#allocation8 + $0x15c8] sm:$0xff]  ;;  %v1128_v63 = vld [vmem:[#allocation8 + $0x1858] sm:$0xff] }
 0x268   :  { %4714 = vmatpush1.bf16.msra.mxu1 %v4713_v36  ;;  %4588 = vmatprep.subr.bf16.mxu0 %v4587_v38  ;;  %v4731_v36 = vpack.c.bf16 %v792_v30, %v776_v23  ;;  %v791_v38 = vld [vmem:[#allocation8 + $0xdd0] sm:$0xff]  ;;  %v917_v23 = vld [vmem:[#allocation8 + $0x11c0] sm:$0xff] }
 0x269   :  { %4716 = vmatprep.subr.bf16.mxu1 %v4715_v42  ;;  %v824_v42 = vld [vmem:[#allocation8 + $0xed8] sm:$0xff]  ;;  %v4733_v46 = vpack.c.bf16 %v791_v38, %v775_v35  ;;  %v903_v30 = vld [vmem:[#allocation8 + $0x1150] sm:$0xff]  ;;  %v4621_v38 = vpack.c.bf16 %v917_v23, %v901_v22  ;;  %v1062_v23 = vld [vmem:[#allocation8 + $0x1648] sm:$0xff] }
 0x26a   :  { %v936_v35 = vld [vmem:[#allocation8 + $0x1258] sm:$0xff]  ;;  %v1047_v22 = vld [vmem:[#allocation8 + $0x15d0] sm:$0xff] }
 0x26b   :  { %4590 = vmatpush1.bf16.msra.mxu0 %v4589_v50  ;;  %v807_v50 = vld [vmem:[#allocation8 + $0xe50] sm:$0xff] }
 0x26c   :  { %4718 = vmatpush1.bf16.msra.mxu1 %v4717_v51  ;;  %4592 = vmatprep.subr.bf16.mxu0 %v4591_v52  ;;  %v4735_v51 = vpack.c.bf16 %v824_v42, %v808_v41  ;;  %v823_v52 = vld [vmem:[#allocation8 + $0xed0] sm:$0xff]  ;;  %v933_v41 = vld [vmem:[#allocation8 + $0x1240] sm:$0xff] }
 0x26d   :  { %4720 = vmatprep.subr.bf16.mxu1 %v4719_v57  ;;  %v856_v57 = vld [vmem:[#allocation8 + $0xfd8] sm:$0xff]  ;;  %v4737_v59 = vpack.c.bf16 %v823_v52, %v807_v50  ;;  %v949_v42 = vld [vmem:[#allocation8 + $0x12c0] sm:$0xff] }
 0x26e   :  { %v968_v50 = vld [vmem:[#allocation8 + $0x1358] sm:$0xff]  ;;  %v4625_v52 = vpack.c.bf16 %v949_v42, %v933_v41  ;;  %v1079_v42 = vld [vmem:[#allocation8 + $0x16d0] sm:$0xff] }
 0x26f   :  { %4594 = vmatpush1.bf16.msra.mxu0 %v4593_v1  ;;  %v839_v1 = vld [vmem:[#allocation8 + $0xf50] sm:$0xff] }
 0x270   :  { %4722 = vmatpush1.bf16.msra.mxu1 %v4721_v3  ;;  %4596 = vmatprep.subr.bf16.mxu0 %v4595_v4  ;;  %v4739_v3 = vpack.c.bf16 %v856_v57, %v840_v56  ;;  %v855_v4 = vld [vmem:[#allocation8 + $0xfd0] sm:$0xff]  ;;  %v965_v56 = vld [vmem:[#allocation8 + $0x1340] sm:$0xff] }
 0x271   :  { %4724 = vmatprep.subr.bf16.mxu1 %v4723_v8  ;;  %v888_v8 = vld [vmem:[#allocation8 + $0x10d8] sm:$0xff]  ;;  %v4741_v10 = vpack.c.bf16 %v855_v4, %v839_v1  ;;  %v981_v57 = vld [vmem:[#allocation8 + $0x13c0] sm:$0xff] }
 0x272   :  { %v1000_v1 = vld [vmem:[#allocation8 + $0x1458] sm:$0xff]  ;;  %v4629_v4 = vpack.c.bf16 %v981_v57, %v965_v56  ;;  %v1109_v56 = vld [vmem:[#allocation8 + $0x17c0] sm:$0xff]  ;;  %v1095_v57 = vld [vmem:[#allocation8 + $0x1750] sm:$0xff] }
 0x273   :  { %4598 = vmatpush1.bf16.msra.mxu0 %v4597_v13  ;;  %v4743_v13 = vpack.c.bf16 %v888_v8, %v872_v7  ;;  %v997_v7 = vld [vmem:[#allocation8 + $0x1440] sm:$0xff] }
 0x274   :  { %4726 = vmatpush1.bf16.msra.mxu1 %v4725_v14  ;;  %4600 = vmatprep.subr.bf16.mxu0 %v4599_v15  ;;  %v871_v14 = vld [vmem:[#allocation8 + $0x1050] sm:$0xff]  ;;  %v1013_v8 = vld [vmem:[#allocation8 + $0x14c0] sm:$0xff] }
 0x275   :  { %4728 = vmatprep.subr.bf16.mxu1 %v4727_v19  ;;  %v887_v15 = vld [vmem:[#allocation8 + $0x10d0] sm:$0xff]  ;;  %v904_v19 = vld [vmem:[#allocation8 + $0x1158] sm:$0xff] }
 0x276   :  { %v4745_v21 = vpack.c.bf16 %v887_v15, %v871_v14  ;;  %v4747_v34 = vpack.c.bf16 %v920_v20, %v904_v19  ;;  %v1048_v14 = vld [vmem:[#allocation8 + $0x15d8] sm:$0xff]  ;;  %v4633_v15 = vpack.c.bf16 %v1013_v8, %v997_v7  ;;  %v1045_v19 = vld [vmem:[#allocation8 + $0x15c0] sm:$0xff]  ;;  %v1031_v20 = vld [vmem:[#allocation8 + $0x1550] sm:$0xff] }
 0x277   :  { %4602 = vmatpush1.bf16.msra.mxu0 %v4601_v43  ;;  %v4619_v43 = vpack.c.bf16 %v918_v17, %v902_v16  ;;  %v4635_v17 = vpack.c.bf16 %v1046_v27, %v1030_v12  ;;  %v1141_v7 = vld [vmem:[#allocation8 + $0x18c0] sm:$0xff]  ;;  %v1127_v8 = vld [vmem:[#allocation8 + $0x1850] sm:$0xff]  ;;  %v1174_v12 = vld [vmem:[#allocation8 + $0x19c8] sm:$0xff] }
 0x278   :  { %4730 = vmatpush1.bf16.msra.mxu1 %v4729_v31  ;;  %4604 = vmatprep.subr.bf16.mxu0 %v4603_v32  ;;  %v919_v31 = vld [vmem:[#allocation8 + $0x11d0] sm:$0xff]  ;;  %v934_v32 = vld [vmem:[#allocation8 + $0x1248] sm:$0xff]  ;;  %v1160_v27 = vld [vmem:[#allocation8 + $0x1958] sm:$0xff] }
 0x279   :  { %4732 = vmatprep.subr.bf16.mxu1 %v4731_v36  ;;  %v952_v36 = vld [vmem:[#allocation8 + $0x12d8] sm:$0xff]  ;;  %v4749_v39 = vpack.c.bf16 %v919_v31, %v903_v30  ;;  %v4623_v40 = vpack.c.bf16 %v950_v33, %v934_v32  ;;  %v1078_v30 = vld [vmem:[#allocation8 + $0x16c8] sm:$0xff]  ;;  %v4765_v33 = vpack.c.bf16 %v1047_v22, %v1031_v20 }
 0x27a   :  { %v1080_v31 = vld [vmem:[#allocation8 + $0x16d8] sm:$0xff]  ;;  %v1190_v22 = vld [vmem:[#allocation8 + $0x1a48] sm:$0xff] }
 0x27b   :  { %4606 = vmatpush1.bf16.msra.mxu0 %v4605_v44  ;;  %v935_v44 = vld [vmem:[#allocation8 + $0x1250] sm:$0xff] }
 0x27c   :  { %4734 = vmatpush1.bf16.msra.mxu1 %v4733_v46  ;;  %4608 = vmatprep.subr.bf16.mxu0 %v4607_v47  ;;  %v4751_v46 = vpack.c.bf16 %v952_v36, %v936_v35  ;;  %v951_v47 = vld [vmem:[#allocation8 + $0x12d0] sm:$0xff]  ;;  %v1061_v35 = vld [vmem:[#allocation8 + $0x1640] sm:$0xff] }
 0x27d   :  { %4736 = vmatprep.subr.bf16.mxu1 %v4735_v51  ;;  %v984_v51 = vld [vmem:[#allocation8 + $0x13d8] sm:$0xff]  ;;  %v4753_v53 = vpack.c.bf16 %v951_v47, %v935_v44  ;;  %v1077_v36 = vld [vmem:[#allocation8 + $0x16c0] sm:$0xff]  ;;  %v1094_v44 = vld [vmem:[#allocation8 + $0x1748] sm:$0xff] }
 0x27f   :  { %4610 = vmatpush1.bf16.msra.mxu0 %v4609_v58  ;;  %v967_v58 = vld [vmem:[#allocation8 + $0x1350] sm:$0xff] }
 0x280   :  { %4738 = vmatpush1.bf16.msra.mxu1 %v4737_v59  ;;  %4612 = vmatprep.subr.bf16.mxu0 %v4611_v60  ;;  %v4755_v59 = vpack.c.bf16 %v984_v51, %v968_v50  ;;  %v983_v60 = vld [vmem:[#allocation8 + $0x13d0] sm:$0xff]  ;;  %v1112_v50 = vld [vmem:[#allocation8 + $0x17d8] sm:$0xff]  ;;  %v4641_v51 = vpack.c.bf16 %v1077_v36, %v1061_v35  ;;  %v1205_v35 = vld [vmem:[#allocation8 + $0x1ac0] sm:$0xff] }
 0x281   :  { %4740 = vmatprep.subr.bf16.mxu1 %v4739_v3  ;;  %v1016_v3 = vld [vmem:[#allocation8 + $0x14d8] sm:$0xff]  ;;  %v4757_v5 = vpack.c.bf16 %v983_v60, %v967_v58  ;;  %v4771_v58 = vpack.c.bf16 %v1112_v50, %v1096_v49  ;;  %v1126_v60 = vld [vmem:[#allocation8 + $0x1848] sm:$0xff]  ;;  %v1191_v36 = vld [vmem:[#allocation8 + $0x1a50] sm:$0xff] }
 0x282   :  { %v1240_v49 = vld [vmem:[#allocation8 + $0x1bd8] sm:$0xff] }
 0x283   :  { %4614 = vmatpush1.bf16.msra.mxu0 %v4613_v9  ;;  %v999_v9 = vld [vmem:[#allocation8 + $0x1450] sm:$0xff] }
 0x284   :  { %4742 = vmatpush1.bf16.msra.mxu1 %v4741_v10  ;;  %4616 = vmatprep.subr.bf16.mxu0 %v4615_v11  ;;  %v4759_v10 = vpack.c.bf16 %v1016_v3, %v1000_v1  ;;  %v1015_v11 = vld [vmem:[#allocation8 + $0x14d0] sm:$0xff]  ;;  %v1144_v1 = vld [vmem:[#allocation8 + $0x18d8] sm:$0xff] }
 0x285   :  { %4744 = vmatprep.subr.bf16.mxu1 %v4743_v13  ;;  %v1032_v13 = vld [vmem:[#allocation8 + $0x1558] sm:$0xff]  ;;  %v4761_v16 = vpack.c.bf16 %v1015_v11, %v999_v9  ;;  %v4775_v9 = vpack.c.bf16 %v1144_v1, %v1128_v63  ;;  %v1158_v11 = vld [vmem:[#allocation8 + $0x1948] sm:$0xff] }
 0x286   :  { %2090 = vmatmul.mubr.f32.vlgmr.msra.gmra.mrb[6].mxu0 %v5830_v61  ;;  %v1272_v63 = vld [vmem:[#allocation8 + $0x1cd8] sm:$0xff] }
 0x287   :  { %2232 = vmatmul.mubr.f32.vlgmr.msra.gmra.mrb[6].mxu1 %v5830_v61  ;;  %4618 = vmatpush1.bf16.msra.mxu0 %v4617_v18  ;;  %v1029_v18 = vld [vmem:[#allocation8 + $0x1540] sm:$0xff] }
 0x288   :  { %2160 = vmatprep.mubr.f32.mxu0 %v5836_v2  ;;  %4746 = vmatpush1.bf16.msra.mxu1 %v4745_v21  ;;  %v4763_v21 = vpack.c.bf16 %v1048_v14, %v1032_v13  ;;  %v4637_v32 = vpack.c.bf16 %v1045_v19, %v1029_v18  ;;  %v1176_v13 = vld [vmem:[#allocation8 + $0x19d8] sm:$0xff]  ;;  %v1173_v18 = vld [vmem:[#allocation8 + $0x19c0] sm:$0xff]  ;;  %v1159_v19 = vld [vmem:[#allocation8 + $0x1950] sm:$0xff] }
 0x289   :  { %2302 = vmatprep.mubr.f32.mxu1 %v5836_v2  ;;  %4620 = vmatprep.subr.bf16.mxu0 %v4619_v43  ;;  %v1064_v43 = vld [vmem:[#allocation8 + $0x1658] sm:$0xff]  ;;  %v4779_v20 = vpack.c.bf16 %v1176_v13, %v1160_v27 }
 0x28a   :  { %4748 = vmatprep.subr.bf16.mxu1 %v4747_v34  ;;  %v4639_v34 = vpack.c.bf16 %v1078_v30, %v1062_v23  ;;  %v4767_v41 = vpack.c.bf16 %v1080_v31, %v1064_v43  ;;  %v1206_v23 = vld [vmem:[#allocation8 + $0x1ac8] sm:$0xff]  ;;  %v1192_v30 = vld [vmem:[#allocation8 + $0x1a58] sm:$0xff] }
 0x28b   :  { %4622 = vmatpush1.bf16.msra.mxu0 %v4621_v38  ;;  %v1063_v38 = vld [vmem:[#allocation8 + $0x1650] sm:$0xff]  ;;  %v1208_v43 = vld [vmem:[#allocation8 + $0x1ad8] sm:$0xff] }
 0x28c   :  { %4750 = vmatpush1.bf16.msra.mxu1 %v4749_v39  ;;  %4624 = vmatprep.subr.bf16.mxu0 %v4623_v40  ;;  %v1304_v27 = vld [vmem:[#allocation8 + $0x1dd8] sm:$0xff] }
 0x28d   :  { %4752 = vmatprep.subr.bf16.mxu1 %v4751_v46  ;;  %v1110_v46 = vld [vmem:[#allocation8 + $0x17c8] sm:$0xff] }
 0x28f   :  { %4626 = vmatpush1.bf16.msra.mxu0 %v4625_v52  ;;  %v4769_v52 = vpack.c.bf16 %v1079_v42, %v1063_v38  ;;  %v4783_v38 = vpack.c.bf16 %v1208_v43, %v1192_v30  ;;  %v1222_v42 = vld [vmem:[#allocation8 + $0x1b48] sm:$0xff]  ;;  %v1336_v30 = vld [vmem:[#allocation8 + $0x1ed8] sm:$0xff] }
 0x290   :  { %4754 = vmatpush1.bf16.msra.mxu1 %v4753_v53  ;;  %4628 = vmatprep.subr.bf16.mxu0 %v4627_v54  ;;  %v4643_v53 = vpack.c.bf16 %v1110_v46, %v1094_v44  ;;  %v1093_v54 = vld [vmem:[#allocation8 + $0x1740] sm:$0xff]  ;;  %v1238_v44 = vld [vmem:[#allocation8 + $0x1bc8] sm:$0xff]  ;;  %v1224_v46 = vld [vmem:[#allocation8 + $0x1b58] sm:$0xff] }
 0x291   :  { %4756 = vmatprep.subr.bf16.mxu1 %v4755_v59  ;;  %v1111_v59 = vld [vmem:[#allocation8 + $0x17d0] sm:$0xff]  ;;  %v4645_v3 = vpack.c.bf16 %v1109_v56, %v1093_v54  ;;  %v1237_v54 = vld [vmem:[#allocation8 + $0x1bc0] sm:$0xff] }
 0x292   :  { %v1223_v56 = vld [vmem:[#allocation8 + $0x1b50] sm:$0xff] }
 0x293   :  { %4630 = vmatpush1.bf16.msra.mxu0 %v4629_v4  ;;  %v4773_v4 = vpack.c.bf16 %v1111_v59, %v1095_v57  ;;  %v4787_v57 = vpack.c.bf16 %v1240_v49, %v1224_v46  ;;  %v1254_v59 = vld [vmem:[#allocation8 + $0x1c48] sm:$0xff]  ;;  %v1368_v46 = vld [vmem:[#allocation8 + $0x1fd8] sm:$0xff] }
 0x294   :  { %4758 = vmatpush1.bf16.msra.mxu1 %v4757_v5  ;;  %4632 = vmatprep.subr.bf16.mxu0 %v4631_v6  ;;  %v4647_v5 = vpack.c.bf16 %v1142_v62, %v1126_v60  ;;  %v1125_v6 = vld [vmem:[#allocation8 + $0x1840] sm:$0xff]  ;;  %v1270_v60 = vld [vmem:[#allocation8 + $0x1cc8] sm:$0xff]  ;;  %v1256_v62 = vld [vmem:[#allocation8 + $0x1c58] sm:$0xff] }
 0x295   :  { %4760 = vmatprep.subr.bf16.mxu1 %v4759_v10  ;;  %v1143_v10 = vld [vmem:[#allocation8 + $0x18d0] sm:$0xff]  ;;  %v4649_v14 = vpack.c.bf16 %v1141_v7, %v1125_v6  ;;  %v1269_v6 = vld [vmem:[#allocation8 + $0x1cc0] sm:$0xff] }
 0x296   :  { %v1255_v7 = vld [vmem:[#allocation8 + $0x1c50] sm:$0xff] }
 0x297   :  { %4634 = vmatpush1.bf16.msra.mxu0 %v4633_v15  ;;  %v4777_v15 = vpack.c.bf16 %v1143_v10, %v1127_v8  ;;  %v4791_v8 = vpack.c.bf16 %v1272_v63, %v1256_v62  ;;  %v1286_v10 = vld [vmem:[#allocation8 + $0x1d48] sm:$0xff]  ;;  %v380_v62 = vld [vmem:[#allocation8 + $0xf8] sm:$0xff] }
 0x298   :  { %4762 = vmatpush1.bf16.msra.mxu1 %v4761_v16  ;;  %4636 = vmatprep.subr.bf16.mxu0 %v4635_v17  ;;  %v4651_v16 = vpack.c.bf16 %v1174_v12, %v1158_v11  ;;  %v1157_v17 = vld [vmem:[#allocation8 + $0x1940] sm:$0xff]  ;;  %v1302_v11 = vld [vmem:[#allocation8 + $0x1dc8] sm:$0xff]  ;;  %v1288_v12 = vld [vmem:[#allocation8 + $0x1d58] sm:$0xff] }
 0x299   :  { %v5864_v39 = vpop.f32.mrb[2].mxu0  ;;  %v5866_v40 = vpop.f32.mrb[2].mxu1  ;;  %4764 = vmatprep.subr.bf16.mxu1 %v4763_v21  ;;  %v1175_v21 = vld [vmem:[#allocation8 + $0x19d0] sm:$0xff]  ;;  %v4653_v31 = vpack.c.bf16 %v1173_v18, %v1157_v17  ;;  %v1301_v17 = vld [vmem:[#allocation8 + $0x1dc0] sm:$0xff] }
 0x29a   :  { %v5868_v47 = vpop.f32.mrb[3].mxu0  ;;  %v5870_v48 = vpop.f32.mrb[3].mxu1  ;;  %v1287_v18 = vld [vmem:[#allocation8 + $0x1d50] sm:$0xff] }
 0x29b   :  { %4638 = vmatpush1.bf16.msra.mxu0 %v4637_v32  ;;  %v4781_v32 = vpack.c.bf16 %v1175_v21, %v1159_v19  ;;  %v4795_v19 = vpack.c.bf16 %v1304_v27, %v1288_v12  ;;  %v1318_v21 = vld [vmem:[#allocation8 + $0x1e48] sm:$0xff]  ;;  %v396_v12 = vld [vmem:[#allocation8 + $0x178] sm:$0xff] }
 0x29c   :  { %4766 = vmatpush1.bf16.msra.mxu1 %v4765_v33  ;;  %4640 = vmatprep.subr.bf16.mxu0 %v4639_v34  ;;  %v4655_v33 = vpack.c.bf16 %v1206_v23, %v1190_v22  ;;  %v1189_v34 = vld [vmem:[#allocation8 + $0x1a40] sm:$0xff]  ;;  %v1334_v22 = vld [vmem:[#allocation8 + $0x1ec8] sm:$0xff]  ;;  %v1320_v23 = vld [vmem:[#allocation8 + $0x1e58] sm:$0xff] }
 0x29d   :  { %4768 = vmatprep.subr.bf16.mxu1 %v4767_v41  ;;  %v1207_v41 = vld [vmem:[#allocation8 + $0x1ad0] sm:$0xff]  ;;  %v4657_v50 = vpack.c.bf16 %v1205_v35, %v1189_v34  ;;  %v1333_v34 = vld [vmem:[#allocation8 + $0x1ec0] sm:$0xff]  ;;  %v412_v27 = vld [vmem:[#allocation8 + $0x1f8] sm:$0xff] }
 0x29e   :  { %v1319_v35 = vld [vmem:[#allocation8 + $0x1e50] sm:$0xff] }
 0x29f   :  { %4642 = vmatpush1.bf16.msra.mxu0 %v4641_v51  ;;  %v4785_v51 = vpack.c.bf16 %v1207_v41, %v1191_v36  ;;  %v4799_v36 = vpack.c.bf16 %v1336_v30, %v1320_v23  ;;  %v1350_v41 = vld [vmem:[#allocation8 + $0x1f48] sm:$0xff]  ;;  %v444_v23 = vld [vmem:[#allocation8 + $0x2f8] sm:$0xff] }
 0x2a0   :  { %4770 = vmatpush1.bf16.msra.mxu1 %v4769_v52  ;;  %4644 = vmatprep.subr.bf16.mxu0 %v4643_v53  ;;  %v4659_v52 = vpack.c.bf16 %v1238_v44, %v1222_v42  ;;  %v1221_v53 = vld [vmem:[#allocation8 + $0x1b40] sm:$0xff]  ;;  %v1366_v42 = vld [vmem:[#allocation8 + $0x1fc8] sm:$0xff]  ;;  %v1352_v44 = vld [vmem:[#allocation8 + $0x1f58] sm:$0xff] }
 0x2a1   :  { %4772 = vmatprep.subr.bf16.mxu1 %v4771_v58  ;;  %v1239_v58 = vld [vmem:[#allocation8 + $0x1bd0] sm:$0xff]  ;;  %v4661_v1 = vpack.c.bf16 %v1237_v54, %v1221_v53  ;;  %v1365_v53 = vld [vmem:[#allocation8 + $0x1fc0] sm:$0xff] }
 0x2a2   :  { %v1351_v54 = vld [vmem:[#allocation8 + $0x1f50] sm:$0xff] }
 0x2a3   :  { %4646 = vmatpush1.bf16.msra.mxu0 %v4645_v3  ;;  %v4789_v3 = vpack.c.bf16 %v1239_v58, %v1223_v56  ;;  %v4803_v56 = vpack.c.bf16 %v1368_v46, %v1352_v44  ;;  %v362_v58 = vld [vmem:[#allocation8 + $0x68] sm:$0xff]  ;;  %v476_v44 = vld [vmem:[#allocation8 + $0x3f8] sm:$0xff] }
 0x2a4   :  { %4774 = vmatpush1.bf16.msra.mxu1 %v4773_v4  ;;  %4648 = vmatprep.subr.bf16.mxu0 %v4647_v5  ;;  %v4663_v4 = vpack.c.bf16 %v1270_v60, %v1254_v59  ;;  %v1253_v5 = vld [vmem:[#allocation8 + $0x1c40] sm:$0xff]  ;;  %v378_v59 = vld [vmem:[#allocation8 + $0xe8] sm:$0xff]  ;;  %v364_v60 = vld [vmem:[#allocation8 + $0x78] sm:$0xff] }
 0x2a5   :  { %4776 = vmatprep.subr.bf16.mxu1 %v4775_v9  ;;  %v1271_v9 = vld [vmem:[#allocation8 + $0x1cd0] sm:$0xff]  ;;  %v4665_v13 = vpack.c.bf16 %v1269_v6, %v1253_v5  ;;  %v377_v5 = vld [vmem:[#allocation8 + $0xe0] sm:$0xff]  ;;  %v4935_v6 = vpack.c.bf16 %v380_v62, %v364_v60 }
 0x2a7   :  { %4650 = vmatpush1.bf16.msra.mxu0 %v4649_v14  ;;  %v4793_v14 = vpack.c.bf16 %v1271_v9, %v1255_v7  ;;  %v363_v7 = vld [vmem:[#allocation8 + $0x70] sm:$0xff]  ;;  %v394_v9 = vld [vmem:[#allocation8 + $0x168] sm:$0xff] }
 0x2a8   :  { %4778 = vmatpush1.bf16.msra.mxu1 %v4777_v15  ;;  %4652 = vmatprep.subr.bf16.mxu0 %v4651_v16  ;;  %v4667_v15 = vpack.c.bf16 %v1302_v11, %v1286_v10  ;;  %v1285_v16 = vld [vmem:[#allocation8 + $0x1d40] sm:$0xff]  ;;  %v410_v10 = vld [vmem:[#allocation8 + $0x1e8] sm:$0xff] }
 0x2a9   :  { %4780 = vmatprep.subr.bf16.mxu1 %v4779_v20  ;;  %v1303_v20 = vld [vmem:[#allocation8 + $0x1dd0] sm:$0xff]  ;;  %v4669_v43 = vpack.c.bf16 %v1301_v17, %v1285_v16  ;;  %v4811_v17 = vpack.c.bf16 %v410_v10, %v394_v9  ;;  %v524_v9 = vld [vmem:[#allocation8 + $0x578] sm:$0xff] }
 0x2aa   :  { %v395_v16 = vld [vmem:[#allocation8 + $0x170] sm:$0xff]  ;;  %v540_v10 = vld [vmem:[#allocation8 + $0x5f8] sm:$0xff] }
 0x2ab   :  { %4654 = vmatpush1.bf16.msra.mxu0 %v4653_v31  ;;  %v4797_v31 = vpack.c.bf16 %v1303_v20, %v1287_v18  ;;  %v411_v18 = vld [vmem:[#allocation8 + $0x1f0] sm:$0xff]  ;;  %v442_v20 = vld [vmem:[#allocation8 + $0x2e8] sm:$0xff] }
 0x2ac   :  { %4782 = vmatpush1.bf16.msra.mxu1 %v4781_v32  ;;  %4656 = vmatprep.subr.bf16.mxu0 %v4655_v33  ;;  %v4671_v32 = vpack.c.bf16 %v1334_v22, %v1318_v21  ;;  %v1317_v33 = vld [vmem:[#allocation8 + $0x1e40] sm:$0xff]  ;;  %v4939_v21 = vpack.c.bf16 %v412_v27, %v396_v12  ;;  %v428_v22 = vld [vmem:[#allocation8 + $0x278] sm:$0xff] }
 0x2ad   :  { %4784 = vmatprep.subr.bf16.mxu1 %v4783_v38  ;;  %v1335_v38 = vld [vmem:[#allocation8 + $0x1ed0] sm:$0xff]  ;;  %v4673_v49 = vpack.c.bf16 %v1333_v34, %v1317_v33  ;;  %v441_v33 = vld [vmem:[#allocation8 + $0x2e0] sm:$0xff] }
 0x2ae   :  { %v427_v34 = vld [vmem:[#allocation8 + $0x270] sm:$0xff] }
 0x2af   :  { %4658 = vmatpush1.bf16.msra.mxu0 %v4657_v50  ;;  %v4801_v50 = vpack.c.bf16 %v1335_v38, %v1319_v35  ;;  %v4943_v35 = vpack.c.bf16 %v444_v23, %v428_v22  ;;  %v458_v38 = vld [vmem:[#allocation8 + $0x368] sm:$0xff] }
 0x2b0   :  { %4786 = vmatpush1.bf16.msra.mxu1 %v4785_v51  ;;  %4660 = vmatprep.subr.bf16.mxu0 %v4659_v52  ;;  %v4675_v51 = vpack.c.bf16 %v1366_v42, %v1350_v41  ;;  %v1349_v52 = vld [vmem:[#allocation8 + $0x1f40] sm:$0xff]  ;;  %v474_v41 = vld [vmem:[#allocation8 + $0x3e8] sm:$0xff]  ;;  %v460_v42 = vld [vmem:[#allocation8 + $0x378] sm:$0xff] }
 0x2b1   :  { %4788 = vmatprep.subr.bf16.mxu1 %v4787_v57  ;;  %v1367_v57 = vld [vmem:[#allocation8 + $0x1fd0] sm:$0xff]  ;;  %v4677_v63 = vpack.c.bf16 %v1365_v53, %v1349_v52  ;;  %v473_v52 = vld [vmem:[#allocation8 + $0x3e0] sm:$0xff] }
 0x2b2   :  { %v459_v53 = vld [vmem:[#allocation8 + $0x370] sm:$0xff] }
 0x2b3   :  { %4662 = vmatpush1.bf16.msra.mxu0 %v4661_v1  ;;  %v4805_v1 = vpack.c.bf16 %v1367_v57, %v1351_v54  ;;  %v4947_v54 = vpack.c.bf16 %v476_v44, %v460_v42  ;;  %v506_v57 = vld [vmem:[#allocation8 + $0x4e8] sm:$0xff] }
 0x2b4   :  { %4790 = vmatpush1.bf16.msra.mxu1 %v4789_v3  ;;  %4664 = vmatprep.subr.bf16.mxu0 %v4663_v4  ;;  %v4807_v3 = vpack.c.bf16 %v378_v59, %v362_v58  ;;  %v361_v4 = vld [vmem:[#allocation8 + $0x60] sm:$0xff]  ;;  %v492_v58 = vld [vmem:[#allocation8 + $0x478] sm:$0xff] }
 0x2b5   :  { %4792 = vmatprep.subr.bf16.mxu1 %v4791_v8  ;;  %v379_v8 = vld [vmem:[#allocation8 + $0xf0] sm:$0xff]  ;;  %v4809_v11 = vpack.c.bf16 %v377_v5, %v361_v4  ;;  %v508_v59 = vld [vmem:[#allocation8 + $0x4f8] sm:$0xff] }
 0x2b6   :  { %v491_v4 = vld [vmem:[#allocation8 + $0x470] sm:$0xff]  ;;  %v4951_v5 = vpack.c.bf16 %v508_v59, %v492_v58 }
 0x2b7   :  { %4666 = vmatpush1.bf16.msra.mxu0 %v4665_v13  ;;  %v4937_v13 = vpack.c.bf16 %v379_v8, %v363_v7  ;;  %v522_v7 = vld [vmem:[#allocation8 + $0x568] sm:$0xff] }
 0x2b8   :  { %4794 = vmatpush1.bf16.msra.mxu1 %v4793_v14  ;;  %4668 = vmatprep.subr.bf16.mxu0 %v4667_v15  ;;  %v393_v14 = vld [vmem:[#allocation8 + $0x160] sm:$0xff]  ;;  %v538_v8 = vld [vmem:[#allocation8 + $0x5e8] sm:$0xff] }
 0x2b9   :  { %4796 = vmatprep.subr.bf16.mxu1 %v4795_v19  ;;  %v409_v15 = vld [vmem:[#allocation8 + $0x1e0] sm:$0xff]  ;;  %v426_v19 = vld [vmem:[#allocation8 + $0x268] sm:$0xff]  ;;  %v4827_v27 = vpack.c.bf16 %v538_v8, %v522_v7  ;;  %v652_v7 = vld [vmem:[#allocation8 + $0x978] sm:$0xff] }
 0x2ba   :  { %v4813_v30 = vpack.c.bf16 %v409_v15, %v393_v14  ;;  %v537_v14 = vld [vmem:[#allocation8 + $0x5e0] sm:$0xff]  ;;  %v523_v15 = vld [vmem:[#allocation8 + $0x570] sm:$0xff]  ;;  %v668_v8 = vld [vmem:[#allocation8 + $0x9f8] sm:$0xff] }
 0x2bb   :  { %4670 = vmatpush1.bf16.msra.mxu0 %v4669_v43  ;;  %v4941_v43 = vpack.c.bf16 %v411_v18, %v395_v16  ;;  %v4955_v16 = vpack.c.bf16 %v540_v10, %v524_v9  ;;  %v554_v18 = vld [vmem:[#allocation8 + $0x668] sm:$0xff] }
 0x2bc   :  { %4798 = vmatpush1.bf16.msra.mxu1 %v4797_v31  ;;  %4672 = vmatprep.subr.bf16.mxu0 %v4671_v32  ;;  %v4815_v31 = vpack.c.bf16 %v442_v20, %v426_v19  ;;  %v425_v32 = vld [vmem:[#allocation8 + $0x260] sm:$0xff]  ;;  %v570_v19 = vld [vmem:[#allocation8 + $0x6e8] sm:$0xff]  ;;  %v556_v20 = vld [vmem:[#allocation8 + $0x678] sm:$0xff] }
 0x2bd   :  { %4800 = vmatprep.subr.bf16.mxu1 %v4799_v36  ;;  %v443_v36 = vld [vmem:[#allocation8 + $0x2f0] sm:$0xff]  ;;  %v4817_v46 = vpack.c.bf16 %v441_v33, %v425_v32 }
 0x2be   :  { %v555_v32 = vld [vmem:[#allocation8 + $0x670] sm:$0xff] }
 0x2bf   :  { %4674 = vmatpush1.bf16.msra.mxu0 %v4673_v49  ;;  %v4945_v49 = vpack.c.bf16 %v443_v36, %v427_v34  ;;  %v571_v34 = vld [vmem:[#allocation8 + $0x6f0] sm:$0xff]  ;;  %v602_v36 = vld [vmem:[#allocation8 + $0x7e8] sm:$0xff] }
 0x2c0   :  { %4802 = vmatpush1.bf16.msra.mxu1 %v4801_v50  ;;  %4676 = vmatprep.subr.bf16.mxu0 %v4675_v51  ;;  %v4819_v50 = vpack.c.bf16 %v474_v41, %v458_v38  ;;  %v457_v51 = vld [vmem:[#allocation8 + $0x360] sm:$0xff]  ;;  %v588_v38 = vld [vmem:[#allocation8 + $0x778] sm:$0xff]  ;;  %v4961_v44 = vpack.c.bf16 %v571_v34, %v555_v32  ;;  %v699_v32 = vld [vmem:[#allocation8 + $0xaf0] sm:$0xff] }
 0x2c1   :  { %4804 = vmatprep.subr.bf16.mxu1 %v4803_v56  ;;  %v490_v56 = vld [vmem:[#allocation8 + $0x468] sm:$0xff]  ;;  %v4821_v60 = vpack.c.bf16 %v473_v52, %v457_v51  ;;  %v604_v41 = vld [vmem:[#allocation8 + $0x7f8] sm:$0xff]  ;;  %v587_v51 = vld [vmem:[#allocation8 + $0x770] sm:$0xff] }
 0x2c2   :  { %v4963_v52 = vpack.c.bf16 %v604_v41, %v588_v38  ;;  %v730_v34 = vld [vmem:[#allocation8 + $0xbe8] sm:$0xff] }
 0x2c3   :  { %4678 = vmatpush1.bf16.msra.mxu0 %v4677_v63  ;;  %v4823_v63 = vpack.c.bf16 %v506_v57, %v490_v56  ;;  %v620_v56 = vld [vmem:[#allocation8 + $0x878] sm:$0xff] }
 0x2c4   :  { %4806 = vmatpush1.bf16.msra.mxu1 %v4805_v1  ;;  %4808 = vmatprep.subr.bf16.mxu0 %v4807_v3  ;;  %v489_v1 = vld [vmem:[#allocation8 + $0x460] sm:$0xff]  ;;  %v636_v57 = vld [vmem:[#allocation8 + $0x8f8] sm:$0xff] }
 0x2c5   :  { %4936 = vmatprep.subr.bf16.mxu1 %v4935_v6  ;;  %v505_v3 = vld [vmem:[#allocation8 + $0x4e0] sm:$0xff]  ;;  %v507_v6 = vld [vmem:[#allocation8 + $0x4f0] sm:$0xff] }
 0x2c6   :  { %2161 = vmatmul.mubr.f32.vlgmr.msra.gmra.mrb[6].mxu0 %v5846_v37  ;;  %v4953_v12 = vpack.c.bf16 %v507_v6, %v491_v4  ;;  %v635_v4 = vld [vmem:[#allocation8 + $0x8f0] sm:$0xff]  ;;  %v666_v6 = vld [vmem:[#allocation8 + $0x9e8] sm:$0xff] }
 0x2c7   :  { %2303 = vmatmul.mubr.f32.vlgmr.msra.gmra.mrb[6].mxu1 %v5846_v37  ;;  %4810 = vmatpush1.bf16.msra.mxu0 %v4809_v11  ;;  %v4825_v11 = vpack.c.bf16 %v505_v3, %v489_v1  ;;  %v619_v1 = vld [vmem:[#allocation8 + $0x870] sm:$0xff]  ;;  %v4967_v3 = vpack.c.bf16 %v636_v57, %v620_v56 }
 0x2c8   :  { %2373 = vmatprep.mubr.f32.mxu0 %v5827_v55  ;;  %4938 = vmatpush1.bf16.msra.mxu1 %v4937_v13  ;;  %v521_v13 = vld [vmem:[#allocation8 + $0x560] sm:$0xff]  ;;  %v4969_v10 = vpack.c.bf16 %v635_v4, %v619_v1  ;;  %v763_v1 = vld [vmem:[#allocation8 + $0xcf0] sm:$0xff]  ;;  %v794_v4 = vld [vmem:[#allocation8 + $0xde8] sm:$0xff] }
 0x2c9   :  { %2515 = vmatprep.mubr.f32.mxu1 %v5827_v55  ;;  %4812 = vmatprep.subr.bf16.mxu0 %v4811_v17  ;;  %v475_v55 = vld [vmem:[#allocation8 + $0x3f0] sm:$0xff]  ;;  %v4829_v22 = vpack.c.bf16 %v537_v14, %v521_v13  ;;  %v4971_v14 = vpack.c.bf16 %v668_v8, %v652_v7 }
 0x2ca   :  { %4940 = vmatprep.subr.bf16.mxu1 %v4939_v21  ;;  %v4949_v62 = vpack.c.bf16 %v475_v55, %v459_v53  ;;  %v539_v17 = vld [vmem:[#allocation8 + $0x5f0] sm:$0xff]  ;;  %v572_v21 = vld [vmem:[#allocation8 + $0x6f8] sm:$0xff]  ;;  %v634_v55 = vld [vmem:[#allocation8 + $0x8e8] sm:$0xff] }
 0x2cb   :  { %4814 = vmatpush1.bf16.msra.mxu0 %v4813_v30  ;;  %v4957_v23 = vpack.c.bf16 %v539_v17, %v523_v15  ;;  %v4831_v30 = vpack.c.bf16 %v570_v19, %v554_v18  ;;  %v4959_v33 = vpack.c.bf16 %v572_v21, %v556_v20  ;;  %v603_v53 = vld [vmem:[#allocation8 + $0x7f0] sm:$0xff]  ;;  %v698_v17 = vld [vmem:[#allocation8 + $0xae8] sm:$0xff]  ;;  %v684_v18 = vld [vmem:[#allocation8 + $0xa78] sm:$0xff] }
 0x2cc   :  { %4942 = vmatpush1.bf16.msra.mxu1 %v4941_v43  ;;  %4816 = vmatprep.subr.bf16.mxu0 %v4815_v31  ;;  %v553_v43 = vld [vmem:[#allocation8 + $0x660] sm:$0xff]  ;;  %v4965_v59 = vpack.c.bf16 %v603_v53, %v587_v51  ;;  %v651_v13 = vld [vmem:[#allocation8 + $0x970] sm:$0xff]  ;;  %v700_v19 = vld [vmem:[#allocation8 + $0xaf8] sm:$0xff] }
 0x2cd   :  { %4944 = vmatprep.subr.bf16.mxu1 %v4943_v35  ;;  %v569_v31 = vld [vmem:[#allocation8 + $0x6e0] sm:$0xff]  ;;  %v586_v35 = vld [vmem:[#allocation8 + $0x768] sm:$0xff]  ;;  %v667_v15 = vld [vmem:[#allocation8 + $0x9f0] sm:$0xff] }
 0x2ce   :  { %v4833_v42 = vpack.c.bf16 %v569_v31, %v553_v43  ;;  %v4973_v21 = vpack.c.bf16 %v667_v15, %v651_v13  ;;  %v683_v43 = vld [vmem:[#allocation8 + $0xa70] sm:$0xff]  ;;  %v4975_v31 = vpack.c.bf16 %v700_v19, %v684_v18  ;;  %v762_v53 = vld [vmem:[#allocation8 + $0xce8] sm:$0xff] }
 0x2cf   :  { %4818 = vmatpush1.bf16.msra.mxu0 %v4817_v46  ;;  %v4835_v46 = vpack.c.bf16 %v602_v36, %v586_v35  ;;  %v716_v35 = vld [vmem:[#allocation8 + $0xb78] sm:$0xff]  ;;  %v4977_v41 = vpack.c.bf16 %v699_v32, %v683_v43  ;;  %v731_v51 = vld [vmem:[#allocation8 + $0xbf0] sm:$0xff]  ;;  %v826_v15 = vld [vmem:[#allocation8 + $0xee8] sm:$0xff] }
 0x2d0   :  { %4946 = vmatpush1.bf16.msra.mxu1 %v4945_v49  ;;  %4820 = vmatprep.subr.bf16.mxu0 %v4819_v50  ;;  %v585_v49 = vld [vmem:[#allocation8 + $0x760] sm:$0xff]  ;;  %v732_v36 = vld [vmem:[#allocation8 + $0xbf8] sm:$0xff]  ;;  %v795_v13 = vld [vmem:[#allocation8 + $0xdf0] sm:$0xff] }
 0x2d1   :  { %4948 = vmatprep.subr.bf16.mxu1 %v4947_v54  ;;  %v601_v50 = vld [vmem:[#allocation8 + $0x7e0] sm:$0xff]  ;;  %v618_v54 = vld [vmem:[#allocation8 + $0x868] sm:$0xff]  ;;  %v827_v43 = vld [vmem:[#allocation8 + $0xef0] sm:$0xff] }
 0x2d2   :  { %v4837_v58 = vpack.c.bf16 %v601_v50, %v585_v49  ;;  %v715_v49 = vld [vmem:[#allocation8 + $0xb70] sm:$0xff]  ;;  %v4979_v50 = vpack.c.bf16 %v732_v36, %v716_v35  ;;  %v858_v32 = vld [vmem:[#allocation8 + $0xfe8] sm:$0xff] }
 0x2d3   :  { %4822 = vmatpush1.bf16.msra.mxu0 %v4821_v60  ;;  %v4839_v60 = vpack.c.bf16 %v634_v55, %v618_v54  ;;  %v748_v54 = vld [vmem:[#allocation8 + $0xc78] sm:$0xff]  ;;  %v4981_v57 = vpack.c.bf16 %v731_v51, %v715_v49  ;;  %v859_v49 = vld [vmem:[#allocation8 + $0xff0] sm:$0xff]  ;;  %v890_v51 = vld [vmem:[#allocation8 + $0x10e8] sm:$0xff] }
 0x2d4   :  { %4950 = vmatpush1.bf16.msra.mxu1 %v4949_v62  ;;  %4824 = vmatprep.subr.bf16.mxu0 %v4823_v63  ;;  %v617_v62 = vld [vmem:[#allocation8 + $0x860] sm:$0xff]  ;;  %v764_v55 = vld [vmem:[#allocation8 + $0xcf8] sm:$0xff] }
 0x2d5   :  { %4952 = vmatprep.subr.bf16.mxu1 %v4951_v5  ;;  %v633_v63 = vld [vmem:[#allocation8 + $0x8e0] sm:$0xff]  ;;  %v650_v5 = vld [vmem:[#allocation8 + $0x968] sm:$0xff] }
 0x2d6   :  { %v4841_v9 = vpack.c.bf16 %v633_v63, %v617_v62  ;;  %v747_v62 = vld [vmem:[#allocation8 + $0xc70] sm:$0xff]  ;;  %v4983_v63 = vpack.c.bf16 %v764_v55, %v748_v54 }
 0x2d7   :  { %4826 = vmatpush1.bf16.msra.mxu0 %v4825_v11  ;;  %v4843_v11 = vpack.c.bf16 %v666_v6, %v650_v5  ;;  %v780_v5 = vld [vmem:[#allocation8 + $0xd78] sm:$0xff]  ;;  %v4985_v8 = vpack.c.bf16 %v763_v1, %v747_v62  ;;  %v891_v62 = vld [vmem:[#allocation8 + $0x10f0] sm:$0xff]  ;;  %v922_v1 = vld [vmem:[#allocation8 + $0x11e8] sm:$0xff] }
 0x2d8   :  { %4954 = vmatpush1.bf16.msra.mxu1 %v4953_v12  ;;  %4828 = vmatprep.subr.bf16.mxu0 %v4827_v27  ;;  %v649_v12 = vld [vmem:[#allocation8 + $0x960] sm:$0xff]  ;;  %v796_v6 = vld [vmem:[#allocation8 + $0xdf8] sm:$0xff] }
 0x2d9   :  { %4956 = vmatprep.subr.bf16.mxu1 %v4955_v16  ;;  %v665_v27 = vld [vmem:[#allocation8 + $0x9e0] sm:$0xff]  ;;  %v682_v16 = vld [vmem:[#allocation8 + $0xa68] sm:$0xff] }
 0x2da   :  { %v4845_v20 = vpack.c.bf16 %v665_v27, %v649_v12  ;;  %v779_v12 = vld [vmem:[#allocation8 + $0xd70] sm:$0xff]  ;;  %v4987_v27 = vpack.c.bf16 %v796_v6, %v780_v5  ;;  %v924_v5 = vld [vmem:[#allocation8 + $0x11f8] sm:$0xff] }
 0x2db   :  { %4830 = vmatpush1.bf16.msra.mxu0 %v4829_v22  ;;  %v4847_v22 = vpack.c.bf16 %v698_v17, %v682_v16  ;;  %v812_v16 = vld [vmem:[#allocation8 + $0xe78] sm:$0xff]  ;;  %v4989_v19 = vpack.c.bf16 %v795_v13, %v779_v12  ;;  %v938_v12 = vld [vmem:[#allocation8 + $0x1268] sm:$0xff] }
 0x2dc   :  { %4958 = vmatpush1.bf16.msra.mxu1 %v4957_v23  ;;  %4832 = vmatprep.subr.bf16.mxu0 %v4831_v30  ;;  %v681_v23 = vld [vmem:[#allocation8 + $0xa60] sm:$0xff]  ;;  %v828_v17 = vld [vmem:[#allocation8 + $0xef8] sm:$0xff] }
 0x2dd   :  { %4960 = vmatprep.subr.bf16.mxu1 %v4959_v33  ;;  %v697_v30 = vld [vmem:[#allocation8 + $0xae0] sm:$0xff]  ;;  %v714_v33 = vld [vmem:[#allocation8 + $0xb68] sm:$0xff] }
 0x2de   :  { %v4849_v38 = vpack.c.bf16 %v697_v30, %v681_v23  ;;  %v811_v23 = vld [vmem:[#allocation8 + $0xe70] sm:$0xff]  ;;  %v4991_v30 = vpack.c.bf16 %v828_v17, %v812_v16 }
 0x2df   :  { %4834 = vmatpush1.bf16.msra.mxu0 %v4833_v42  ;;  %v4851_v42 = vpack.c.bf16 %v730_v34, %v714_v33  ;;  %v844_v33 = vld [vmem:[#allocation8 + $0xf78] sm:$0xff]  ;;  %v4993_v36 = vpack.c.bf16 %v827_v43, %v811_v23  ;;  %v955_v23 = vld [vmem:[#allocation8 + $0x12f0] sm:$0xff]  ;;  %v986_v43 = vld [vmem:[#allocation8 + $0x13e8] sm:$0xff] }
 0x2e0   :  { %4962 = vmatpush1.bf16.msra.mxu1 %v4961_v44  ;;  %4836 = vmatprep.subr.bf16.mxu0 %v4835_v46  ;;  %v713_v44 = vld [vmem:[#allocation8 + $0xb60] sm:$0xff]  ;;  %v860_v34 = vld [vmem:[#allocation8 + $0xff8] sm:$0xff] }
 0x2e1   :  { %4964 = vmatprep.subr.bf16.mxu1 %v4963_v52  ;;  %v729_v46 = vld [vmem:[#allocation8 + $0xbe0] sm:$0xff]  ;;  %v746_v52 = vld [vmem:[#allocation8 + $0xc68] sm:$0xff] }
 0x2e2   :  { %v4853_v56 = vpack.c.bf16 %v729_v46, %v713_v44  ;;  %v843_v44 = vld [vmem:[#allocation8 + $0xf70] sm:$0xff]  ;;  %v4995_v46 = vpack.c.bf16 %v860_v34, %v844_v33 }
 0x2e3   :  { %4838 = vmatpush1.bf16.msra.mxu0 %v4837_v58  ;;  %v4855_v58 = vpack.c.bf16 %v762_v53, %v746_v52  ;;  %v876_v52 = vld [vmem:[#allocation8 + $0x1078] sm:$0xff]  ;;  %v4997_v55 = vpack.c.bf16 %v859_v49, %v843_v44  ;;  %v1018_v44 = vld [vmem:[#allocation8 + $0x14e8] sm:$0xff] }
 0x2e4   :  { %4966 = vmatpush1.bf16.msra.mxu1 %v4965_v59  ;;  %4840 = vmatprep.subr.bf16.mxu0 %v4839_v60  ;;  %v745_v59 = vld [vmem:[#allocation8 + $0xc60] sm:$0xff]  ;;  %v892_v53 = vld [vmem:[#allocation8 + $0x10f8] sm:$0xff] }
 0x2e5   :  { %4968 = vmatprep.subr.bf16.mxu1 %v4967_v3  ;;  %v761_v60 = vld [vmem:[#allocation8 + $0xce0] sm:$0xff]  ;;  %v778_v3 = vld [vmem:[#allocation8 + $0xd68] sm:$0xff]  ;;  %v1020_v49 = vld [vmem:[#allocation8 + $0x14f8] sm:$0xff] }
 0x2e6   :  { %v4857_v7 = vpack.c.bf16 %v761_v60, %v745_v59  ;;  %v4999_v59 = vpack.c.bf16 %v892_v53, %v876_v52  ;;  %v875_v60 = vld [vmem:[#allocation8 + $0x1070] sm:$0xff]  ;;  %v1001_v53 = vld [vmem:[#allocation8 + $0x1460] sm:$0xff] }
 0x2e7   :  { %4842 = vmatpush1.bf16.msra.mxu0 %v4841_v9  ;;  %v4859_v9 = vpack.c.bf16 %v794_v4, %v778_v3  ;;  %v908_v4 = vld [vmem:[#allocation8 + $0x1178] sm:$0xff]  ;;  %v5001_v6 = vpack.c.bf16 %v891_v62, %v875_v60 }
 0x2e8   :  { %4970 = vmatpush1.bf16.msra.mxu1 %v4969_v10  ;;  %4844 = vmatprep.subr.bf16.mxu0 %v4843_v11  ;;  %v777_v10 = vld [vmem:[#allocation8 + $0xd60] sm:$0xff]  ;;  %v5003_v13 = vpack.c.bf16 %v924_v5, %v908_v4  ;;  %v1036_v60 = vld [vmem:[#allocation8 + $0x1578] sm:$0xff] }
 0x2e9   :  { %4972 = vmatprep.subr.bf16.mxu1 %v4971_v14  ;;  %v793_v11 = vld [vmem:[#allocation8 + $0xde0] sm:$0xff]  ;;  %v810_v14 = vld [vmem:[#allocation8 + $0xe68] sm:$0xff]  ;;  %v1052_v62 = vld [vmem:[#allocation8 + $0x15f8] sm:$0xff] }
 0x2ea   :  { %v4861_v18 = vpack.c.bf16 %v793_v11, %v777_v10  ;;  %v923_v11 = vld [vmem:[#allocation8 + $0x11f0] sm:$0xff]  ;;  %v1033_v4 = vld [vmem:[#allocation8 + $0x1560] sm:$0xff] }
 0x2eb   :  { %4846 = vmatpush1.bf16.msra.mxu0 %v4845_v20  ;;  %v4863_v20 = vpack.c.bf16 %v826_v15, %v810_v14  ;;  %v940_v14 = vld [vmem:[#allocation8 + $0x1278] sm:$0xff]  ;;  %v1049_v5 = vld [vmem:[#allocation8 + $0x15e0] sm:$0xff] }
 0x2ec   :  { %4974 = vmatpush1.bf16.msra.mxu1 %v4973_v21  ;;  %4848 = vmatprep.subr.bf16.mxu0 %v4847_v22  ;;  %v809_v21 = vld [vmem:[#allocation8 + $0xe60] sm:$0xff]  ;;  %v956_v15 = vld [vmem:[#allocation8 + $0x12f8] sm:$0xff] }
 0x2ed   :  { %4976 = vmatprep.subr.bf16.mxu1 %v4975_v31  ;;  %v825_v22 = vld [vmem:[#allocation8 + $0xee0] sm:$0xff]  ;;  %v842_v31 = vld [vmem:[#allocation8 + $0xf68] sm:$0xff] }
 0x2ee   :  { %v4865_v35 = vpack.c.bf16 %v825_v22, %v809_v21  ;;  %v939_v21 = vld [vmem:[#allocation8 + $0x1270] sm:$0xff]  ;;  %v5007_v22 = vpack.c.bf16 %v956_v15, %v940_v14  ;;  %v1065_v15 = vld [vmem:[#allocation8 + $0x1660] sm:$0xff] }
 0x2ef   :  { %4850 = vmatpush1.bf16.msra.mxu0 %v4849_v38  ;;  %v4867_v38 = vpack.c.bf16 %v858_v32, %v842_v31  ;;  %v972_v31 = vld [vmem:[#allocation8 + $0x1378] sm:$0xff]  ;;  %v5009_v33 = vpack.c.bf16 %v955_v23, %v939_v21  ;;  %v1098_v21 = vld [vmem:[#allocation8 + $0x1768] sm:$0xff] }
 0x2f0   :  { %4978 = vmatpush1.bf16.msra.mxu1 %v4977_v41  ;;  %4852 = vmatprep.subr.bf16.mxu0 %v4851_v42  ;;  %v841_v41 = vld [vmem:[#allocation8 + $0xf60] sm:$0xff] }
 0x2f1   :  { %4980 = vmatprep.subr.bf16.mxu1 %v4979_v50  ;;  %v857_v42 = vld [vmem:[#allocation8 + $0xfe0] sm:$0xff]  ;;  %v874_v50 = vld [vmem:[#allocation8 + $0x1068] sm:$0xff] }
 0x2f2   :  { %v4869_v54 = vpack.c.bf16 %v857_v42, %v841_v41  ;;  %v1002_v42 = vld [vmem:[#allocation8 + $0x1468] sm:$0xff] }
 0x2f3   :  { %4854 = vmatpush1.bf16.msra.mxu0 %v4853_v56  ;;  %v4871_v56 = vpack.c.bf16 %v890_v51, %v874_v50  ;;  %v4887_v52 = vpack.c.bf16 %v1018_v44, %v1002_v42  ;;  %v1130_v42 = vld [vmem:[#allocation8 + $0x1868] sm:$0xff] }
 0x2f4   :  { %4982 = vmatpush1.bf16.msra.mxu1 %v4981_v57  ;;  %4856 = vmatprep.subr.bf16.mxu0 %v4855_v58  ;;  %v873_v57 = vld [vmem:[#allocation8 + $0x1060] sm:$0xff]  ;;  %v1146_v44 = vld [vmem:[#allocation8 + $0x18e8] sm:$0xff] }
 0x2f5   :  { %4984 = vmatprep.subr.bf16.mxu1 %v4983_v63  ;;  %v889_v58 = vld [vmem:[#allocation8 + $0x10e0] sm:$0xff]  ;;  %v906_v63 = vld [vmem:[#allocation8 + $0x1168] sm:$0xff] }
 0x2f6   :  { %v4873_v3 = vpack.c.bf16 %v889_v58, %v873_v57  ;;  %v4875_v10 = vpack.c.bf16 %v922_v1, %v906_v63  ;;  %v1019_v57 = vld [vmem:[#allocation8 + $0x14f0] sm:$0xff]  ;;  %v1034_v58 = vld [vmem:[#allocation8 + $0x1568] sm:$0xff] }
 0x2f7   :  { %4858 = vmatpush1.bf16.msra.mxu0 %v4857_v7  ;;  %v905_v7 = vld [vmem:[#allocation8 + $0x1160] sm:$0xff] }
 0x2f8   :  { %4986 = vmatpush1.bf16.msra.mxu1 %v4985_v8  ;;  %4860 = vmatprep.subr.bf16.mxu0 %v4859_v9  ;;  %v921_v8 = vld [vmem:[#allocation8 + $0x11e0] sm:$0xff]  ;;  %v907_v9 = vld [vmem:[#allocation8 + $0x1170] sm:$0xff] }
 0x2f9   :  { %4988 = vmatprep.subr.bf16.mxu1 %v4987_v27  ;;  %v954_v27 = vld [vmem:[#allocation8 + $0x12e8] sm:$0xff]  ;;  %v4877_v16 = vpack.c.bf16 %v921_v8, %v905_v7  ;;  %v5005_v17 = vpack.c.bf16 %v923_v11, %v907_v9  ;;  %v5019_v7 = vpack.c.bf16 %v1052_v62, %v1036_v60  ;;  %v1051_v8 = vld [vmem:[#allocation8 + $0x15f0] sm:$0xff]  ;;  %v1068_v11 = vld [vmem:[#allocation8 + $0x1678] sm:$0xff] }
 0x2fa   :  { %v1066_v9 = vld [vmem:[#allocation8 + $0x1668] sm:$0xff]  ;;  %v1164_v60 = vld [vmem:[#allocation8 + $0x1978] sm:$0xff] }
 0x2fb   :  { %4862 = vmatpush1.bf16.msra.mxu0 %v4861_v18  ;;  %v4879_v18 = vpack.c.bf16 %v954_v27, %v938_v12  ;;  %v1084_v12 = vld [vmem:[#allocation8 + $0x16f8] sm:$0xff]  ;;  %v4893_v27 = vpack.c.bf16 %v1049_v5, %v1033_v4  ;;  %v1161_v4 = vld [vmem:[#allocation8 + $0x1960] sm:$0xff] }
 0x2fc   :  { %4990 = vmatpush1.bf16.msra.mxu1 %v4989_v19  ;;  %4864 = vmatprep.subr.bf16.mxu0 %v4863_v20  ;;  %v937_v19 = vld [vmem:[#allocation8 + $0x1260] sm:$0xff]  ;;  %v1180_v62 = vld [vmem:[#allocation8 + $0x19f8] sm:$0xff] }
 0x2fd   :  { %4992 = vmatprep.subr.bf16.mxu1 %v4991_v30  ;;  %v953_v20 = vld [vmem:[#allocation8 + $0x12e0] sm:$0xff]  ;;  %v970_v30 = vld [vmem:[#allocation8 + $0x1368] sm:$0xff] }
 0x2fe   :  { %v4881_v32 = vpack.c.bf16 %v953_v20, %v937_v19  ;;  %v4883_v34 = vpack.c.bf16 %v986_v43, %v970_v30  ;;  %v5023_v19 = vpack.c.bf16 %v1084_v12, %v1068_v11  ;;  %v1083_v20 = vld [vmem:[#allocation8 + $0x16f0] sm:$0xff]  ;;  %v1100_v43 = vld [vmem:[#allocation8 + $0x1778] sm:$0xff]  ;;  %v1177_v5 = vld [vmem:[#allocation8 + $0x19e0] sm:$0xff] }
 0x2ff   :  { %4866 = vmatpush1.bf16.msra.mxu0 %v4865_v35  ;;  %v969_v35 = vld [vmem:[#allocation8 + $0x1360] sm:$0xff]  ;;  %v1196_v11 = vld [vmem:[#allocation8 + $0x1a78] sm:$0xff] }
 0x300   :  { %4994 = vmatpush1.bf16.msra.mxu1 %v4993_v36  ;;  %4868 = vmatprep.subr.bf16.mxu0 %v4867_v38  ;;  %v985_v36 = vld [vmem:[#allocation8 + $0x13e0] sm:$0xff]  ;;  %v971_v38 = vld [vmem:[#allocation8 + $0x1370] sm:$0xff]  ;;  %v1212_v12 = vld [vmem:[#allocation8 + $0x1af8] sm:$0xff] }
 0x301   :  { %4996 = vmatprep.subr.bf16.mxu1 %v4995_v46  ;;  %v1004_v46 = vld [vmem:[#allocation8 + $0x1478] sm:$0xff]  ;;  %v4885_v50 = vpack.c.bf16 %v985_v36, %v969_v35  ;;  %v1097_v35 = vld [vmem:[#allocation8 + $0x1760] sm:$0xff] }
 0x302   :  { %v1113_v36 = vld [vmem:[#allocation8 + $0x17e0] sm:$0xff] }
 0x303   :  { %4870 = vmatpush1.bf16.msra.mxu0 %v4869_v54  ;;  %v1017_v54 = vld [vmem:[#allocation8 + $0x14e0] sm:$0xff] }
 0x304   :  { %4998 = vmatpush1.bf16.msra.mxu1 %v4997_v55  ;;  %4872 = vmatprep.subr.bf16.mxu0 %v4871_v56  ;;  %v1003_v55 = vld [vmem:[#allocation8 + $0x1470] sm:$0xff]  ;;  %v5015_v56 = vpack.c.bf16 %v1020_v49, %v1004_v46  ;;  %v4889_v63 = vpack.c.bf16 %v1017_v54, %v1001_v53  ;;  %v1132_v46 = vld [vmem:[#allocation8 + $0x1878] sm:$0xff]  ;;  %v1129_v53 = vld [vmem:[#allocation8 + $0x1860] sm:$0xff] }
 0x305   :  { %5000 = vmatprep.subr.bf16.mxu1 %v4999_v59  ;;  %v1050_v59 = vld [vmem:[#allocation8 + $0x15e8] sm:$0xff]  ;;  %v5017_v1 = vpack.c.bf16 %v1019_v57, %v1003_v55  ;;  %v1148_v49 = vld [vmem:[#allocation8 + $0x18f8] sm:$0xff]  ;;  %v1145_v54 = vld [vmem:[#allocation8 + $0x18e0] sm:$0xff] }
 0x306   :  { %2374 = vmatmul.mubr.f32.vlgmr.msra.gmra.mrb[8].mxu0 %v5830_v61  ;;  %v1131_v55 = vld [vmem:[#allocation8 + $0x1870] sm:$0xff] }
 0x307   :  { %2516 = vmatmul.mubr.f32.vlgmr.msra.gmra.mrb[8].mxu1 %v5830_v61  ;;  %4874 = vmatpush1.bf16.msra.mxu0 %v4873_v3  ;;  %v988_v61 = vld [vmem:[#allocation8 + $0x13f8] sm:$0xff]  ;;  %v4891_v3 = vpack.c.bf16 %v1050_v59, %v1034_v58  ;;  %v1147_v57 = vld [vmem:[#allocation8 + $0x18f0] sm:$0xff]  ;;  %v1162_v58 = vld [vmem:[#allocation8 + $0x1968] sm:$0xff] }
 0x308   :  { %2444 = vmatprep.mubr.f32.mxu0 %v5836_v2  ;;  %5002 = vmatpush1.bf16.msra.mxu1 %v5001_v6  ;;  %v5011_v41 = vpack.c.bf16 %v988_v61, %v972_v31  ;;  %v1035_v6 = vld [vmem:[#allocation8 + $0x1570] sm:$0xff]  ;;  %v1116_v31 = vld [vmem:[#allocation8 + $0x17f8] sm:$0xff]  ;;  %v1178_v59 = vld [vmem:[#allocation8 + $0x19e8] sm:$0xff] }
 0x309   :  { %2586 = vmatprep.mubr.f32.mxu1 %v5836_v2  ;;  %4876 = vmatprep.subr.bf16.mxu0 %v4875_v10  ;;  %v987_v2 = vld [vmem:[#allocation8 + $0x13f0] sm:$0xff]  ;;  %v1082_v10 = vld [vmem:[#allocation8 + $0x16e8] sm:$0xff] }
 0x30a   :  { %5004 = vmatprep.subr.bf16.mxu1 %v5003_v13  ;;  %v5013_v51 = vpack.c.bf16 %v987_v2, %v971_v38  ;;  %v5021_v13 = vpack.c.bf16 %v1051_v8, %v1035_v6  ;;  %v4895_v14 = vpack.c.bf16 %v1082_v10, %v1066_v9  ;;  %v1099_v38 = vld [vmem:[#allocation8 + $0x1770] sm:$0xff]  ;;  %v1194_v9 = vld [vmem:[#allocation8 + $0x1a68] sm:$0xff] }
 0x30b   :  { %4878 = vmatpush1.bf16.msra.mxu0 %v4877_v16  ;;  %v1081_v16 = vld [vmem:[#allocation8 + $0x16e0] sm:$0xff]  ;;  %v1115_v2 = vld [vmem:[#allocation8 + $0x17f0] sm:$0xff]  ;;  %v1210_v10 = vld [vmem:[#allocation8 + $0x1ae8] sm:$0xff] }
 0x30c   :  { %5006 = vmatpush1.bf16.msra.mxu1 %v5005_v17  ;;  %4880 = vmatprep.subr.bf16.mxu0 %v4879_v18  ;;  %v1067_v17 = vld [vmem:[#allocation8 + $0x1670] sm:$0xff] }
 0x30d   :  { %5008 = vmatprep.subr.bf16.mxu1 %v5007_v22  ;;  %v1114_v22 = vld [vmem:[#allocation8 + $0x17e8] sm:$0xff]  ;;  %v1163_v6 = vld [vmem:[#allocation8 + $0x1970] sm:$0xff] }
 0x30e   :  { %v1179_v8 = vld [vmem:[#allocation8 + $0x19f0] sm:$0xff] }
 0x30f   :  { %4882 = vmatpush1.bf16.msra.mxu0 %v4881_v32  ;;  %v4897_v32 = vpack.c.bf16 %v1081_v16, %v1065_v15  ;;  %v1193_v15 = vld [vmem:[#allocation8 + $0x1a60] sm:$0xff] }
 0x310   :  { %5010 = vmatpush1.bf16.msra.mxu1 %v5009_v33  ;;  %4884 = vmatprep.subr.bf16.mxu0 %v4883_v34  ;;  %v5025_v33 = vpack.c.bf16 %v1083_v20, %v1067_v17  ;;  %v4899_v34 = vpack.c.bf16 %v1114_v22, %v1098_v21  ;;  %v1209_v16 = vld [vmem:[#allocation8 + $0x1ae0] sm:$0xff]  ;;  %v1195_v17 = vld [vmem:[#allocation8 + $0x1a70] sm:$0xff]  ;;  %v1226_v21 = vld [vmem:[#allocation8 + $0x1b68] sm:$0xff] }
 0x311   :  { %5012 = vmatprep.subr.bf16.mxu1 %v5011_v41  ;;  %v5027_v41 = vpack.c.bf16 %v1116_v31, %v1100_v43  ;;  %v1211_v20 = vld [vmem:[#allocation8 + $0x1af0] sm:$0xff]  ;;  %v1242_v22 = vld [vmem:[#allocation8 + $0x1be8] sm:$0xff]  ;;  %v1228_v43 = vld [vmem:[#allocation8 + $0x1b78] sm:$0xff] }
 0x312   :  { %v1244_v31 = vld [vmem:[#allocation8 + $0x1bf8] sm:$0xff] }
 0x313   :  { %4886 = vmatpush1.bf16.msra.mxu0 %v4885_v50  ;;  %v4901_v50 = vpack.c.bf16 %v1113_v36, %v1097_v35  ;;  %v1225_v35 = vld [vmem:[#allocation8 + $0x1b60] sm:$0xff] }
 0x314   :  { %5014 = vmatpush1.bf16.msra.mxu1 %v5013_v51  ;;  %4888 = vmatprep.subr.bf16.mxu0 %v4887_v52  ;;  %v5029_v51 = vpack.c.bf16 %v1115_v2, %v1099_v38  ;;  %v4903_v52 = vpack.c.bf16 %v1146_v44, %v1130_v42  ;;  %v1241_v36 = vld [vmem:[#allocation8 + $0x1be0] sm:$0xff]  ;;  %v1227_v38 = vld [vmem:[#allocation8 + $0x1b70] sm:$0xff]  ;;  %v1258_v42 = vld [vmem:[#allocation8 + $0x1c68] sm:$0xff] }
 0x315   :  { %5016 = vmatprep.subr.bf16.mxu1 %v5015_v56  ;;  %v5031_v56 = vpack.c.bf16 %v1148_v49, %v1132_v46  ;;  %v1243_v2 = vld [vmem:[#allocation8 + $0x1bf0] sm:$0xff]  ;;  %v1274_v44 = vld [vmem:[#allocation8 + $0x1ce8] sm:$0xff]  ;;  %v1260_v46 = vld [vmem:[#allocation8 + $0x1c78] sm:$0xff] }
 0x316   :  { %v1276_v49 = vld [vmem:[#allocation8 + $0x1cf8] sm:$0xff] }
 0x317   :  { %4890 = vmatpush1.bf16.msra.mxu0 %v4889_v63  ;;  %v4905_v63 = vpack.c.bf16 %v1145_v54, %v1129_v53  ;;  %v1257_v53 = vld [vmem:[#allocation8 + $0x1c60] sm:$0xff] }
 0x318   :  { %5018 = vmatpush1.bf16.msra.mxu1 %v5017_v1  ;;  %4892 = vmatprep.subr.bf16.mxu0 %v4891_v3  ;;  %v5033_v1 = vpack.c.bf16 %v1147_v57, %v1131_v55  ;;  %v4907_v3 = vpack.c.bf16 %v1178_v59, %v1162_v58  ;;  %v1273_v54 = vld [vmem:[#allocation8 + $0x1ce0] sm:$0xff]  ;;  %v1259_v55 = vld [vmem:[#allocation8 + $0x1c70] sm:$0xff]  ;;  %v1290_v58 = vld [vmem:[#allocation8 + $0x1d68] sm:$0xff] }
 0x319   :  { %v5880_v18 = vpop.f32.mrb[4].mxu0  ;;  %5020 = vmatprep.subr.bf16.mxu1 %v5019_v7  ;;  %v5035_v7 = vpack.c.bf16 %v1180_v62, %v1164_v60  ;;  %v1275_v57 = vld [vmem:[#allocation8 + $0x1cf0] sm:$0xff]  ;;  %v1306_v59 = vld [vmem:[#allocation8 + $0x1de8] sm:$0xff]  ;;  %v1292_v60 = vld [vmem:[#allocation8 + $0x1d78] sm:$0xff] }
 0x31a   :  { %v5882_v23 = vpop.f32.mrb[4].mxu1  ;;  %v5884_v30 = vpop.f32.mrb[5].mxu0  ;;  %v1308_v62 = vld [vmem:[#allocation8 + $0x1df8] sm:$0xff] }
 0x31b   :  { %v5886_v61 = vpop.f32.mrb[5].mxu1  ;;  %4894 = vmatpush1.bf16.msra.mxu0 %v4893_v27  ;;  %v4909_v27 = vpack.c.bf16 %v1177_v5, %v1161_v4  ;;  %v1289_v4 = vld [vmem:[#allocation8 + $0x1d60] sm:$0xff] }
 0x31c   :  { %5022 = vmatpush1.bf16.msra.mxu1 %v5021_v13  ;;  %4896 = vmatprep.subr.bf16.mxu0 %v4895_v14  ;;  %v5037_v13 = vpack.c.bf16 %v1179_v8, %v1163_v6  ;;  %v4911_v14 = vpack.c.bf16 %v1210_v10, %v1194_v9  ;;  %v1305_v5 = vld [vmem:[#allocation8 + $0x1de0] sm:$0xff]  ;;  %v1291_v6 = vld [vmem:[#allocation8 + $0x1d70] sm:$0xff]  ;;  %v1322_v9 = vld [vmem:[#allocation8 + $0x1e68] sm:$0xff] }
 0x31d   :  { %5024 = vmatprep.subr.bf16.mxu1 %v5023_v19  ;;  %v5039_v19 = vpack.c.bf16 %v1212_v12, %v1196_v11  ;;  %v1307_v8 = vld [vmem:[#allocation8 + $0x1df0] sm:$0xff]  ;;  %v1338_v10 = vld [vmem:[#allocation8 + $0x1ee8] sm:$0xff]  ;;  %v1324_v11 = vld [vmem:[#allocation8 + $0x1e78] sm:$0xff] }
 0x31e   :  { %v1340_v12 = vld [vmem:[#allocation8 + $0x1ef8] sm:$0xff] }
 0x31f   :  { %4898 = vmatpush1.bf16.msra.mxu0 %v4897_v32  ;;  %v4913_v32 = vpack.c.bf16 %v1209_v16, %v1193_v15  ;;  %v4927_v15 = vpack.c.bf16 %v1338_v10, %v1322_v9  ;;  %v1321_v16 = vld [vmem:[#allocation8 + $0x1e60] sm:$0xff]  ;;  %v2646_v9 = vld [vmem:[#allocation11 + $0x18] sm:$0xff] }
 0x320   :  { %5026 = vmatpush1.bf16.msra.mxu1 %v5025_v33  ;;  %4900 = vmatprep.subr.bf16.mxu0 %v4899_v34  ;;  %v5041_v33 = vpack.c.bf16 %v1211_v20, %v1195_v17  ;;  %v4915_v34 = vpack.c.bf16 %v1242_v22, %v1226_v21  ;;  %v1337_v17 = vld [vmem:[#allocation8 + $0x1ee0] sm:$0xff]  ;;  %v5055_v20 = vpack.c.bf16 %v1340_v12, %v1324_v11  ;;  %v1339_v21 = vld [vmem:[#allocation8 + $0x1ef0] sm:$0xff]  ;;  %v1354_v22 = vld [vmem:[#allocation8 + $0x1f68] sm:$0xff] }
 0x321   :  { %5028 = vmatprep.subr.bf16.mxu1 %v5027_v41  ;;  %v5043_v41 = vpack.c.bf16 %v1244_v31, %v1228_v43  ;;  %v1370_v43 = vld [vmem:[#allocation8 + $0x1fe8] sm:$0xff]  ;;  %v1356_v31 = vld [vmem:[#allocation8 + $0x1f78] sm:$0xff]  ;;  %v2773_v10 = vld [vmem:[#allocation11 + $0x110] sm:$0xff] }
 0x322   :  { %v2774_v12 = vld [vmem:[#allocation11 + $0x118] sm:$0xff] }
 0x323   :  { %4902 = vmatpush1.bf16.msra.mxu0 %v4901_v50  ;;  %v4917_v50 = vpack.c.bf16 %v1241_v36, %v1225_v35 }
 0x324   :  { %5030 = vmatpush1.bf16.msra.mxu1 %v5029_v51  ;;  %4904 = vmatprep.subr.bf16.mxu0 %v4903_v52  ;;  %v5045_v51 = vpack.c.bf16 %v1243_v2, %v1227_v38  ;;  %v4919_v52 = vpack.c.bf16 %v1274_v44, %v1258_v42  ;;  %v4931_v38 = vpack.c.bf16 %v1370_v43, %v1354_v22  ;;  %v1369_v2 = vld [vmem:[#allocation8 + $0x1fe0] sm:$0xff]  ;;  %v1355_v42 = vld [vmem:[#allocation8 + $0x1f70] sm:$0xff] }
 0x325   :  { %5032 = vmatprep.subr.bf16.mxu1 %v5031_v56  ;;  %v5047_v56 = vpack.c.bf16 %v1276_v49, %v1260_v46  ;;  %v1371_v46 = vld [vmem:[#allocation8 + $0x1ff0] sm:$0xff]  ;;  %v5101_v22 = vpack.c.bf16 %v2774_v12, %v2773_v10  ;;  %v2654_v10 = vld [vmem:[#allocation11 + $0x58] sm:$0xff] }
 0x326   :  { %v2659_v49 = vld [vmem:[#allocation11 + $0x80] sm:$0xff] }
 0x327   :  { %4906 = vmatpush1.bf16.msra.mxu0 %v4905_v63  ;;  %v4921_v63 = vpack.c.bf16 %v1273_v54, %v1257_v53 }
 0x328   :  { %5034 = vmatpush1.bf16.msra.mxu1 %v5033_v1  ;;  %4908 = vmatprep.subr.bf16.mxu0 %v4907_v3  ;;  %v5049_v1 = vpack.c.bf16 %v1275_v57, %v1259_v55  ;;  %v4923_v3 = vpack.c.bf16 %v1306_v59, %v1290_v58  ;;  %v2643_v58 = vld [vmem:[#allocation11] sm:$0xff]  ;;  %v2644_v59 = vld [vmem:[#allocation11 + $0x8] sm:$0xff] }
 0x329   :  { %5036 = vmatprep.subr.bf16.mxu1 %v5035_v7  ;;  %v5051_v7 = vpack.c.bf16 %v1308_v62, %v1292_v60  ;;  %v2771_v62 = vld [vmem:[#allocation11 + $0x100] sm:$0xff] }
 0x32b   :  { %4910 = vmatpush1.bf16.msra.mxu0 %v4909_v27  ;;  %v5888_v27 = vld [vmem:[#allocation10] sm:$0xff] }
 0x32c   :  { %5038 = vmatpush1.bf16.msra.mxu1 %v5037_v13  ;;  %4912 = vmatprep.subr.bf16.mxu0 %v4911_v14  ;;  %v4925_v13 = vpack.c.bf16 %v1305_v5, %v1289_v4  ;;  %v5053_v14 = vpack.c.bf16 %v1307_v8, %v1291_v6  ;;  %v1392_v35 = vrot.slane %v5888_v27, %v5817_v29  ;;  %v2790_v6 = vld [vmem:[#allocation11 + $0x198] sm:$0xff]  ;;  %v2645_v8 = vld [vmem:[#allocation11 + $0x10] sm:$0xff] }
 0x32d   :  { %5040 = vmatprep.subr.bf16.mxu1 %v5039_v19  ;;  %v1323_v19 = vld [vmem:[#allocation8 + $0x1e70] sm:$0xff]  ;;  %v5065_v5 = vpack.c.bf16 %v2644_v59, %v2643_v58 }
 0x32e   :  { %v5057_v36 = vpack.c.bf16 %v1339_v21, %v1323_v19  ;;  %v5322_v55 = vadd.f32 %v5870_v48, %v1392_v35  ;;  %v2776_v35 = vld [vmem:[#allocation11 + $0x128] sm:$0xff] }
 0x32f   :  { %4914 = vmatpush1.bf16.msra.mxu0 %v4913_v32  ;;  %v1372_v32 = vld [vmem:[#allocation8 + $0x1ff8] sm:$0xff] }
 0x330   :  { %5042 = vmatpush1.bf16.msra.mxu1 %v5041_v33  ;;  %4916 = vmatprep.subr.bf16.mxu0 %v4915_v34  ;;  %v1384_v33 = vrot.slane %v5888_v27, %v5814_v28  ;;  %v4929_v34 = vpack.c.bf16 %v1337_v17, %v1321_v16  ;;  %v5059_v44 = vpack.c.bf16 %v1372_v32, %v1356_v31  ;;  %vm2596_vm9 = vcmp.gt.f32.partialorder %v5322_v55, 0.0  ;;  %v2791_v16 = vld [vmem:[#allocation11 + $0x1a0] sm:$0xff]  ;;  %v2792_v17 = vld [vmem:[#allocation11 + $0x1a8] sm:$0xff] }
 0x331   :  { %5044 = vmatprep.subr.bf16.mxu1 %v5043_v41  ;;  %v1353_v41 = vld [vmem:[#allocation8 + $0x1f60] sm:$0xff]  ;;  %v2647_v31 = vld [vmem:[#allocation11 + $0x20] sm:$0xff]  ;;  %v2648_v32 = vld [vmem:[#allocation11 + $0x28] sm:$0xff] }
 0x332   :  { %v5320_v53 = vadd.f32 %v5868_v47, %v1384_v33  ;;  %v4933_v54 = vpack.c.bf16 %v1369_v2, %v1353_v41  ;;  %v2789_v47 = vld [vmem:[#allocation11 + $0x190] sm:$0xff]  ;;  %v2775_v33 = vld [vmem:[#allocation11 + $0x120] sm:$0xff]  ;;  %v2794_v41 = vld [vmem:[#allocation11 + $0x1b8] sm:$0xff]  ;;  %v5073_v2 = vpack.c.bf16 %v2648_v32, %v2647_v31 }
 0x333   :  { %4918 = vmatpush1.bf16.msra.mxu0 %v4917_v50  ;;  %v2660_v50 = vld [vmem:[#allocation11 + $0x88] sm:$0xff]  ;;  %v2655_v31 = vld [vmem:[#allocation11 + $0x60] sm:$0xff] }
 0x334   :  { %5046 = vmatpush1.bf16.msra.mxu1 %v5045_v51  ;;  %4920 = vmatprep.subr.bf16.mxu0 %v4919_v52  ;;  %v2787_v51 = vld [vmem:[#allocation11 + $0x180] sm:$0xff]  ;;  %v2788_v52 = vld [vmem:[#allocation11 + $0x188] sm:$0xff]  ;;  %v5063_v57 = vpack.c.bf16 %v2660_v50, %v2659_v49  ;;  %v2610_v4 = vmul.f32 0.01, %v5320_v53  ;;  %vm2594_vm8 = vcmp.gt.f32.partialorder %v5320_v53, 0.0  ;;  %v2650_v49 = vld [vmem:[#allocation11 + $0x38] sm:$0xff] }
 0x335   :  { %5048 = vmatprep.subr.bf16.mxu1 %v5047_v56  ;;  %v5061_v56 = vpack.c.bf16 %v1371_v46, %v1355_v42  ;;  %v5095_v60 = vpack.c.bf16 %v2788_v52, %v2787_v51  ;;  %v5105_v42 = vpack.c.bf16 %v2776_v35, %v2775_v33  ;;  %v2649_v46 = vld [vmem:[#allocation11 + $0x30] sm:$0xff]  ;;  %v2778_v52 = vld [vmem:[#allocation11 + $0x138] sm:$0xff]  ;;  %v2656_v32 = vld [vmem:[#allocation11 + $0x68] sm:$0xff] }
 0x336   :  { %v2626_v19 = vsel %vm2594_vm8, %v5320_v53, %v2610_v4  ;;  %v2777_v50 = vld [vmem:[#allocation11 + $0x130] sm:$0xff]  ;;  %v2667_v53 = vld [vmem:[#allocation11 + $0xc0] sm:$0xff] }
 0x337   :  { %4922 = vmatpush1.bf16.msra.mxu0 %v4921_v63  ;;  %v2772_v63 = vld [vmem:[#allocation11 + $0x108] sm:$0xff]  ;;  %v5109_v58 = vpack.c.bf16 %v2778_v52, %v2777_v50  ;;  %v2669_v4 = vld [vmem:[#allocation11 + $0xd0] sm:$0xff]  ;;  %v2783_v33 = vld [vmem:[#allocation11 + $0x160] sm:$0xff] }
 0x338   :  { %5050 = vmatpush1.bf16.msra.mxu1 %v5049_v1  ;;  %4924 = vmatprep.subr.bf16.mxu0 %v4923_v3  ;;  %v2661_v1 = vld [vmem:[#allocation11 + $0x90] sm:$0xff]  ;;  %v2662_v3 = vld [vmem:[#allocation11 + $0x98] sm:$0xff]  ;;  %v5097_v48 = vpack.c.bf16 %v2772_v63, %v2771_v62  ;;  %v2652_v62 = vld [vmem:[#allocation11 + $0x48] sm:$0xff] }
 0x339   :  { %5052 = vmatprep.subr.bf16.mxu1 %v5051_v7  ;;  %v2612_v7 = vmul.f32 0.01, %v5322_v55  ;;  %v5067_v11 = vpack.c.bf16 %v2662_v3, %v2661_v1  ;;  %v2779_v63 = vld [vmem:[#allocation11 + $0x140] sm:$0xff]  ;;  %v2780_v3 = vld [vmem:[#allocation11 + $0x148] sm:$0xff]  ;;  %v2657_v52 = vld [vmem:[#allocation11 + $0x70] sm:$0xff] }
 0x33b   :  { %4926 = vmatpush1.bf16.msra.mxu0 %v4925_v13  ;;  %v2663_v13 = vld [vmem:[#allocation11 + $0xa0] sm:$0xff]  ;;  %v2628_v21 = vsel %vm2596_vm9, %v5322_v55, %v2612_v7 }
 0x33c   :  { %5054 = vmatpush1.bf16.msra.mxu1 %v5053_v14  ;;  %4928 = vmatprep.subr.bf16.mxu0 %v4927_v15  ;;  %v2664_v14 = vld [vmem:[#allocation11 + $0xa8] sm:$0xff]  ;;  %v5099_v15 = vpack.c.bf16 %v2790_v6, %v2789_v47  ;;  %v2795_v55 = vld [vmem:[#allocation11 + $0x1c0] sm:$0xff]  ;;  %v2797_v47 = vld [vmem:[#allocation11 + $0x1d0] sm:$0xff] }
 0x33d   :  { %5056 = vmatprep.subr.bf16.mxu1 %v5055_v20  ;;  %v5069_v20 = vpack.c.bf16 %v2646_v9, %v2645_v8  ;;  %v5071_v43 = vpack.c.bf16 %v2664_v14, %v2663_v13  ;;  %v2798_v6 = vld [vmem:[#allocation11 + $0x1d8] sm:$0xff]  ;;  %v2653_v9 = vld [vmem:[#allocation11 + $0x50] sm:$0xff]  ;;  %v2671_v14 = vld [vmem:[#allocation11 + $0xe0] sm:$0xff] }
 0x33e   :  { %v5115_v12 = vpack.c.bf16 %v2798_v6, %v2797_v47  ;;  %v2782_v13 = vld [vmem:[#allocation11 + $0x158] sm:$0xff]  ;;  %v2902_v6 = vld [vmem:[#allocation11 + $0x208] sm:$0xff] }
 0x33f   :  { %4930 = vmatpush1.bf16.msra.mxu0 %v4929_v34  ;;  %v5103_v34 = vpack.c.bf16 %v2792_v17, %v2791_v16  ;;  %v2799_v16 = vld [vmem:[#allocation11 + $0x1e0] sm:$0xff]  ;;  %v2800_v17 = vld [vmem:[#allocation11 + $0x1e8] sm:$0xff] }
 0x340   :  { %5058 = vmatpush1.bf16.msra.mxu1 %v5057_v36  ;;  %4932 = vmatprep.subr.bf16.mxu0 %v4931_v38  ;;  %v2665_v36 = vld [vmem:[#allocation11 + $0xb0] sm:$0xff]  ;;  %v2666_v38 = vld [vmem:[#allocation11 + $0xb8] sm:$0xff]  ;;  %v5119_v35 = vpack.c.bf16 %v2800_v17, %v2799_v16 }
 0x341   :  { %5060 = vmatprep.subr.bf16.mxu1 %v5059_v44  ;;  %v5075_v44 = vpack.c.bf16 %v2666_v38, %v2665_v36  ;;  %v2784_v36 = vld [vmem:[#allocation11 + $0x168] sm:$0xff]  ;;  %v2673_v38 = vld [vmem:[#allocation11 + $0xf0] sm:$0xff]  ;;  %v2904_v17 = vld [vmem:[#allocation11 + $0x218] sm:$0xff] }
 0x342   :  { %v5121_v50 = vpack.c.bf16 %v2784_v36, %v2783_v33  ;;  %v2903_v16 = vld [vmem:[#allocation11 + $0x210] sm:$0xff]  ;;  %v2922_v33 = vld [vmem:[#allocation11 + $0x2a8] sm:$0xff]  ;;  %v3051_v36 = vld [vmem:[#allocation11 + $0x3a0] sm:$0xff] }
 0x343   :  { %4934 = vmatpush1.bf16.msra.mxu0 %v4933_v54  ;;  %v2668_v54 = vld [vmem:[#allocation11 + $0xc8] sm:$0xff] }
 0x344   :  { %5062 = vmatpush1.bf16.msra.mxu1 %v5061_v56  ;;  %5064 = vmatprep.subr.bf16.mxu0 %v5063_v57  ;;  %v2796_v56 = vld [vmem:[#allocation11 + $0x1c8] sm:$0xff]  ;;  %v5077_v57 = vpack.c.bf16 %v2650_v49, %v2649_v46  ;;  %v5079_v59 = vpack.c.bf16 %v2668_v54, %v2667_v53  ;;  %v5089_v46 = vpack.c.bf16 %v2656_v32, %v2655_v31  ;;  %v2658_v53 = vld [vmem:[#allocation11 + $0x78] sm:$0xff]  ;;  %v2785_v54 = vld [vmem:[#allocation11 + $0x170] sm:$0xff] }
 0x345   :  { %5096 = vmatprep.subr.bf16.mxu1 %v5095_v60  ;;  %v2651_v60 = vld [vmem:[#allocation11 + $0x40] sm:$0xff]  ;;  %v5111_v1 = vpack.c.bf16 %v2796_v56, %v2795_v55  ;;  %v3034_v31 = vld [vmem:[#allocation11 + $0x318] sm:$0xff] }
 0x346   :  { %2445 = vmatmul.mubr.f32.vlgmr.msra.gmra.mrb[8].mxu0 %v5846_v37  ;;  %v5081_v7 = vpack.c.bf16 %v2652_v62, %v2651_v60  ;;  %v3047_v62 = vld [vmem:[#allocation11 + $0x380] sm:$0xff] }
 0x347   :  { %2587 = vmatmul.mubr.f32.vlgmr.msra.gmra.mrb[8].mxu1 %v5846_v37  ;;  %5066 = vmatpush3.bf16.msra.mxu0 %v5065_v5  ;;  %v2793_v37 = vld [vmem:[#allocation11 + $0x1b0] sm:$0xff]  ;;  %v2670_v5 = vld [vmem:[#allocation11 + $0xd8] sm:$0xff]  ;;  %v2921_v32 = vld [vmem:[#allocation11 + $0x2a0] sm:$0xff] }
 0x348   :  { %2746 = vmatprep.mubr.f32.mxu0 %v2626_v19  ;;  %5098 = vmatpush3.bf16.msra.mxu1 %v5097_v48  ;;  %v5107_v51 = vpack.c.bf16 %v2794_v41, %v2793_v37  ;;  %v5113_v48 = vpack.c.bf16 %v2780_v3, %v2779_v63  ;;  %v5083_v8 = vpack.c.bf16 %v2670_v5, %v2669_v4  ;;  %v1399_v19 = vsub.s32 5, %v5806_v25  ;;  %v2674_v37 = vld [vmem:[#allocation11 + $0xf8] sm:$0xff]  ;;  %v3048_v63 = vld [vmem:[#allocation11 + $0x388] sm:$0xff] }
 0x349   :  { %2875 = vmatprep.mubr.f32.mxu1 %v2628_v21  ;;  %5068 = vmatprep.subr.bf16.mxu0 %v5067_v11  ;;  %v2781_v11 = vld [vmem:[#allocation11 + $0x150] sm:$0xff]  ;;  %v1407_v21 = vsub.s32 7, %v5806_v25  ;;  %v1388_v41 = vrot.slane %v5888_v27, %v5841_v45  ;;  %v5093_v3 = vpack.c.bf16 %v2658_v53, %v2657_v52  ;;  %v3036_v52 = vld [vmem:[#allocation11 + $0x328] sm:$0xff] }
 0x34a   :  { %5100 = vmatprep.subr.bf16.mxu1 %v5099_v15  ;;  %v2672_v15 = vld [vmem:[#allocation11 + $0xe8] sm:$0xff]  ;;  %v2923_v53 = vld [vmem:[#allocation11 + $0x2b0] sm:$0xff] }
 0x34b   :  { %5070 = vmatpush3.bf16.msra.mxu0 %v5069_v20  ;;  %v5085_v20 = vpack.c.bf16 %v2654_v10, %v2653_v9  ;;  %v1408_v49 = vrot.slane %v5888_v27, %v1407_v21  ;;  %v5321_v60 = vadd.f32 %v5866_v40, %v1388_v41  ;;  %v3032_v9 = vld [vmem:[#allocation11 + $0x308] sm:$0xff]  ;;  %v2919_v10 = vld [vmem:[#allocation11 + $0x290] sm:$0xff]  ;;  %v5133_v41 = vpack.c.bf16 %v2904_v17, %v2903_v16 }
 0x34c   :  { %5102 = vmatpush3.bf16.msra.mxu1 %v5101_v22  ;;  %5072 = vmatprep.subr.bf16.mxu0 %v5071_v43  ;;  %v5117_v22 = vpack.c.bf16 %v2782_v13, %v2781_v11  ;;  %v5087_v43 = vpack.c.bf16 %v2672_v15, %v2671_v14  ;;  %v2920_v11 = vld [vmem:[#allocation11 + $0x298] sm:$0xff]  ;;  %v2911_v17 = vld [vmem:[#allocation11 + $0x250] sm:$0xff] }
 0x34d   :  { %5104 = vmatprep.subr.bf16.mxu1 %v5103_v34  ;;  %v1380_v34 = vrot.slane %v5888_v27, %v5809_v26  ;;  %v5326_v4 = vadd.f32 %v5886_v61, %v1408_v49  ;;  %v2611_v40 = vmul.f32 0.01, %v5321_v60  ;;  %vm2595_vm11 = vcmp.gt.f32.partialorder %v5321_v60, 0.0  ;;  %v3049_v61 = vld [vmem:[#allocation11 + $0x390] sm:$0xff]  ;;  %v3050_v13 = vld [vmem:[#allocation11 + $0x398] sm:$0xff]  ;;  %v2906_v49 = vld [vmem:[#allocation11 + $0x228] sm:$0xff] }
 0x34f   :  { %5074 = vmatpush3.bf16.msra.mxu0 %v5073_v2  ;;  %v2801_v2 = vld [vmem:[#allocation11 + $0x1f0] sm:$0xff]  ;;  %v5319_v55 = vadd.f32 %v5864_v39, %v1380_v34  ;;  %v2901_v39 = vld [vmem:[#allocation11 + $0x200] sm:$0xff]  ;;  %v2616_v14 = vmul.f32 0.01, %v5326_v4  ;;  %vm2600_vm13 = vcmp.gt.f32.partialorder %v5326_v4, 0.0  ;;  %v2627_v34 = vsel %vm2595_vm11, %v5321_v60, %v2611_v40 }
 0x350   :  { %5106 = vmatpush3.bf16.msra.mxu1 %v5105_v42  ;;  %5076 = vmatprep.subr.bf16.mxu0 %v5075_v44  ;;  %v2802_v42 = vld [vmem:[#allocation11 + $0x1f8] sm:$0xff]  ;;  %v1400_v44 = vrot.slane %v5888_v27, %v1399_v19  ;;  %v2907_v60 = vld [vmem:[#allocation11 + $0x230] sm:$0xff]  ;;  %v3039_v40 = vld [vmem:[#allocation11 + $0x340] sm:$0xff] }
 0x351   :  { %5108 = vmatprep.subr.bf16.mxu1 %v5107_v51  ;;  %v5091_v51 = vpack.c.bf16 %v2674_v37, %v2673_v38  ;;  %v5123_v56 = vpack.c.bf16 %v2802_v42, %v2801_v2  ;;  %vm2593_vm10 = vcmp.gt.f32.partialorder %v5319_v55, 0.0  ;;  %v3052_v38 = vld [vmem:[#allocation11 + $0x3a8] sm:$0xff]  ;;  %v2632_v2 = vsel %vm2600_vm13, %v5326_v4, %v2616_v14  ;;  %v2925_v4 = vld [vmem:[#allocation11 + $0x2c0] sm:$0xff] }
 0x353   :  { %5078 = vmatpush3.bf16.msra.mxu0 %v5077_v57  ;;  %v2786_v57 = vld [vmem:[#allocation11 + $0x178] sm:$0xff] }
 0x354   :  { %5110 = vmatpush3.bf16.msra.mxu1 %v5109_v58  ;;  %5080 = vmatprep.subr.bf16.mxu0 %v5079_v59  ;;  %v2917_v58 = vld [vmem:[#allocation11 + $0x280] sm:$0xff]  ;;  %v2918_v59 = vld [vmem:[#allocation11 + $0x288] sm:$0xff]  ;;  %v5125_v5 = vpack.c.bf16 %v2786_v57, %v2785_v54  ;;  %v2924_v54 = vld [vmem:[#allocation11 + $0x2b8] sm:$0xff] }
 0x355   :  { %5112 = vmatprep.subr.bf16.mxu1 %v5111_v1  ;;  %v5324_v1 = vadd.f32 %v5884_v30, %v1400_v44  ;;  %v5127_v47 = vpack.c.bf16 %v2918_v59, %v2917_v58  ;;  %v5135_v44 = vpack.c.bf16 %v2922_v33, %v2921_v32  ;;  %v5139_v59 = vpack.c.bf16 %v2924_v54, %v2923_v53  ;;  %v3042_v32 = vld [vmem:[#allocation11 + $0x358] sm:$0xff]  ;;  %v2929_v33 = vld [vmem:[#allocation11 + $0x2e0] sm:$0xff] }
 0x356   :  { %v2932_v53 = vld [vmem:[#allocation11 + $0x2f8] sm:$0xff] }
 0x357   :  { %5082 = vmatpush3.bf16.msra.mxu0 %v5081_v7  ;;  %v2609_v7 = vmul.f32 0.01, %v5319_v55  ;;  %v2614_v30 = vmul.f32 0.01, %v5324_v1  ;;  %vm2598_vm12 = vcmp.gt.f32.partialorder %v5324_v1, 0.0 }
 0x358   :  { %5114 = vmatpush3.bf16.msra.mxu1 %v5113_v48  ;;  %5084 = vmatprep.subr.bf16.mxu0 %v5083_v8  ;;  %v5159_v48 = vpack.c.bf16 %v3048_v63, %v3047_v62  ;;  %v3031_v8 = vld [vmem:[#allocation11 + $0x300] sm:$0xff]  ;;  %v2908_v62 = vld [vmem:[#allocation11 + $0x238] sm:$0xff]  ;;  %v3037_v63 = vld [vmem:[#allocation11 + $0x330] sm:$0xff] }
 0x359   :  { %5116 = vmatprep.subr.bf16.mxu1 %v5115_v12  ;;  %v5129_v12 = vpack.c.bf16 %v2902_v6, %v2901_v39  ;;  %v5161_v15 = vpack.c.bf16 %v3032_v9, %v3031_v8  ;;  %v2630_v37 = vsel %vm2598_vm12, %v5324_v1, %v2614_v30  ;;  %v3056_v39 = vld [vmem:[#allocation11 + $0x3c8] sm:$0xff]  ;;  %v5141_v6 = vpack.c.bf16 %v2908_v62, %v2907_v60  ;;  %v2909_v8 = vld [vmem:[#allocation11 + $0x240] sm:$0xff]  ;;  %v2927_v30 = vld [vmem:[#allocation11 + $0x2d0] sm:$0xff] }
 0x35a   :  { %v2910_v9 = vld [vmem:[#allocation11 + $0x248] sm:$0xff]  ;;  %v2915_v60 = vld [vmem:[#allocation11 + $0x270] sm:$0xff]  ;;  %v2916_v62 = vld [vmem:[#allocation11 + $0x278] sm:$0xff] }
 0x35b   :  { %5086 = vmatpush3.bf16.msra.mxu0 %v5085_v20  ;;  %v3033_v20 = vld [vmem:[#allocation11 + $0x310] sm:$0xff]  ;;  %v5145_v14 = vpack.c.bf16 %v2910_v9, %v2909_v8  ;;  %v3161_v9 = vld [vmem:[#allocation11 + $0x400] sm:$0xff] }
 0x35c   :  { %5118 = vmatpush3.bf16.msra.mxu1 %v5117_v22  ;;  %5088 = vmatprep.subr.bf16.mxu0 %v5087_v43  ;;  %v2625_v22 = vsel %vm2593_vm10, %v5319_v55, %v2609_v7  ;;  %v5131_v43 = vpack.c.bf16 %v2920_v11, %v2919_v10  ;;  %v5165_v42 = vpack.c.bf16 %v3034_v31, %v3033_v20  ;;  %v3053_v55 = vld [vmem:[#allocation11 + $0x3b0] sm:$0xff]  ;;  %v3040_v11 = vld [vmem:[#allocation11 + $0x348] sm:$0xff]  ;;  %v2912_v20 = vld [vmem:[#allocation11 + $0x258] sm:$0xff] }
 0x35d   :  { %5120 = vmatprep.subr.bf16.mxu1 %v5119_v35  ;;  %v5163_v35 = vpack.c.bf16 %v3050_v13, %v3049_v61  ;;  %v3057_v61 = vld [vmem:[#allocation11 + $0x3d0] sm:$0xff]  ;;  %v3058_v13 = vld [vmem:[#allocation11 + $0x3d8] sm:$0xff] }
 0x35e   :  { %v5179_v31 = vpack.c.bf16 %v3058_v13, %v3057_v61  ;;  %v3180_v61 = vld [vmem:[#allocation11 + $0x498] sm:$0xff] }
 0x35f   :  { %5090 = vmatpush3.bf16.msra.mxu0 %v5089_v46  ;;  %v2905_v46 = vld [vmem:[#allocation11 + $0x220] sm:$0xff] }
 0x360   :  { %5122 = vmatpush3.bf16.msra.mxu1 %v5121_v50  ;;  %5092 = vmatprep.subr.bf16.mxu0 %v5091_v51  ;;  %v3035_v50 = vld [vmem:[#allocation11 + $0x320] sm:$0xff]  ;;  %v5167_v51 = vpack.c.bf16 %v3052_v38, %v3051_v36  ;;  %v5137_v57 = vpack.c.bf16 %v2906_v49, %v2905_v46  ;;  %v3060_v38 = vld [vmem:[#allocation11 + $0x3e8] sm:$0xff] }
 0x361   :  { %5124 = vmatprep.subr.bf16.mxu1 %v5123_v56  ;;  %v3054_v56 = vld [vmem:[#allocation11 + $0x3b8] sm:$0xff]  ;;  %v5169_v58 = vpack.c.bf16 %v3036_v52, %v3035_v50  ;;  %v3059_v36 = vld [vmem:[#allocation11 + $0x3e0] sm:$0xff]  ;;  %v2931_v52 = vld [vmem:[#allocation11 + $0x2f0] sm:$0xff] }
 0x362   :  { %v5171_v1 = vpack.c.bf16 %v3054_v56, %v3053_v55  ;;  %v3043_v46 = vld [vmem:[#allocation11 + $0x360] sm:$0xff]  ;;  %v5183_v50 = vpack.c.bf16 %v3060_v38, %v3059_v36  ;;  %v3061_v55 = vld [vmem:[#allocation11 + $0x3f0] sm:$0xff]  ;;  %v3062_v56 = vld [vmem:[#allocation11 + $0x3f8] sm:$0xff] }
 0x363   :  { %5094 = vmatpush3.bf16.msra.mxu0 %v5093_v3  ;;  %v3038_v3 = vld [vmem:[#allocation11 + $0x338] sm:$0xff]  ;;  %v3181_v36 = vld [vmem:[#allocation11 + $0x4a0] sm:$0xff]  ;;  %v3182_v38 = vld [vmem:[#allocation11 + $0x4a8] sm:$0xff] }
 0x364   :  { %5126 = vmatpush3.bf16.msra.mxu1 %v5125_v5  ;;  %5128 = vmatprep.subr.bf16.mxu0 %v5127_v47  ;;  %v2926_v5 = vld [vmem:[#allocation11 + $0x2c8] sm:$0xff]  ;;  %v3055_v47 = vld [vmem:[#allocation11 + $0x3c0] sm:$0xff]  ;;  %v5173_v7 = vpack.c.bf16 %v3038_v3, %v3037_v63  ;;  %v3045_v63 = vld [vmem:[#allocation11 + $0x370] sm:$0xff]  ;;  %v5187_v3 = vpack.c.bf16 %v3062_v56, %v3061_v55 }
 0x365   :  { %5160 = vmatprep.subr.bf16.mxu1 %v5159_v48  ;;  %v5143_v48 = vpack.c.bf16 %v2926_v5, %v2925_v4  ;;  %v5175_v10 = vpack.c.bf16 %v3056_v39, %v3055_v47  ;;  %v3046_v4 = vld [vmem:[#allocation11 + $0x378] sm:$0xff]  ;;  %v3177_v5 = vld [vmem:[#allocation11 + $0x480] sm:$0xff]  ;;  %v3178_v47 = vld [vmem:[#allocation11 + $0x488] sm:$0xff] }
 0x366   :  { %2747 = vmatmul.mubr.f32.vlgmr.msra.gmra.mrb[10].mxu0 %v2625_v22  ;;  %v3041_v22 = vld [vmem:[#allocation11 + $0x350] sm:$0xff]  ;;  %v3307_v39 = vld [vmem:[#allocation11 + $0x580] sm:$0xff]  ;;  %v5191_v8 = vpack.c.bf16 %v3178_v47, %v3177_v5  ;;  %v3184_v55 = vld [vmem:[#allocation11 + $0x4b8] sm:$0xff] }
 0x367   :  { %2876 = vmatmul.mubr.f32.vlgmr.msra.gmra.mrb[10].mxu1 %v2627_v34  ;;  %5130 = vmatpush3.bf16.msra.mxu0 %v5129_v12  ;;  %v2928_v12 = vld [vmem:[#allocation11 + $0x2d8] sm:$0xff]  ;;  %v2930_v34 = vld [vmem:[#allocation11 + $0x2e8] sm:$0xff]  ;;  %v3313_v56 = vld [vmem:[#allocation11 + $0x5b0] sm:$0xff] }
 0x368   :  { %3005 = vmatprep.mubr.f32.mxu0 %v2630_v37  ;;  %5162 = vmatpush3.bf16.msra.mxu1 %v5161_v15  ;;  %v5177_v15 = vpack.c.bf16 %v3040_v11, %v3039_v40  ;;  %v5147_v16 = vpack.c.bf16 %v2928_v12, %v2927_v30  ;;  %v5149_v37 = vpack.c.bf16 %v2912_v20, %v2911_v17  ;;  %v3162_v40 = vld [vmem:[#allocation11 + $0x408] sm:$0xff]  ;;  %v3179_v12 = vld [vmem:[#allocation11 + $0x490] sm:$0xff]  ;;  %v3185_v5 = vld [vmem:[#allocation11 + $0x4c0] sm:$0xff] }
 0x369   :  { %3135 = vmatprep.mubr.f32.mxu1 %v2632_v2  ;;  %5132 = vmatprep.subr.bf16.mxu0 %v5131_v43  ;;  %v1395_v43 = vsub.s32 4, %v5806_v25  ;;  %v5151_v2 = vpack.c.bf16 %v2930_v34, %v2929_v33  ;;  %v3292_v30 = vld [vmem:[#allocation11 + $0x508] sm:$0xff]  ;;  %v5195_v17 = vpack.c.bf16 %v3180_v61, %v3179_v12  ;;  %v3163_v20 = vld [vmem:[#allocation11 + $0x410] sm:$0xff]  ;;  %v3294_v34 = vld [vmem:[#allocation11 + $0x518] sm:$0xff] }
 0x36a   :  { %5164 = vmatprep.subr.bf16.mxu1 %v5163_v35  ;;  %v1403_v35 = vsub.s32 6, %v5806_v25  ;;  %v3186_v47 = vld [vmem:[#allocation11 + $0x4c8] sm:$0xff]  ;;  %v3317_v12 = vld [vmem:[#allocation11 + $0x5d0] sm:$0xff]  ;;  %v3318_v61 = vld [vmem:[#allocation11 + $0x5d8] sm:$0xff] }
 0x36b   :  { %5134 = vmatpush3.bf16.msra.mxu0 %v5133_v41  ;;  %v5181_v41 = vpack.c.bf16 %v3042_v32, %v3041_v22  ;;  %v1396_v49 = vrot.slane %v5888_v27, %v1395_v43  ;;  %v3164_v22 = vld [vmem:[#allocation11 + $0x418] sm:$0xff] }
 0x36c   :  { %5166 = vmatpush3.bf16.msra.mxu1 %v5165_v42  ;;  %5136 = vmatprep.subr.bf16.mxu0 %v5135_v44  ;;  %v2913_v42 = vld [vmem:[#allocation11 + $0x260] sm:$0xff]  ;;  %v2914_v44 = vld [vmem:[#allocation11 + $0x268] sm:$0xff]  ;;  %v1404_v54 = vrot.slane %v5888_v27, %v1403_v35 }
 0x36d   :  { %5168 = vmatprep.subr.bf16.mxu1 %v5167_v51  ;;  %v3044_v51 = vld [vmem:[#allocation11 + $0x368] sm:$0xff] }
 0x36e   :  { %v5325_v27 = vadd.f32 %v5882_v23, %v1404_v54  ;;  %v3309_v23 = vld [vmem:[#allocation11 + $0x590] sm:$0xff] }
 0x36f   :  { %5138 = vmatpush3.bf16.msra.mxu0 %v5137_v57  ;;  %v5153_v57 = vpack.c.bf16 %v2914_v44, %v2913_v42  ;;  %v5197_v42 = vpack.c.bf16 %v3164_v22, %v3163_v20  ;;  %v3183_v54 = vld [vmem:[#allocation11 + $0x4b0] sm:$0xff]  ;;  %v5243_v22 = vpack.c.bf16 %v3318_v61, %v3317_v12  ;;  %v3421_v61 = vld [vmem:[#allocation11 + $0x600] sm:$0xff] }
 0x370   :  { %5170 = vmatpush3.bf16.msra.mxu1 %v5169_v58  ;;  %5140 = vmatprep.subr.bf16.mxu0 %v5139_v59  ;;  %v5185_v58 = vpack.c.bf16 %v3044_v51, %v3043_v46  ;;  %v5155_v59 = vpack.c.bf16 %v2932_v53, %v2931_v52  ;;  %v2615_v13 = vmul.f32 0.01, %v5325_v27  ;;  %vm2599_vm15 = vcmp.gt.f32.partialorder %v5325_v27, 0.0  ;;  %v3295_v51 = vld [vmem:[#allocation11 + $0x520] sm:$0xff]  ;;  %v3296_v53 = vld [vmem:[#allocation11 + $0x528] sm:$0xff]  ;;  %v3301_v20 = vld [vmem:[#allocation11 + $0x550] sm:$0xff] }
 0x371   :  { %5172 = vmatprep.subr.bf16.mxu1 %v5171_v1  ;;  %v5323_v1 = vadd.f32 %v5880_v18, %v1396_v49  ;;  %v5199_v46 = vpack.c.bf16 %v3182_v38, %v3181_v36  ;;  %v3165_v49 = vld [vmem:[#allocation11 + $0x420] sm:$0xff]  ;;  %v3320_v36 = vld [vmem:[#allocation11 + $0x5e8] sm:$0xff] }
 0x373   :  { %5142 = vmatpush3.bf16.msra.mxu0 %v5141_v6  ;;  %v3308_v6 = vld [vmem:[#allocation11 + $0x588] sm:$0xff]  ;;  %v2613_v11 = vmul.f32 0.01, %v5323_v1  ;;  %vm2597_vm14 = vcmp.gt.f32.partialorder %v5323_v1, 0.0 }
 0x374   :  { %5174 = vmatpush3.bf16.msra.mxu1 %v5173_v7  ;;  %5144 = vmatprep.subr.bf16.mxu0 %v5143_v48  ;;  %v5157_v7 = vpack.c.bf16 %v2916_v62, %v2915_v60  ;;  %v5189_v48 = vpack.c.bf16 %v3046_v4, %v3045_v63  ;;  %v5223_v18 = vpack.c.bf16 %v3308_v6, %v3307_v39  ;;  %v3167_v62 = vld [vmem:[#allocation11 + $0x430] sm:$0xff]  ;;  %v3168_v63 = vld [vmem:[#allocation11 + $0x438] sm:$0xff]  ;;  %v3316_v39 = vld [vmem:[#allocation11 + $0x5c8] sm:$0xff] }
 0x375   :  { %5176 = vmatprep.subr.bf16.mxu1 %v5175_v10  ;;  %v3291_v10 = vld [vmem:[#allocation11 + $0x500] sm:$0xff]  ;;  %v2629_v32 = vsel %vm2597_vm14, %v5323_v1, %v2613_v11  ;;  %v5203_v60 = vpack.c.bf16 %v3184_v55, %v3183_v54  ;;  %v3297_v1 = vld [vmem:[#allocation11 + $0x530] sm:$0xff]  ;;  %v3298_v4 = vld [vmem:[#allocation11 + $0x538] sm:$0xff]  ;;  %v5205_v6 = vpack.c.bf16 %v3168_v63, %v3167_v62 }
 0x376   :  { %v3300_v11 = vld [vmem:[#allocation11 + $0x548] sm:$0xff]  ;;  %v3322_v62 = vld [vmem:[#allocation11 + $0x5f8] sm:$0xff] }
 0x377   :  { %5146 = vmatpush3.bf16.msra.mxu0 %v5145_v14  ;;  %v3310_v14 = vld [vmem:[#allocation11 + $0x598] sm:$0xff] }
 0x378   :  { %5178 = vmatpush3.bf16.msra.mxu1 %v5177_v15  ;;  %5148 = vmatprep.subr.bf16.mxu0 %v5147_v16  ;;  %v5193_v15 = vpack.c.bf16 %v3162_v40, %v3161_v9  ;;  %v5225_v16 = vpack.c.bf16 %v3292_v30, %v3291_v10  ;;  %v5227_v33 = vpack.c.bf16 %v3310_v14, %v3309_v23  ;;  %v3170_v9 = vld [vmem:[#allocation11 + $0x448] sm:$0xff]  ;;  %v3299_v40 = vld [vmem:[#allocation11 + $0x540] sm:$0xff]  ;;  %v3188_v30 = vld [vmem:[#allocation11 + $0x4d8] sm:$0xff] }
 0x379   :  { %5180 = vmatprep.subr.bf16.mxu1 %v5179_v31  ;;  %v3293_v31 = vld [vmem:[#allocation11 + $0x510] sm:$0xff]  ;;  %v5930_v23 = vld [vmem:[#allocation10 + $0x8] sm:$0xff]  ;;  %v5241_v14 = vpack.c.bf16 %v3300_v11, %v3299_v40  ;;  %v3568_v40 = vld [vmem:[#allocation11 + $0x788] sm:$0xff] }
 0x37a   :  { %v5229_v44 = vpack.c.bf16 %v3294_v34, %v3293_v31  ;;  %v3302_v31 = vld [vmem:[#allocation11 + $0x558] sm:$0xff]  ;;  %v3319_v34 = vld [vmem:[#allocation11 + $0x5e0] sm:$0xff]  ;;  %v1416_v38 = vrot.slane %v5930_v23, %v5814_v28  ;;  %v1420_v28 = vrot.slane %v5930_v23, %v5841_v45 }
 0x37b   :  { %5150 = vmatpush3.bf16.msra.mxu0 %v5149_v37  ;;  %v2631_v37 = vsel %vm2599_vm15, %v5325_v27, %v2615_v13  ;;  %v3315_v27 = vld [vmem:[#allocation11 + $0x5c0] sm:$0xff] }
 0x37c   :  { %5182 = vmatpush3.bf16.msra.mxu1 %v5181_v41  ;;  %5152 = vmatprep.subr.bf16.mxu0 %v5151_v2  ;;  %v3311_v41 = vld [vmem:[#allocation11 + $0x5a0] sm:$0xff]  ;;  %v3312_v2 = vld [vmem:[#allocation11 + $0x5a8] sm:$0xff]  ;;  %v5239_v10 = vpack.c.bf16 %v3316_v39, %v3315_v27  ;;  %v3306_v27 = vld [vmem:[#allocation11 + $0x578] sm:$0xff] }
 0x37d   :  { %5184 = vmatprep.subr.bf16.mxu1 %v5183_v50  ;;  %v3166_v50 = vld [vmem:[#allocation11 + $0x428] sm:$0xff]  ;;  %v5231_v52 = vpack.c.bf16 %v3312_v2, %v3311_v41  ;;  %v1424_v41 = vrot.slane %v5930_v23, %v5817_v29  ;;  %v5245_v2 = vpack.c.bf16 %v3302_v31, %v3301_v20  ;;  %v3192_v29 = vld [vmem:[#allocation11 + $0x4f8] sm:$0xff]  ;;  %v3437_v39 = vld [vmem:[#allocation11 + $0x680] sm:$0xff] }
 0x37e   :  { %v3439_v20 = vld [vmem:[#allocation11 + $0x690] sm:$0xff] }
 0x37f   :  { %5154 = vmatpush3.bf16.msra.mxu0 %v5153_v57  ;;  %v3314_v57 = vld [vmem:[#allocation11 + $0x5b8] sm:$0xff] }
 0x380   :  { %5186 = vmatpush3.bf16.msra.mxu1 %v5185_v58  ;;  %5156 = vmatprep.subr.bf16.mxu0 %v5155_v59  ;;  %v5201_v58 = vpack.c.bf16 %v3166_v50, %v3165_v49  ;;  %v5233_v59 = vpack.c.bf16 %v3296_v53, %v3295_v51  ;;  %v1412_v49 = vrot.slane %v5930_v23, %v5809_v26  ;;  %v3304_v53 = vld [vmem:[#allocation11 + $0x568] sm:$0xff] }
 0x381   :  { %5188 = vmatprep.subr.bf16.mxu1 %v5187_v3  ;;  %v5235_v3 = vpack.c.bf16 %v3314_v57, %v3313_v56  ;;  %v5247_v51 = vpack.c.bf16 %v3320_v36, %v3319_v34  ;;  %v3191_v56 = vld [vmem:[#allocation11 + $0x4f0] sm:$0xff] }
 0x382   :  { %v5219_v45 = vpack.c.bf16 %v3192_v29, %v3191_v56  ;;  %v3425_v56 = vld [vmem:[#allocation11 + $0x620] sm:$0xff]  ;;  %v3426_v29 = vld [vmem:[#allocation11 + $0x628] sm:$0xff] }
 0x383   :  { %5158 = vmatpush3.bf16.msra.mxu0 %v5157_v7  ;;  %v5237_v7 = vpack.c.bf16 %v3298_v4, %v3297_v1  ;;  %v3175_v1 = vld [vmem:[#allocation11 + $0x470] sm:$0xff] }
 0x384   :  { %5190 = vmatpush3.bf16.msra.mxu1 %v5189_v48  ;;  %5192 = vmatprep.subr.bf16.mxu0 %v5191_v8  ;;  %v5207_v48 = vpack.c.bf16 %v3186_v47, %v3185_v5  ;;  %v3169_v8 = vld [vmem:[#allocation11 + $0x440] sm:$0xff]  ;;  %v3305_v4 = vld [vmem:[#allocation11 + $0x570] sm:$0xff] }
 0x385   :  { %5224 = vmatprep.subr.bf16.mxu1 %v5223_v18  ;;  %v3187_v18 = vld [vmem:[#allocation11 + $0x4d0] sm:$0xff]  ;;  %v5209_v13 = vpack.c.bf16 %v3170_v9, %v3169_v8  ;;  %v3567_v9 = vld [vmem:[#allocation11 + $0x780] sm:$0xff] }
 0x386   :  { %3006 = vmatmul.mubr.f32.vlgmr.msra.gmra.mrb[12].mxu0 %v2629_v32  ;;  %v3189_v32 = vld [vmem:[#allocation11 + $0x4e0] sm:$0xff] }
 0x387   :  { %3136 = vmatmul.mubr.f32.vlgmr.msra.gmra.mrb[12].mxu1 %v2631_v37  ;;  %5194 = vmatpush3.bf16.msra.mxu0 %v5193_v15  ;;  %v5211_v15 = vpack.c.bf16 %v3188_v30, %v3187_v18  ;;  %v5253_v30 = vpack.c.bf16 %v3306_v27, %v3305_v4 }
 0x388   :  { %5226 = vmatpush3.bf16.msra.mxu1 %v5225_v16  ;;  %5196 = vmatprep.subr.bf16.mxu0 %v5195_v17  ;;  %v3171_v16 = vld [vmem:[#allocation11 + $0x450] sm:$0xff]  ;;  %v3172_v17 = vld [vmem:[#allocation11 + $0x458] sm:$0xff] }
 0x389   :  { %5228 = vmatprep.subr.bf16.mxu1 %v5227_v33  ;;  %v3190_v33 = vld [vmem:[#allocation11 + $0x4e8] sm:$0xff]  ;;  %v5213_v37 = vpack.c.bf16 %v3172_v17, %v3171_v16  ;;  %v5287_v16 = vpack.c.bf16 %v3568_v40, %v3567_v9 }
 0x38a   :  { %v3552_v17 = vld [vmem:[#allocation11 + $0x708] sm:$0xff] }
 0x38b   :  { %5198 = vmatpush3.bf16.msra.mxu0 %v5197_v42  ;;  %v5215_v42 = vpack.c.bf16 %v3190_v33, %v3189_v32  ;;  %v3569_v32 = vld [vmem:[#allocation11 + $0x790] sm:$0xff]  ;;  %v3570_v33 = vld [vmem:[#allocation11 + $0x798] sm:$0xff] }
 0x38c   :  { %5230 = vmatpush3.bf16.msra.mxu1 %v5229_v44  ;;  %5200 = vmatprep.subr.bf16.mxu0 %v5199_v46  ;;  %v3173_v44 = vld [vmem:[#allocation11 + $0x460] sm:$0xff]  ;;  %v3174_v46 = vld [vmem:[#allocation11 + $0x468] sm:$0xff] }
 0x38d   :  { %5232 = vmatprep.subr.bf16.mxu1 %v5231_v52  ;;  %v3303_v52 = vld [vmem:[#allocation11 + $0x560] sm:$0xff] }
 0x38e   :  { %v5249_v26 = vpack.c.bf16 %v3304_v53, %v3303_v52  ;;  %v3571_v52 = vld [vmem:[#allocation11 + $0x7a0] sm:$0xff]  ;;  %v3572_v53 = vld [vmem:[#allocation11 + $0x7a8] sm:$0xff] }
 0x38f   :  { %5202 = vmatpush3.bf16.msra.mxu0 %v5201_v58 }
 0x390   :  { %5234 = vmatpush3.bf16.msra.mxu1 %v5233_v59  ;;  %5204 = vmatprep.subr.bf16.mxu0 %v5203_v60  ;;  %v5217_v59 = vpack.c.bf16 %v3174_v46, %v3173_v44  ;;  %v3321_v60 = vld [vmem:[#allocation11 + $0x5f0] sm:$0xff]  ;;  %v5291_v44 = vpack.c.bf16 %v3570_v33, %v3569_v32  ;;  %v3554_v46 = vld [vmem:[#allocation11 + $0x718] sm:$0xff] }
 0x391   :  { %5236 = vmatprep.subr.bf16.mxu1 %v5235_v3  ;;  %v3176_v3 = vld [vmem:[#allocation11 + $0x478] sm:$0xff]  ;;  %v5251_v8 = vpack.c.bf16 %v3322_v62, %v3321_v60  ;;  %v3443_v60 = vld [vmem:[#allocation11 + $0x6b0] sm:$0xff] }
 0x392   :  { %v5221_v11 = vpack.c.bf16 %v3176_v3, %v3175_v1  ;;  %v3444_v62 = vld [vmem:[#allocation11 + $0x6b8] sm:$0xff]  ;;  %v5265_v1 = vpack.c.bf16 %v3426_v29, %v3425_v56  ;;  %v3561_v33 = vld [vmem:[#allocation11 + $0x750] sm:$0xff] }
 0x393   :  { %5206 = vmatpush3.bf16.msra.mxu0 %v5205_v6  ;;  %v3438_v6 = vld [vmem:[#allocation11 + $0x688] sm:$0xff]  ;;  %v5267_v4 = vpack.c.bf16 %v3444_v62, %v3443_v60  ;;  %v3432_v32 = vld [vmem:[#allocation11 + $0x658] sm:$0xff] }
 0x394   :  { %5238 = vmatpush3.bf16.msra.mxu1 %v5237_v7  ;;  %5208 = vmatprep.subr.bf16.mxu0 %v5207_v48  ;;  %v5255_v12 = vpack.c.bf16 %v3438_v6, %v3437_v39  ;;  %v3558_v39 = vld [vmem:[#allocation11 + $0x738] sm:$0xff]  ;;  %v3445_v6 = vld [vmem:[#allocation11 + $0x6c0] sm:$0xff] }
 0x395   :  { %5240 = vmatprep.subr.bf16.mxu1 %v5239_v10  ;;  %v3582_v56 = vld [vmem:[#allocation11 + $0x7f8] sm:$0xff] }
 0x396   :  { %v3436_v60 = vld [vmem:[#allocation11 + $0x678] sm:$0xff] }
 0x397   :  { %5210 = vmatpush3.bf16.msra.mxu0 %v5209_v13  ;;  %v3422_v13 = vld [vmem:[#allocation11 + $0x608] sm:$0xff] }
 0x398   :  { %5242 = vmatpush3.bf16.msra.mxu1 %v5241_v14  ;;  %5212 = vmatprep.subr.bf16.mxu0 %v5211_v15  ;;  %v3551_v14 = vld [vmem:[#allocation11 + $0x700] sm:$0xff]  ;;  %v5257_v34 = vpack.c.bf16 %v3422_v13, %v3421_v61  ;;  %v3560_v61 = vld [vmem:[#allocation11 + $0x748] sm:$0xff]  ;;  %v3447_v13 = vld [vmem:[#allocation11 + $0x6d0] sm:$0xff] }
 0x399   :  { %v2162_v50 = vpop.f32.mrb[6].mxu0  ;;  %5244 = vmatprep.subr.bf16.mxu1 %v5243_v22  ;;  %v3440_v22 = vld [vmem:[#allocation11 + $0x698] sm:$0xff]  ;;  %v5289_v36 = vpack.c.bf16 %v3552_v17, %v3551_v14 }
 0x39a   :  { %v2304_v54 = vpop.f32.mrb[6].mxu1  ;;  %v2164_v55 = vpop.f32.mrb[7].mxu0  ;;  %v5327_v5 = vadd.f32 %v2162_v50, %v1412_v49  ;;  %v3441_v49 = vld [vmem:[#allocation11 + $0x6a0] sm:$0xff]  ;;  %v3442_v50 = vld [vmem:[#allocation11 + $0x6a8] sm:$0xff]  ;;  %v3448_v14 = vld [vmem:[#allocation11 + $0x6d8] sm:$0xff] }
 0x39b   :  { %v5328_v57 = vadd.f32 %v2164_v55, %v1416_v38  ;;  %v2306_v58 = vpop.f32.mrb[7].mxu1  ;;  %5214 = vmatpush3.bf16.msra.mxu0 %v5213_v37  ;;  %v5329_v7 = vadd.f32 %v2304_v54, %v1420_v28  ;;  %v5259_v38 = vpack.c.bf16 %v3440_v22, %v3439_v20  ;;  %v3423_v37 = vld [vmem:[#allocation11 + $0x610] sm:$0xff]  ;;  %v5263_v55 = vpack.c.bf16 %v3442_v50, %v3441_v49  ;;  %v3433_v49 = vld [vmem:[#allocation11 + $0x660] sm:$0xff]  ;;  %v3434_v50 = vld [vmem:[#allocation11 + $0x668] sm:$0xff] }
 0x39c   :  { %v5330_v63 = vadd.f32 %v2306_v58, %v1424_v41  ;;  %5246 = vmatpush3.bf16.msra.mxu1 %v5245_v2  ;;  %5216 = vmatprep.subr.bf16.mxu0 %v5215_v42  ;;  %v2617_v15 = vmul.f32 0.01, %v5327_v5  ;;  %vm2601_vm2 = vcmp.gt.f32.partialorder %v5327_v5, 0.0  ;;  %v3424_v41 = vld [vmem:[#allocation11 + $0x618] sm:$0xff]  ;;  %v3553_v2 = vld [vmem:[#allocation11 + $0x710] sm:$0xff]  ;;  %v5295_v58 = vpack.c.bf16 %v3572_v53, %v3571_v52  ;;  %v3564_v53 = vld [vmem:[#allocation11 + $0x768] sm:$0xff] }
 0x39d   :  { %v2618_v47 = vmul.f32 0.01, %v5328_v57  ;;  %5248 = vmatprep.subr.bf16.mxu1 %v5247_v51  ;;  %vm2602_vm0 = vcmp.gt.f32.partialorder %v5328_v57, 0.0  ;;  %v2619_v31 = vmul.f32 0.01, %v5329_v7  ;;  %vm2603_vm3 = vcmp.gt.f32.partialorder %v5329_v7, 0.0 }
 0x39e   :  { %v2620_v48 = vmul.f32 0.01, %v5330_v63  ;;  %vm2604_vm1 = vcmp.gt.f32.partialorder %v5330_v63, 0.0  ;;  %v2633_v42 = vsel %vm2601_vm2, %v5327_v5, %v2617_v15  ;;  %v5261_v28 = vpack.c.bf16 %v3424_v41, %v3423_v37  ;;  %v3427_v5 = vld [vmem:[#allocation11 + $0x630] sm:$0xff]  ;;  %v3450_v37 = vld [vmem:[#allocation11 + $0x6e8] sm:$0xff]  ;;  %v3579_v41 = vld [vmem:[#allocation11 + $0x7e0] sm:$0xff] }
 0x39f   :  { %5218 = vmatpush3.bf16.msra.mxu0 %v5217_v59  ;;  %v2634_v10 = vsel %vm2602_vm0, %v5328_v57, %v2618_v47  ;;  %v2635_v51 = vsel %vm2603_vm3, %v5329_v7, %v2619_v31  ;;  %v5293_v54 = vpack.c.bf16 %v3554_v46, %v3553_v2  ;;  %v3555_v57 = vld [vmem:[#allocation11 + $0x720] sm:$0xff]  ;;  %v3556_v59 = vld [vmem:[#allocation11 + $0x728] sm:$0xff]  ;;  %v3428_v47 = vld [vmem:[#allocation11 + $0x638] sm:$0xff]  ;;  %v5275_v22 = vpack.c.bf16 %v3448_v14, %v3447_v13 }
 0x3a0   :  { %5250 = vmatpush3.bf16.msra.mxu1 %v5249_v26  ;;  %3265 = vmatprep.mubr.f32.mxu0 %v2634_v10  ;;  %v2636_v18 = vsel %vm2604_vm1, %v5330_v63, %v2620_v48  ;;  %v3573_v63 = vld [vmem:[#allocation11 + $0x7b0] sm:$0xff]  ;;  %v3574_v26 = vld [vmem:[#allocation11 + $0x7b8] sm:$0xff]  ;;  %v5297_v3 = vpack.c.bf16 %v3556_v59, %v3555_v57  ;;  %v3446_v7 = vld [vmem:[#allocation11 + $0x6c8] sm:$0xff]  ;;  %v5269_v9 = vpack.c.bf16 %v3428_v47, %v3427_v5 }
 0x3a1   :  { %3395 = vmatprep.mubr.f32.mxu1 %v2636_v18  ;;  %5220 = vmatprep.subr.bf16.mxu0 %v5219_v45  ;;  %v3557_v45 = vld [vmem:[#allocation11 + $0x730] sm:$0xff]  ;;  %v5299_v27 = vpack.c.bf16 %v3574_v26, %v3573_v63  ;;  %v3575_v48 = vld [vmem:[#allocation11 + $0x7c0] sm:$0xff]  ;;  %v5271_v10 = vpack.c.bf16 %v3446_v7, %v3445_v6  ;;  %v3430_v18 = vld [vmem:[#allocation11 + $0x648] sm:$0xff]  ;;  %v5281_v29 = vpack.c.bf16 %v3434_v50, %v3433_v49 }
 0x3a2   :  { %5252 = vmatprep.subr.bf16.mxu1 %v5251_v8  ;;  %v3576_v8 = vld [vmem:[#allocation11 + $0x7c8] sm:$0xff]  ;;  %v5301_v40 = vpack.c.bf16 %v3558_v39, %v3557_v45  ;;  %v3577_v15 = vld [vmem:[#allocation11 + $0x7d0] sm:$0xff]  ;;  %v3566_v26 = vld [vmem:[#allocation11 + $0x778] sm:$0xff]  ;;  %v1436_v5 = vrot.slane %v5930_v23, %v1403_v35  ;;  %v1432_v47 = vrot.slane %v5930_v23, %v1399_v19  ;;  %v1440_v45 = vrot.slane %v5930_v23, %v1407_v21 }
 0x3a3   :  { %5222 = vmatpush3.bf16.msra.mxu0 %v5221_v11  ;;  %v3429_v11 = vld [vmem:[#allocation11 + $0x640] sm:$0xff]  ;;  %v3431_v31 = vld [vmem:[#allocation11 + $0x650] sm:$0xff]  ;;  %v3580_v2 = vld [vmem:[#allocation11 + $0x7e8] sm:$0xff] }
 0x3a4   :  { %5254 = vmatpush3.bf16.msra.mxu1 %v5253_v30  ;;  %5256 = vmatprep.subr.bf16.mxu0 %v5255_v12  ;;  %v3559_v30 = vld [vmem:[#allocation11 + $0x740] sm:$0xff]  ;;  %v5303_v12 = vpack.c.bf16 %v3576_v8, %v3575_v48  ;;  %v5273_v17 = vpack.c.bf16 %v3430_v18, %v3429_v11  ;;  %v5311_v52 = vpack.c.bf16 %v3580_v2, %v3579_v41  ;;  %v3435_v59 = vld [vmem:[#allocation11 + $0x670] sm:$0xff] }
 0x3a5   :  { %5288 = vmatprep.subr.bf16.mxu1 %v5287_v16  ;;  %v3578_v16 = vld [vmem:[#allocation11 + $0x7d8] sm:$0xff]  ;;  %v5305_v20 = vpack.c.bf16 %v3560_v61, %v3559_v30  ;;  %v3565_v63 = vld [vmem:[#allocation11 + $0x770] sm:$0xff]  ;;  %v3724_v14 = vld [vmem:[#allocation13 + $0x1] ss:$0 sm:$0xff] }
 0x3a6   :  { %3266 = vmatmul.mubr.f32.vlgmr.msra.gmra.mrb[14].mxu0 %v2633_v42  ;;  %v5277_v42 = vpack.c.bf16 %v3432_v32, %v3431_v31  ;;  %v3722_v31 = vld [vmem:[#allocation14] ss:$0 sm:$0xff]  ;;  %v3730_v49 = vld [vmem:[#allocation13 + $0x3] ss:$0 sm:$0xff] }
 0x3a7   :  { %3396 = vmatmul.mubr.f32.vlgmr.msra.gmra.mrb[14].mxu1 %v2635_v51  ;;  %5258 = vmatpush3.bf16.msra.mxu0 %v5257_v34  ;;  %v5307_v34 = vpack.c.bf16 %v3578_v16, %v3577_v15  ;;  %v3563_v51 = vld [vmem:[#allocation11 + $0x760] sm:$0xff] }
 0x3a8   :  { %5290 = vmatpush3.bf16.msra.mxu1 %v5289_v36  ;;  %5260 = vmatprep.subr.bf16.mxu0 %v5259_v38  ;;  %v3562_v36 = vld [vmem:[#allocation11 + $0x758] sm:$0xff]  ;;  %v3449_v38 = vld [vmem:[#allocation11 + $0x6e0] sm:$0xff]  ;;  %v5313_v57 = vpack.c.bf16 %v3564_v53, %v3563_v51 }
 0x3a9   :  { %5292 = vmatprep.subr.bf16.mxu1 %v5291_v44  ;;  %v5309_v44 = vpack.c.bf16 %v3562_v36, %v3561_v33  ;;  %v5279_v46 = vpack.c.bf16 %v3450_v37, %v3449_v38  ;;  %v3725_v38 = vld [vmem:[#allocation14 + $0x1] ss:$0 sm:$0xff] }
 0x3ab   :  { %5262 = vmatpush3.bf16.msra.mxu0 %v5261_v28  ;;  %v3451_v28 = vld [vmem:[#allocation11 + $0x6f0] sm:$0xff] }
 0x3ac   :  { %5294 = vmatpush3.bf16.msra.mxu1 %v5293_v54  ;;  %5264 = vmatprep.subr.bf16.mxu0 %v5263_v55  ;;  %v3452_v54 = vld [vmem:[#allocation11 + $0x6f8] sm:$0xff]  ;;  %v3581_v55 = vld [vmem:[#allocation11 + $0x7f0] sm:$0xff] }
 0x3ad   :  { %5296 = vmatprep.subr.bf16.mxu1 %v5295_v58  ;;  %v5283_v58 = vpack.c.bf16 %v3452_v54, %v3451_v28  ;;  %v5315_v62 = vpack.c.bf16 %v3582_v56, %v3581_v55  ;;  %v3728_v54 = vld [vmem:[#allocation14 + $0x2] ss:$0 sm:$0xff] }
 0x3af   :  { %5266 = vmatpush3.bf16.msra.mxu0 %v5265_v1  ;;  %v5285_v1 = vpack.c.bf16 %v3436_v60, %v3435_v59 }
 0x3b0   :  { %5298 = vmatpush3.bf16.msra.mxu1 %v5297_v3  ;;  %5268 = vmatprep.subr.bf16.mxu0 %v5267_v4  ;;  %v5317_v3 = vpack.c.bf16 %v3566_v26, %v3565_v63  ;;  %v1428_v4 = vrot.slane %v5930_v23, %v1395_v43  ;;  %v3733_v63 = vld [vmem:[#allocation13 + $0x4] ss:$0 sm:$0xff] }
 0x3b1   :  { %5300 = vmatprep.subr.bf16.mxu1 %v5299_v27 }
 0x3b3   :  { %5270 = vmatpush3.bf16.msra.mxu0 %v5269_v9 }
 0x3b4   :  { %5302 = vmatpush3.bf16.msra.mxu1 %v5301_v40  ;;  %5272 = vmatprep.subr.bf16.mxu0 %v5271_v10 }
 0x3b5   :  { %5304 = vmatprep.subr.bf16.mxu1 %v5303_v12  ;;  %v3721_v12 = vld [vmem:[#allocation13] ss:$0 sm:$0xff] }
 0x3b7   :  { %5274 = vmatpush3.bf16.msra.mxu0 %v5273_v17 }
 0x3b8   :  { %5306 = vmatpush3.bf16.msra.mxu1 %v5305_v20  ;;  %5276 = vmatprep.subr.bf16.mxu0 %v5275_v22 }
 0x3b9   :  { %5308 = vmatprep.subr.bf16.mxu1 %v5307_v34 }
 0x3bb   :  { %5278 = vmatpush3.bf16.msra.mxu0 %v5277_v42  ;;  %v3727_v42 = vld [vmem:[#allocation13 + $0x2] ss:$0 sm:$0xff] }
 0x3bc   :  { %5310 = vmatpush3.bf16.msra.mxu1 %v5309_v44  ;;  %5280 = vmatprep.subr.bf16.mxu0 %v5279_v46 }
 0x3bd   :  { %5312 = vmatprep.subr.bf16.mxu1 %v5311_v52 }
 0x3bf   :  { %5282 = vmatpush3.bf16.msra.mxu0 %v5281_v29 }
 0x3c0   :  { %5314 = vmatpush3.bf16.msra.mxu1 %v5313_v57  ;;  %5284 = vmatprep.subr.bf16.mxu0 %v5283_v58  ;;  %v3731_v58 = vld [vmem:[#allocation14 + $0x3] ss:$0 sm:$0xff] }
 0x3c1   :  { %5316 = vmatprep.subr.bf16.mxu1 %v5315_v62 }
 0x3c3   :  { %5286 = vmatpush3.bf16.msra.mxu0 %v5285_v1 }
 0x3c4   :  { %5318 = vmatpush3.bf16.msra.mxu1 %v5317_v3  ;;  %v3736_v3 = vld [vmem:[#allocation13 + $0x5] ss:$0 sm:$0xff] }
 0x419   :  { %v2446_v27 = vpop.f32.mrb[8].mxu0 }
 0x41a   :  { %v5331_v39 = vadd.f32 %v2446_v27, %v1428_v4  ;;  %v2588_v6 = vpop.f32.mrb[8].mxu1  ;;  %v2448_v7 = vpop.f32.mrb[9].mxu0 }
 0x41b   :  { %v5333_v48 = vadd.f32 %v2588_v6, %v1436_v5  ;;  %v5332_v8 = vadd.f32 %v2448_v7, %v1432_v47  ;;  %v2590_v9 = vpop.f32.mrb[9].mxu1  ;;  %v3737_v7 = vld [vmem:[#allocation14 + $0x5] ss:$0 sm:$0xff] }
 0x41c   :  { %v2621_v43 = vmul.f32 0.01, %v5331_v39  ;;  %v5334_v40 = vadd.f32 %v2590_v9, %v1440_v45  ;;  %vm2605_vm4 = vcmp.gt.f32.partialorder %v5331_v39, 0.0 }
 0x41d   :  { %v2623_v10 = vmul.f32 0.01, %v5333_v48  ;;  %v2622_v35 = vmul.f32 0.01, %v5332_v8  ;;  %vm2606_vm5 = vcmp.gt.f32.partialorder %v5332_v8, 0.0  ;;  %vm2607_vm6 = vcmp.gt.f32.partialorder %v5333_v48, 0.0 }
 0x41e   :  { %v2624_v11 = vmul.f32 0.01, %v5334_v40  ;;  %vm2608_vm7 = vcmp.gt.f32.partialorder %v5334_v40, 0.0  ;;  %v2637_v21 = vsel %vm2605_vm4, %v5331_v39, %v2621_v43  ;;  %v3734_v39 = vld [vmem:[#allocation14 + $0x4] ss:$0 sm:$0xff] }
 0x41f   :  { %v2638_v19 = vsel %vm2606_vm5, %v5332_v8, %v2622_v35  ;;  %v2639_v23 = vsel %vm2607_vm6, %v5333_v48, %v2623_v10  ;;  %v3739_v35 = vld [vmem:[#allocation13 + $0x6] ss:$0 sm:$0xff] }
 0x420   :  { %3525 = vmatprep.mubr.f32.mxu0 %v2638_v19  ;;  %v2640_v25 = vsel %vm2608_vm7, %v5334_v40, %v2624_v11 }
 0x421   :  { %3655 = vmatprep.mubr.f32.mxu1 %v2640_v25  ;;  %3526 = vmatmul.mubr.f32.vlgmr.msra.gmra.mrb[16].mxu0 %v2637_v21  ;;  %v3742_v25 = vld [vmem:[#allocation13 + $0x7] ss:$0 sm:$0xff] }
 0x422   :  { %3656 = vmatmul.mubr.f32.vlgmr.msra.gmra.mrb[16].mxu1 %v2639_v23 }
 0x439   :  { %v3779_v18 = vpop.f32.mrb[10].mxu0 }
 0x43a   :  { %v3814_v30 = vpop.f32.mrb[10].mxu1  ;;  %v3780_v61 = vpop.f32.mrb[11].mxu0 }
 0x43b   :  { %v3781_v13 = vadd.f32 %v3780_v61, %v3779_v18  ;;  %v3815_v15 = vpop.f32.mrb[11].mxu1  ;;  %v3740_v61 = vld [vmem:[#allocation14 + $0x6] ss:$0 sm:$0xff] }
 0x43c   :  { %v3816_v16 = vadd.f32 %v3815_v15, %v3814_v30 }
 0x43d   :  { %v2749_v17 = vadd.f32 %v3781_v13, %v3721_v12 }
 0x43e   :  { %v2878_v20 = vadd.f32 %v3816_v16, %v3724_v14  ;;  %v3743_v14 = vld [vmem:[#allocation14 + $0x7] ss:$0 sm:$0xff] }
 0x43f   :  { %vm2752_vm8 = vcmp.gt.f32.partialorder %v2749_v17, 0.0  ;;  %v2753_v22 = vmul.f32 0.01, %v2749_v17 }
 0x440   :  { %vm2881_vm9 = vcmp.gt.f32.partialorder %v2878_v20, 0.0  ;;  %v2882_v32 = vmul.f32 0.01, %v2878_v20 }
 0x441   :  { %v2754_v33 = vsel %vm2752_vm8, %v2749_v17, %v2753_v22  ;;  %vm3694_vm8 = vcmask 64512  }
 0x442   :  { %v2762_v34 = vmul.f32 %v3722_v31, %v2754_v33  ;;  %v2883_v36 = vsel %vm2881_vm9, %v2878_v20, %v2882_v32  ;;  %v2642_v31 = vand.u32 127, %v158_v24 }
 0x443   :  { %v2892_v37 = vmul.f32 %v3725_v38, %v2883_v36 }
 0x444   :  { %2763 = vadd.xlane.f32.xlu0 %v2762_v34  ;;  %vm2895_vm0 = vcmp.eq.s32.totalorder %v2642_v31, 1  ;;  %vm2765_vm1 = vcmp.eq.s32.totalorder %v2642_v31, 0  ;;  %vm3025_vm2 = vcmp.eq.s32.totalorder %v2642_v31, 2  ;;  %vm3155_vm3 = vcmp.eq.s32.totalorder %v2642_v31, 3 }
 0x445   :  { %v3726_v33 = vsel %vm2895_vm0, 1.0, %v5622_v0  ;;  %v3723_v36 = vsel %vm2765_vm1, 1.0, %v5622_v0  ;;  %v3729_v38 = vsel %vm3025_vm2, 1.0, %v5622_v0  ;;  %vm3285_vm4 = vcmp.eq.s32.totalorder %v2642_v31, 4 }
 0x446   :  { %v3735_v24 = vsel %vm3285_vm4, 1.0, %v5622_v0  ;;  %vm3415_vm5 = vcmp.eq.s32.totalorder %v2642_v31, 5  ;;  %vm3545_vm6 = vcmp.eq.s32.totalorder %v2642_v31, 6  ;;  %vm3675_vm7 = vcmp.eq.s32.totalorder %v2642_v31, 7 }
 0x448   :  { %2893 = vadd.xlane.f32.xlu0 %v2892_v37 }
 0x459   :  { %v3849_v41 = vpop.f32.mrb[12].mxu0 }
 0x45a   :  { %v3884_v2 = vpop.f32.mrb[12].mxu1  ;;  %v3850_v44 = vpop.f32.mrb[13].mxu0 }
 0x45b   :  { %v3851_v46 = vadd.f32 %v3850_v44, %v3849_v41  ;;  %v3885_v50 = vpop.f32.mrb[13].mxu1  ;;  %v3732_v41 = vsel %vm3155_vm3, 1.0, %v5622_v0 }
 0x45c   :  { %v3886_v51 = vadd.f32 %v3885_v50, %v3884_v2 }
 0x45d   :  { %v3008_v52 = vadd.f32 %v3851_v46, %v3727_v42 }
 0x45e   :  { %v3138_v53 = vadd.f32 %v3886_v51, %v3730_v49 }
 0x45f   :  { %vm3011_vm10 = vcmp.gt.f32.partialorder %v3008_v52, 0.0  ;;  %v3012_v28 = vmul.f32 0.01, %v3008_v52 }
 0x460   :  { %vm3141_vm11 = vcmp.gt.f32.partialorder %v3138_v53, 0.0  ;;  %v3142_v55 = vmul.f32 0.01, %v3138_v53 }
 0x461   :  { %v3013_v56 = vsel %vm3011_vm10, %v3008_v52, %v3012_v28  ;;  %v3738_v28 = vsel %vm3415_vm5, 1.0, %v5622_v0 }
 0x462   :  { %v3022_v29 = vmul.f32 %v3728_v54, %v3013_v56  ;;  %v3143_v57 = vsel %vm3141_vm11, %v3138_v53, %v3142_v55  ;;  %v3741_v56 = vsel %vm3545_vm6, 1.0, %v5622_v0 }
 0x463   :  { %v3152_v59 = vmul.f32 %v3731_v58, %v3143_v57  ;;  %v3744_v57 = vsel %vm3675_vm7, 1.0, %v5622_v0 }
 0x464   :  { %3023 = vadd.xlane.f32.xlu1 %v3022_v29 }
 0x468   :  { %3153 = vadd.xlane.f32.xlu1 %v3152_v59 }
 0x479   :  { %v3919_v60 = vpop.f32.mrb[14].mxu0 }
 0x47a   :  { %v3954_v62 = vpop.f32.mrb[14].mxu1  ;;  %v3920_v26 = vpop.f32.mrb[15].mxu0 }
 0x47b   :  { %v3921_v1 = vadd.f32 %v3920_v26, %v3919_v60  ;;  %v3955_v4 = vpop.f32.mrb[15].mxu1 }
 0x47c   :  { %v3956_v5 = vadd.f32 %v3955_v4, %v3954_v62 }
 0x47d   :  { %v3268_v47 = vadd.f32 %v3921_v1, %v3733_v63  ;;  %v3745_v1 = vld [vmem:[#allocation16] ss:$0 sm:$0xff] }
 0x47e   :  { %v3398_v45 = vadd.f32 %v3956_v5, %v3736_v3 }
 0x47f   :  { %vm3271_vm12 = vcmp.gt.f32.partialorder %v3268_v47, 0.0  ;;  %v3272_v27 = vmul.f32 0.01, %v3268_v47 }
 0x480   :  { %vm3401_vm13 = vcmp.gt.f32.partialorder %v3398_v45, 0.0  ;;  %v3402_v6 = vmul.f32 0.01, %v3398_v45 }
 0x481   :  { %v3273_v48 = vsel %vm3271_vm12, %v3268_v47, %v3272_v27 }
 0x482   :  { %v3403_v8 = vsel %vm3401_vm13, %v3398_v45, %v3402_v6  ;;  %v3282_v9 = vmul.f32 %v3734_v39, %v3273_v48 }
 0x483   :  { %v3412_v43 = vmul.f32 %v3737_v7, %v3403_v8 }
 0x484   :  { %3283 = vadd.xlane.f32.xlu0 %v3282_v9 }
 0x485   :  { %3413 = vadd.xlane.f32.xlu1 %v3412_v43 }
 0x4d1   :  { %v2764_v22 = vpop.xlane.xlu0 %2763 }
 0x4d2   :  { %v2768_v42 = vmul.f32 %v3723_v36, %v2764_v22 }
 0x4d5   :  { %v2894_v34 = vpop.xlane.xlu0 %2893 }
 0x4d6   :  { %v2898_v37 = vmul.f32 %v3726_v33, %v2894_v34 }
 0x4d8   :  { %v2899_v49 = vadd.f32 %v2898_v37, %v2768_v42 }
 0x4f1   :  { %v3024_v32 = vpop.xlane.xlu1 %3023 }
 0x4f2   :  { %v3028_v44 = vmul.f32 %v3729_v38, %v3024_v32 }
 0x4f4   :  { %v3989_v40 = vpop.f32.mrb[16].mxu0  ;;  %v3029_v51 = vadd.f32 %v3028_v44, %v2899_v49 }
 0x4f5   :  { %v4024_v10 = vpop.f32.mrb[16].mxu1  ;;  %v3990_v11 = vpop.f32.mrb[17].mxu0 }
 0x4f6   :  { %v3991_v19 = vadd.f32 %v3990_v11, %v3989_v40  ;;  %v4025_v21 = vpop.f32.mrb[17].mxu1  ;;  %v3154_v2 = vpop.xlane.xlu1 %3153 }
 0x4f7   :  { %v4026_v23 = vadd.f32 %v4025_v21, %v4024_v10  ;;  %v3158_v50 = vmul.f32 %v3732_v41, %v3154_v2 }
 0x4f8   :  { %v3528_v18 = vadd.f32 %v3991_v19, %v3739_v35 }
 0x4f9   :  { %v3658_v30 = vadd.f32 %v4026_v23, %v3742_v25  ;;  %v3159_v53 = vadd.f32 %v3158_v50, %v3029_v51 }
 0x4fa   :  { %vm3531_vm14 = vcmp.gt.f32.partialorder %v3528_v18, 0.0  ;;  %v3532_v12 = vmul.f32 0.01, %v3528_v18 }
 0x4fb   :  { %vm3661_vm15 = vcmp.gt.f32.partialorder %v3658_v30, 0.0  ;;  %v3662_v13 = vmul.f32 0.01, %v3658_v30 }
 0x4fc   :  { %v3533_v15 = vsel %vm3531_vm14, %v3528_v18, %v3532_v12 }
 0x4fd   :  { %v3663_v16 = vsel %vm3661_vm15, %v3658_v30, %v3662_v13  ;;  %v3542_v17 = vmul.f32 %v3740_v61, %v3533_v15 }
 0x4fe   :  { %v3672_v20 = vmul.f32 %v3743_v14, %v3663_v16 }
 0x4ff   :  { %3543 = vadd.xlane.f32.xlu0 %v3542_v17 }
 0x500   :  { %3673 = vadd.xlane.f32.xlu1 %v3672_v20 }
 0x511   :  { %v3284_v46 = vpop.xlane.xlu0 %3283 }
 0x512   :  { %v3288_v52 = vmul.f32 %v3735_v24, %v3284_v46  ;;  %v3414_v54 = vpop.xlane.xlu1 %3413 }
 0x513   :  { %v3418_v29 = vmul.f32 %v3738_v28, %v3414_v54 }
 0x514   :  { %v3289_v55 = vadd.f32 %v3288_v52, %v3159_v53 }
 0x516   :  { %v3419_v60 = vadd.f32 %v3418_v29, %v3289_v55 }
 0x58c   :  { %v3544_v58 = vpop.xlane.xlu0 %3543 }
 0x58d   :  { %v3674_v59 = vpop.xlane.xlu1 %3673  ;;  %v3548_v62 = vmul.f32 %v3741_v56, %v3544_v58 }
 0x58e   :  { %v3678_v63 = vmul.f32 %v3744_v57, %v3674_v59 }
 0x58f   :  { %v3549_v26 = vadd.f32 %v3548_v62, %v3419_v60 }
 0x591   :  { %v3679_v3 = vadd.f32 %v3678_v63, %v3549_v26 }
 0x593   :  { %v3687_v4 = vadd.f32 %v3745_v1, %v3679_v3 }
 0x595   :  { %v3746_v5 = vmul.f32 -1.442695, %v3687_v4 }
 0x597   :  { %5370 = vpow2.f32 %v3746_v5 }
 0x5a1   :  { %v5371_v47 = vpop.eup %5370 }
 0x5a2   :  { %v3691_v45 = vadd.f32 1.0, %v5371_v47 }
 0x5a4   :  { %5372 = vrcp.f32 %v3691_v45 }
 0x5ae   :  { %v5373_v27 = vpop.eup %5372 }
 0x5af   :  { %3695 = vst.msk [vmem:[#allocation17] sm:$0xff] %vm3694_vm8, %v5373_v27 }
 0x5b0   :  { %5583 = shalt.err (!%p5580_p6)
}
 0x5b1   :  { %s5584_s27 = scalar_lea.hbm %s5983_s9, 128 }
 0x5b2   :  { %p5585_p7 = scmp.ne.s32.totalorder %s5983_s9, %s5584_s27  ;;  %p5588_p8 = scmp.lt.u32.totalorder %s5584_s27, %s5983_s9 }
 0x5b4   :  { %p5590_p9 = pnand %p5588_p8, %p5585_p7 }
 0x5b6   :  { %5593 = shalt.err (!%p5590_p9)
}
 0x5b7   :  { %3705 = dma.vmem_to_hbm [thread:$0]  %s3703_s16, 128, %s5983_s9, [#allocation4]  }
 0x5b8   :  { %5604 = dma.done.wait [#allocation4], 128  }
 0x5b9   :  { %5605 = vsyncadd [#allocation4], 4294967168 }
 0x5ba   :  { %3709 = vsyncpa [#allocation3], 1 }
 0x5bb   :  { %3710 = vsyncpa [#allocation6], 1 }
 0x5bc   :  { %3711 = vsyncpa [#allocation9], 1 }
 0x5bd   :  { %3712 = vsyncpa [#allocation12], 1 }
 0x5be   :  { %3713 = vsyncpa [#allocation15], 1 }
 0x5bf   :  { %3714 = vsyncpa [#allocation4], 1 }

</bundles_post_ra>
